<compile_context>
chip_gen: v6e
topology: v6e:2x2x1
jax: 0.10.0
libtpu: 0.0.40
codegen_flags: <defaults>
</compile_context>

<pallas_src>
import math
import numpy as np
import jax
import jax.numpy as jnp
from jax.experimental import pallas as pl
from jax.experimental.pallas import tpu as pltpu

LOG2PI = math.log(2.0 * math.pi)


def _softplus(v):
    # matches torch.nn.Softplus (threshold=20); clamp avoids inf in exp branch
    return jnp.where(v > 20.0, v, jnp.log1p(jnp.exp(jnp.minimum(v, 20.0))))


# -----------------------------------------------------------------------------
# Kernel
# -----------------------------------------------------------------------------
def _make_kernel(T, B, cfg, layout):
    A, L = cfg['n_agents'], cfg['n_layers']
    X, Y, Z, H, R = cfg['x_dim'], cfg['y_dim'], cfg['z_dim'], cfg['h_dim'], cfg['rnn_dim']
    AX, AZ, AH = A * X, A * Z, A * H

    def dotf(a, b):
        # bf16 MXU operands, f32 accumulation (loss math stays f32 outside)
        return jnp.dot(a.astype(jnp.bfloat16), b, preferred_element_type=jnp.float32)

    def kernel(xy_ref, eps_ref, w_ref, b_ref, out_ref):
        # ---- load / slice weights & biases ONCE (hoisted out of the unroll) ----
        def wblk(name):
            r, c0, c1 = layout[name]
            return w_ref[0:r, c0:c1]

        w_pre, w_ep1_h, w_ep2 = wblk('pre'), wblk('ep1_h'), wblk('ep2')
        w_hep, w_d1, w_d2, w_hd = wblk('hep'), wblk('d1'), wblk('d2'), wblk('hd')
        w_g = [wblk(f'g{l}') for l in range(L)]

        bias = b_ref[...]

        def brow(i, width):  # pre-broadcast once; reused by every unrolled step
            return jnp.broadcast_to(bias[i:i + 1, :width], (B, width))

        b_ep1, b_ep2 = brow(0, 2 * AH), brow(1, 2 * AH)
        b_hep, b_d1 = brow(2, 4 * AZ), brow(3, AH)
        b_d2, b_hd = brow(4, AH), brow(5, 2 * AX)
        b_g = [brow(6 + l, 4 * R) for l in range(L)]

        # ---- hoisted input-only matmul: one MXU pass covers ALL time steps ----
        # output columns: [ enc+prior layer-1 | dec layer-1 (y part) | GRU0 (y part) ]
        pre = dotf(xy_ref[...], w_pre)                     # ((T-1)*B, 2AH+AH+4R) f32
        pre_ep1 = pre[:, 0:2 * AH]
        pre_d1 = pre[:, 2 * AH:2 * AH + AH]
        pre_g0 = pre[:, 2 * AH + AH:2 * AH + AH + 4 * R]

        h = [jnp.zeros((B, R), jnp.float32) for _ in range(L)]
        kl_acc = jnp.zeros((B, AZ), jnp.float32)
        re_acc = jnp.zeros((B, AX), jnp.float32)

        for t in range(T - 1):                             # static unroll (tiny T)
            r0 = t * B
            x_t = xy_ref[r0:r0 + B, 0:AX]                  # (B, AX) f32 loss target
            eps_t = eps_ref[r0:r0 + B, :]                  # (B, AZ) noise
            h_top = h[L - 1]

            # encoder + prior (layers 1-2 + all four heads), every agent fused
            ep1 = jax.nn.relu(pre_ep1[r0:r0 + B] + dotf(h_top, w_ep1_h) + b_ep1)
            ep2 = jax.nn.relu(dotf(ep1, w_ep2) + b_ep2)
            heads = dotf(ep2, w_hep) + b_hep               # [enc_mu|enc_sd|pri_mu|pri_sd]
            enc_mean = heads[:, 0:AZ]
            enc_std = _softplus(heads[:, AZ:2 * AZ])
            pri_mean = heads[:, 2 * AZ:3 * AZ]
            pri_std = _softplus(heads[:, 3 * AZ:4 * AZ])
            z_all = enc_mean + enc_std * eps_t             # reparameterized sample

            # decoder (y contribution hoisted; [z_all|h_top] fused into one matmul)
            d1 = jax.nn.relu(pre_d1[r0:r0 + B]
                             + dotf(jnp.concatenate([z_all, h_top], axis=1), w_d1)
                             + b_d1)
            d2 = jax.nn.relu(dotf(d1, w_d2) + b_d2)
            dheads = dotf(d2, w_hd) + b_hd                 # [dec_mu|dec_sd]
            dec_mean = dheads[:, 0:AX]
            dec_std = _softplus(dheads[:, AX:2 * AX])

            # losses: elementwise accumulation, single reduction at the very end
            inv_pvar = pl.reciprocal(pri_std * pri_std, approx=True)
            dmu = enc_mean - pri_mean
            kl_acc = kl_acc + (2.0 * jnp.log(pri_std / enc_std)
                               + (enc_std * enc_std + dmu * dmu) * inv_pvar - 1.0)
            inv_dvar = pl.reciprocal(dec_std * dec_std, approx=True)
            dx = x_t - dec_mean
            re_acc = re_acc + dx * dx * inv_dvar + 2.0 * jnp.log(dec_std) + LOG2PI

            # multi-layer GRU: ONE matmul per layer, gate columns [r|z|n_i|n_h]
            new_h = []
            g = (pre_g0[r0:r0 + B]
                 + dotf(jnp.concatenate([z_all, h[0]], axis=1), w_g[0]) + b_g[0])
            for l in range(L):
                if l > 0:
                    g = dotf(jnp.concatenate([new_h[l - 1], h[l]], axis=1),
                             w_g[l]) + b_g[l]
                r = jax.nn.sigmoid(g[:, 0:R])
                zg = jax.nn.sigmoid(g[:, R:2 * R])
                n = jnp.tanh(g[:, 2 * R:3 * R] + r * g[:, 3 * R:4 * R])
                new_h.append((1.0 - zg) * n + zg * h[l])
            h = new_h

        # single reduction + single (1, 2) store: lane0 = kl, lane1 = recon
        kl = 0.5 * jnp.sum(kl_acc, keepdims=True)          # (1, 1)
        re = 0.5 * jnp.sum(re_acc, keepdims=True)          # (1, 1)
        lane = jax.lax.broadcasted_iota(jnp.int32, (1, 2), 1)
        out_ref[...] = jnp.where(lane == 0, kl, re)

    return kernel


# -----------------------------------------------------------------------------
# Host-side packing: all weights into ONE bf16 slab (128-aligned column slots),
# all biases into ONE f32 slab. Agents / enc+prior branches are stacked along
# output lanes, block-diagonal where an input is agent-private.
# -----------------------------------------------------------------------------
def pack_params(p, cfg):
    A, L = cfg['n_agents'], cfg['n_layers']
    X, Y, Z, H, R = cfg['x_dim'], cfg['y_dim'], cfg['z_dim'], cfg['h_dim'], cfg['rnn_dim']
    AX, AZ, AH = A * X, A * Z, A * H
    npf = lambda a: np.asarray(a, dtype=np.float32)

    n_pre = 2 * AH + AH + 4 * R          # [enc+prior L1 | dec L1 (y) | GRU0 gates (y)]
    w_pre = np.zeros((AX + Y, n_pre), np.float32)
    w_ep1_h = np.zeros((R, 2 * AH), np.float32)
    w_ep2 = np.zeros((2 * AH, 2 * AH), np.float32)
    w_hep = np.zeros((2 * AH, 4 * AZ), np.float32)
    w_d1 = np.zeros((AZ + R, AH), np.float32)
    w_d2 = np.zeros((AH, AH), np.float32)
    w_hd = np.zeros((AH, 2 * AX), np.float32)
    off_d1y, off_g0y = 2 * AH, 2 * AH + AH

    for i in range(A):
        rh = slice(i * H, (i + 1) * H)               # encoder / decoder block
        rp = slice(AH + i * H, AH + (i + 1) * H)     # prior block
        rz = slice(i * Z, (i + 1) * Z)
        rx = slice(i * X, (i + 1) * X)

        # hoisted input-only rows: 0:AX = x_all(t+1), AX:AX+Y = y(t)
        w_pre[rx, rh] = npf(p['enc_w1x'][i])
        w_pre[AX:AX + Y, rh] = npf(p['enc_w1y'][i])
        w_pre[AX:AX + Y, rp] = npf(p['pri_w1y'][i])
        w_pre[AX:AX + Y, off_d1y + i * H:off_d1y + (i + 1) * H] = npf(p['dec_w1y'][i])

        w_ep1_h[:, rh] = npf(p['enc_w1h'][i])
        w_ep1_h[:, rp] = npf(p['pri_w1h'][i])
        w_ep2[rh, rh] = npf(p['enc_w2'][i])
        w_ep2[rp, rp] = npf(p['pri_w2'][i])
        w_hep[rh, 0 * AZ + i * Z:0 * AZ + (i + 1) * Z] = npf(p['enc_mw'][i])
        w_hep[rh, 1 * AZ + i * Z:1 * AZ + (i + 1) * Z] = npf(p['enc_sw'][i])
        w_hep[rp, 2 * AZ + i * Z:2 * AZ + (i + 1) * Z] = npf(p['pri_mw'][i])
        w_hep[rp, 3 * AZ + i * Z:3 * AZ + (i + 1) * Z] = npf(p['pri_sw'][i])

        w_d1[rz, rh] = npf(p['dec_w1z'][i])
        w_d1[AZ:AZ + R, rh] = npf(p['dec_w1h'][i])
        w_d2[rh, rh] = npf(p['dec_w2'][i])
        w_hd[rh, 0 * AX + i * X:0 * AX + (i + 1) * X] = npf(p['dec_mw'][i])
        w_hd[rh, 1 * AX + i * X:1 * AX + (i + 1) * X] = npf(p['dec_sw'][i])

    # ---- GRU: gate layout [r | z | n_i | n_h] so each layer is ONE matmul ----
    gru = p['gru']
    R3 = 3 * R
    W_ihy = npf(gru[0])                          # (Y, 3R)
    W_ihz = npf(gru[1]).reshape(AZ, R3)          # (AZ, 3R) agent-major rows
    b_ih0 = npf(gru[2]).reshape(R3)
    W_hh0 = npf(gru[3])                          # (R, 3R)
    b_hh0 = npf(gru[4]).reshape(R3)
    w_pre[AX:AX + Y, off_g0y:off_g0y + R3] = W_ihy   # y part of [r|z|n_i], n_h = 0

    w_g, b_g = [], []
    w0 = np.zeros((AZ + R, 4 * R), np.float32)       # LHS rows = [z_all | h0]
    w0[0:AZ, 0:R3] = W_ihz
    w0[AZ:AZ + R, 0:2 * R] = W_hh0[:, 0:2 * R]
    w0[AZ:AZ + R, 3 * R:4 * R] = W_hh0[:, 2 * R:R3]
    b0 = np.zeros(4 * R, np.float32)
    b0[0:2 * R] = b_ih0[0:2 * R] + b_hh0[0:2 * R]
    b0[2 * R:3 * R] = b_ih0[2 * R:R3]
    b0[3 * R:4 * R] = b_hh0[2 * R:R3]
    w_g.append(w0); b_g.append(b0)
    for l in range(1, L):
        base = 5 + 4 * (l - 1)
        W_ih = npf(gru[base]); b_ih = npf(gru[base + 1]).reshape(R3)
        W_hh = npf(gru[base + 2]); b_hh = npf(gru[base + 3]).reshape(R3)
        wl = np.zeros((2 * R, 4 * R), np.float32)    # LHS rows = [h_{l-1} | h_l]
        wl[0:R, 0:R3] = W_ih
        wl[R:2 * R, 0:2 * R] = W_hh[:, 0:2 * R]
        wl[R:2 * R, 3 * R:4 * R] = W_hh[:, 2 * R:R3]
        bl = np.zeros(4 * R, np.float32)
        bl[0:2 * R] = b_ih[0:2 * R] + b_hh[0:2 * R]
        bl[2 * R:3 * R] = b_ih[2 * R:R3]
        bl[3 * R:4 * R] = b_hh[2 * R:R3]
        w_g.append(wl); b_g.append(bl)

    # ---- bias slab: one row per layer, zero-padded to the widest ----
    bias_rows = [
        np.concatenate([npf(p['enc_b1']).reshape(AH), npf(p['pri_b1']).reshape(AH)]),
        np.concatenate([npf(p['enc_b2']).reshape(AH), npf(p['pri_b2']).reshape(AH)]),
        np.concatenate([npf(p['enc_mb']).reshape(AZ), npf(p['enc_sb']).reshape(AZ),
                        npf(p['pri_mb']).reshape(AZ), npf(p['pri_sb']).reshape(AZ)]),
        npf(p['dec_b1']).reshape(AH),
        npf(p['dec_b2']).reshape(AH),
        np.concatenate([npf(p['dec_mb']).reshape(AX), npf(p['dec_sb']).reshape(AX)]),
    ] + b_g
    wmax = max(r.shape[0] for r in bias_rows)
    b_slab = np.zeros((len(bias_rows), wmax), np.float32)
    for i, row in enumerate(bias_rows):
        b_slab[i, :row.shape[0]] = row

    # ---- weight slab: 128-aligned column slots, rows start at 0 ----
    blocks = [('pre', w_pre), ('ep1_h', w_ep1_h), ('ep2', w_ep2), ('hep', w_hep),
              ('d1', w_d1), ('d2', w_d2), ('hd', w_hd)]
    blocks += [(f'g{l}', w_g[l]) for l in range(L)]
    LANE = 128
    layout, off, max_rows = {}, 0, 0
    for name, w in blocks:
        r, c = w.shape
        layout[name] = (r, off, off + c)
        off += -(-c // LANE) * LANE
        max_rows = max(max_rows, r)
    max_rows = -(-max_rows // 8) * 8
    w_slab = np.zeros((max_rows, off), np.float32)
    for name, w in blocks:
        r, c0, c1 = layout[name]
        w_slab[:r, c0:c1] = w

    return (jnp.asarray(w_slab, dtype=jnp.bfloat16),
            jnp.asarray(b_slab, dtype=jnp.float32), layout)


# -----------------------------------------------------------------------------
# Wrapper
# -----------------------------------------------------------------------------
def vrnn_mixed_pallas(states, eps, params, cfg):
    """states: (T, B, y_dim) f32; eps: (T-1, n_agents, B, z_dim) f32 noise."""
    T, B, Y = states.shape
    A, L = cfg['n_agents'], cfg['n_layers']
    X, Z = cfg['x_dim'], cfg['z_dim']
    AX, AZ = A * X, A * Z
    assert Y == cfg['y_dim']
    assert X == 2, "VRNN_MIXED hard-codes agent slices states[:, 2i:2i+2]"
    assert AX <= Y, "need n_agents * x_dim <= y_dim"

    # layout plumbing: per-step LHS rows [x_all(t+1) | y(t)], flat over steps
    xy_flat = jnp.concatenate([states[1:, :, :AX], states[:-1]], axis=-1)
    xy_flat = xy_flat.reshape((T - 1) * B, AX + Y)
    eps_flat = eps.transpose(0, 2, 1, 3).reshape((T - 1) * B, AZ)  # agent-major lanes

    w_slab, b_slab, layout = pack_params(params, cfg)
    kernel = _make_kernel(T, B, cfg, layout)

    vspec = lambda: pl.BlockSpec(memory_space=pltpu.MemorySpace.VMEM)
    out = pl.pallas_call(
        kernel,
        out_shape=jax.ShapeDtypeStruct((1, 2), jnp.float32),
        in_specs=[vspec() for _ in range(4)],
        out_specs=vspec(),
    )(xy_flat, eps_flat, w_slab, b_slab)
    return out[0, 0], out[0, 1]


# -----------------------------------------------------------------------------
# Deterministic init (PyTorch-style uniform(-1/sqrt(fan_in), 1/sqrt(fan_in)))
# -----------------------------------------------------------------------------
def init_params(key, cfg):
    A, L = cfg['n_agents'], cfg['n_layers']
    X, Y, Z, H, R = cfg['x_dim'], cfg['y_dim'], cfg['z_dim'], cfg['h_dim'], cfg['rnn_dim']
    keys = jax.random.split(key, 64)
    ctr = iter(range(64))

    def u(shape, fan_in):
        k = 1.0 / math.sqrt(fan_in)
        return jax.random.uniform(keys[next(ctr)], shape, jnp.float32, -k, k)

    p = {}
    e_in, pr_in, d_in = X + Y + R, Y + R, Y + Z + R
    p['enc_w1x'] = u((A, X, H), e_in); p['enc_w1y'] = u((A, Y, H), e_in)
    p['enc_w1h'] = u((A, R, H), e_in); p['enc_b1'] = u((A, 1, H), e_in)
    p['enc_w2'] = u((A, H, H), H);     p['enc_b2'] = u((A, 1, H), H)
    p['enc_mw'] = u((A, H, Z), H);     p['enc_mb'] = u((A, 1, Z), H)
    p['enc_sw'] = u((A, H, Z), H);     p['enc_sb'] = u((A, 1, Z), H)
    p['pri_w1y'] = u((A, Y, H), pr_in); p['pri_w1h'] = u((A, R, H), pr_in)
    p['pri_b1'] = u((A, 1, H), pr_in)
    p['pri_w2'] = u((A, H, H), H);     p['pri_b2'] = u((A, 1, H), H)
    p['pri_mw'] = u((A, H, Z), H);     p['pri_mb'] = u((A, 1, Z), H)
    p['pri_sw'] = u((A, H, Z), H);     p['pri_sb'] = u((A, 1, Z), H)
    p['dec_w1y'] = u((A, Y, H), d_in); p['dec_w1z'] = u((A, Z, H), d_in)
    p['dec_w1h'] = u((A, R, H), d_in); p['dec_b1'] = u((A, 1, H), d_in)
    p['dec_w2'] = u((A, H, H), H);     p['dec_b2'] = u((A, 1, H), H)
    p['dec_mw'] = u((A, H, X), H);     p['dec_mb'] = u((A, 1, X), H)
    p['dec_sw'] = u((A, H, X), H);     p['dec_sb'] = u((A, 1, X), H)

    gru = []
    gru.append(u((Y, 3 * R), R))       # layer-0 W_ih, y columns (transposed)
    gru.append(u((A, Z, 3 * R), R))    # layer-0 W_ih, per-agent z columns
    gru.append(u((1, 3 * R), R))       # layer-0 b_ih
    gru.append(u((R, 3 * R), R))       # layer-0 W_hh
    gru.append(u((1, 3 * R), R))       # layer-0 b_hh
    for _ in range(1, L):
        gru.append(u((R, 3 * R), R))   # W_ih
        gru.append(u((1, 3 * R), R))   # b_ih
        gru.append(u((R, 3 * R), R))   # W_hh
        gru.append(u((1, 3 * R), R))   # b_hh
    p['gru'] = gru
    return p


# -----------------------------------------------------------------------------
# Pure-JAX reference (mirrors the PyTorch forward exactly, f32 everywhere)
# -----------------------------------------------------------------------------
def vrnn_mixed_ref(states, eps, p, cfg):
    A, L = cfg['n_agents'], cfg['n_layers']
    X, Z, R = cfg['x_dim'], cfg['z_dim'], cfg['rnn_dim']
    T, B, _ = states.shape
    hi = lambda a, b: jnp.dot(a, b, precision=jax.lax.Precision.HIGHEST)
    gru = p['gru']
    h = jnp.zeros((L, B, R), jnp.float32)
    kl = jnp.float32(0.0)
    re = jnp.float32(0.0)
    for t in range(T - 1):
        y = states[t]
        h_top = h[L - 1]
        z_list = []
        for i in range(A):
            x_i = states[t + 1][:, 2 * i:2 * i + X]
            e1 = jax.nn.relu(hi(x_i, p['enc_w1x'][i]) + hi(y, p['enc_w1y'][i])
                             + hi(h_top, p['enc_w1h'][i]) + p['enc_b1'][i])
            e2 = jax.nn.relu(hi(e1, p['enc_w2'][i]) + p['enc_b2'][i])
            enc_mean = hi(e2, p['enc_mw'][i]) + p['enc_mb'][i]
            enc_std = _softplus(hi(e2, p['enc_sw'][i]) + p['enc_sb'][i])
            p1 = jax.nn.relu(hi(y, p['pri_w1y'][i]) + hi(h_top, p['pri_w1h'][i]) + p['pri_b1'][i])
            p2 = jax.nn.relu(hi(p1, p['pri_w2'][i]) + p['pri_b2'][i])
            pri_mean = hi(p2, p['pri_mw'][i]) + p['pri_mb'][i]
            pri_std = _softplus(hi(p2, p['pri_sw'][i]) + p['pri_sb'][i])
            z_i = enc_mean + enc_std * eps[t, i]
            z_list.append(z_i)
            d1 = jax.nn.relu(hi(y, p['dec_w1y'][i]) + hi(z_i, p['dec_w1z'][i])
                             + hi(h_top, p['dec_w1h'][i]) + p['dec_b1'][i])
            d2 = jax.nn.relu(hi(d1, p['dec_w2'][i]) + p['dec_b2'][i])
            dec_mean = hi(d2, p['dec_mw'][i]) + p['dec_mb'][i]
            dec_std = _softplus(hi(d2, p['dec_sw'][i]) + p['dec_sb'][i])
            kl = kl + 0.5 * jnp.sum(2 * jnp.log(pri_std) - 2 * jnp.log(enc_std)
                                    + (enc_std ** 2 + (enc_mean - pri_mean) ** 2)
                                    / pri_std ** 2 - 1.0)
            re = re + 0.5 * jnp.sum((x_i - dec_mean) ** 2 / dec_std ** 2
                                    + 2 * jnp.log(dec_std) + LOG2PI)
        gi0 = hi(y, gru[0]) + gru[2]
        for i in range(A):
            gi0 = gi0 + hi(z_list[i], gru[1][i])
        new_h, x_in = [], None
        for l in range(L):
            h_prev = h[l]
            if l == 0:
                gi, whh, bhh = gi0, gru[3], gru[4]
            else:
                base = 5 + 4 * (l - 1)
                wih, bih, whh, bhh = gru[base:base + 4]
                gi = hi(x_in, wih) + bih
            gh = hi(h_prev, whh) + bhh
            r = jax.nn.sigmoid(gi[:, :R] + gh[:, :R])
            zg = jax.nn.sigmoid(gi[:, R:2 * R] + gh[:, R:2 * R])
            n = jnp.tanh(gi[:, 2 * R:] + r * gh[:, 2 * R:])
            h_new = (1.0 - zg) * n + zg * h_prev
            new_h.append(h_new)
            x_in = h_new
        h = jnp.stack(new_h, axis=0)
    return kl, re


if __name__ == "__main__":
    cfg = dict(x_dim=2, y_dim=4, z_dim=2, h_dim=16, rnn_dim=16,
               n_layers=2, n_agents=2)            # y_dim = 2 * n_agents
    T, B = 6, 8

    key = jax.random.PRNGKey(0)
    k_states, k_eps, k_par = jax.random.split(key, 3)
    states = jax.random.normal(k_states, (T, B, cfg['y_dim']), jnp.float32)
    # sample_gauss noise is precomputed (the TPU kernel consumes it as input).
    eps = jax.random.normal(k_eps, (T - 1, cfg['n_agents'], B, cfg['z_dim']),
                            jnp.float32)
    params = init_params(k_par, cfg)

    kl, recon = vrnn_mixed_pallas(states, eps, params, cfg)
    jax.block_until_ready((kl, recon))

    kl_ref, re_ref = vrnn_mixed_ref(states, eps, params, cfg)
    assert jnp.allclose(kl, kl_ref, rtol=5e-2, atol=2e-1), (kl, kl_ref)
    assert jnp.allclose(recon, re_ref, rtol=5e-2, atol=2e-1), (recon, re_ref)
    print("KERNEL_OK")
</pallas_src>

<mosaic_0001>
module attributes {stable_mosaic.version = 11 : i64} {
  func.func @kernel(%arg0: memref<40x8xf32, #tpu.memory_space<vmem>>, %arg1: memref<40x4xf32, #tpu.memory_space<vmem>>, %arg2: memref<64x1280xbf16, #tpu.memory_space<vmem>>, %arg3: memref<8x64xf32, #tpu.memory_space<vmem>>, %arg4: memref<1x2xf32, #tpu.memory_space<vmem>>) attributes {dimension_semantics = [], scalar_prefetch = 0 : i64, scratch_operands = 0 : i64, tpu.core_type = #tpu.core_type<tc>} {
    %c0 = arith.constant 0 : index
    %c0_0 = arith.constant 0 : index
    %0 = vector.load %arg2[%c0, %c0_0] : memref<64x1280xbf16, #tpu.memory_space<vmem>>, vector<8x160xbf16>
    %c0_1 = arith.constant 0 : index
    %c256 = arith.constant 256 : index
    %1 = vector.load %arg2[%c0_1, %c256] : memref<64x1280xbf16, #tpu.memory_space<vmem>>, vector<16x64xbf16>
    %c0_2 = arith.constant 0 : index
    %c384 = arith.constant 384 : index
    %2 = vector.load %arg2[%c0_2, %c384] : memref<64x1280xbf16, #tpu.memory_space<vmem>>, vector<64x64xbf16>
    %c0_3 = arith.constant 0 : index
    %c512 = arith.constant 512 : index
    %3 = vector.load %arg2[%c0_3, %c512] : memref<64x1280xbf16, #tpu.memory_space<vmem>>, vector<64x16xbf16>
    %c0_4 = arith.constant 0 : index
    %c640 = arith.constant 640 : index
    %4 = vector.load %arg2[%c0_4, %c640] : memref<64x1280xbf16, #tpu.memory_space<vmem>>, vector<20x32xbf16>
    %c0_5 = arith.constant 0 : index
    %c768 = arith.constant 768 : index
    %5 = vector.load %arg2[%c0_5, %c768] : memref<64x1280xbf16, #tpu.memory_space<vmem>>, vector<32x32xbf16>
    %c0_6 = arith.constant 0 : index
    %c896 = arith.constant 896 : index
    %6 = vector.load %arg2[%c0_6, %c896] : memref<64x1280xbf16, #tpu.memory_space<vmem>>, vector<32x8xbf16>
    %c0_7 = arith.constant 0 : index
    %c1024 = arith.constant 1024 : index
    %7 = vector.load %arg2[%c0_7, %c1024] : memref<64x1280xbf16, #tpu.memory_space<vmem>>, vector<20x64xbf16>
    %c0_8 = arith.constant 0 : index
    %c1152 = arith.constant 1152 : index
    %8 = vector.load %arg2[%c0_8, %c1152] : memref<64x1280xbf16, #tpu.memory_space<vmem>>, vector<32x64xbf16>
    %c0_9 = arith.constant 0 : index
    %c0_10 = arith.constant 0 : index
    %9 = vector.load %arg3[%c0_9, %c0_10] : memref<8x64xf32, #tpu.memory_space<vmem>>, vector<8x64xf32>
    %10 = vector.extract_strided_slice %9 {offsets = [0, 0], sizes = [1, 64], strides = [1, 1]} : vector<8x64xf32> to vector<1x64xf32>
    %11 = vector.shape_cast %10 : vector<1x64xf32> to vector<1x64xf32>
    %12 = vector.broadcast %11 : vector<1x64xf32> to vector<8x64xf32>
    %13 = vector.extract_strided_slice %9 {offsets = [1, 0], sizes = [1, 64], strides = [1, 1]} : vector<8x64xf32> to vector<1x64xf32>
    %14 = vector.shape_cast %13 : vector<1x64xf32> to vector<1x64xf32>
    %15 = vector.broadcast %14 : vector<1x64xf32> to vector<8x64xf32>
    %16 = vector.extract_strided_slice %9 {offsets = [2, 0], sizes = [1, 16], strides = [1, 1]} : vector<8x64xf32> to vector<1x16xf32>
    %17 = vector.shape_cast %16 : vector<1x16xf32> to vector<1x16xf32>
    %18 = vector.broadcast %17 : vector<1x16xf32> to vector<8x16xf32>
    %19 = vector.extract_strided_slice %9 {offsets = [3, 0], sizes = [1, 32], strides = [1, 1]} : vector<8x64xf32> to vector<1x32xf32>
    %20 = vector.shape_cast %19 : vector<1x32xf32> to vector<1x32xf32>
    %21 = vector.broadcast %20 : vector<1x32xf32> to vector<8x32xf32>
    %22 = vector.extract_strided_slice %9 {offsets = [4, 0], sizes = [1, 32], strides = [1, 1]} : vector<8x64xf32> to vector<1x32xf32>
    %23 = vector.shape_cast %22 : vector<1x32xf32> to vector<1x32xf32>
    %24 = vector.broadcast %23 : vector<1x32xf32> to vector<8x32xf32>
    %25 = vector.extract_strided_slice %9 {offsets = [5, 0], sizes = [1, 8], strides = [1, 1]} : vector<8x64xf32> to vector<1x8xf32>
    %26 = vector.shape_cast %25 : vector<1x8xf32> to vector<1x8xf32>
    %27 = vector.broadcast %26 : vector<1x8xf32> to vector<8x8xf32>
    %28 = vector.extract_strided_slice %9 {offsets = [6, 0], sizes = [1, 64], strides = [1, 1]} : vector<8x64xf32> to vector<1x64xf32>
    %29 = vector.shape_cast %28 : vector<1x64xf32> to vector<1x64xf32>
    %30 = vector.broadcast %29 : vector<1x64xf32> to vector<8x64xf32>
    %31 = vector.extract_strided_slice %9 {offsets = [7, 0], sizes = [1, 64], strides = [1, 1]} : vector<8x64xf32> to vector<1x64xf32>
    %32 = vector.shape_cast %31 : vector<1x64xf32> to vector<1x64xf32>
    %33 = vector.broadcast %32 : vector<1x64xf32> to vector<8x64xf32>
    %c0_11 = arith.constant 0 : index
    %c0_12 = arith.constant 0 : index
    %34 = vector.load %arg0[%c0_11, %c0_12] : memref<40x8xf32, #tpu.memory_space<vmem>>, vector<40x8xf32>
    %35 = arith.truncf %34 : vector<40x8xf32> to vector<40x8xbf16>
    %cst = arith.constant dense<0.000000e+00> : vector<40x160xf32>
    %36 = tpu.matmul %35, %0, %cst {dimension_numbers = #tpu.dot_dimension_numbers<[1], [0], [0], [1], [0, 0, 1, 1], [], []>} : vector<40x8xbf16>, vector<8x160xbf16>, vector<40x160xf32> -> vector<40x160xf32>
    %37 = vector.extract_strided_slice %36 {offsets = [0, 0], sizes = [40, 64], strides = [1, 1]} : vector<40x160xf32> to vector<40x64xf32>
    %38 = vector.extract_strided_slice %36 {offsets = [0, 64], sizes = [40, 32], strides = [1, 1]} : vector<40x160xf32> to vector<40x32xf32>
    %39 = vector.extract_strided_slice %36 {offsets = [0, 96], sizes = [40, 64], strides = [1, 1]} : vector<40x160xf32> to vector<40x64xf32>
    %cst_13 = arith.constant 0.000000e+00 : f32
    %40 = vector.broadcast %cst_13 : f32 to vector<8x16xf32>
    %cst_14 = arith.constant 0.000000e+00 : f32
    %41 = vector.broadcast %cst_14 : f32 to vector<8x16xf32>
    %cst_15 = arith.constant 0.000000e+00 : f32
    %42 = vector.broadcast %cst_15 : f32 to vector<8x4xf32>
    %cst_16 = arith.constant 0.000000e+00 : f32
    %43 = vector.broadcast %cst_16 : f32 to vector<8x4xf32>
    %c0_17 = arith.constant 0 : index
    %c0_18 = arith.constant 0 : index
    %44 = vector.load %arg0[%c0_17, %c0_18] : memref<40x8xf32, #tpu.memory_space<vmem>>, vector<8x4xf32>
    %c0_19 = arith.constant 0 : index
    %c0_20 = arith.constant 0 : index
    %45 = vector.load %arg1[%c0_19, %c0_20] : memref<40x4xf32, #tpu.memory_space<vmem>>, vector<8x4xf32>
    %46 = vector.extract_strided_slice %37 {offsets = [0, 0], sizes = [8, 64], strides = [1, 1]} : vector<40x64xf32> to vector<8x64xf32>
    %47 = arith.truncf %41 : vector<8x16xf32> to vector<8x16xbf16>
    %cst_21 = arith.constant dense<0.000000e+00> : vector<8x64xf32>
    %48 = tpu.matmul %47, %1, %cst_21 {dimension_numbers = #tpu.dot_dimension_numbers<[1], [0], [0], [1], [0, 0, 1, 1], [], []>} : vector<8x16xbf16>, vector<16x64xbf16>, vector<8x64xf32> -> vector<8x64xf32>
    %49 = arith.addf %46, %48 : vector<8x64xf32>
    %50 = arith.addf %49, %12 : vector<8x64xf32>
    %cst_22 = arith.constant 0.000000e+00 : f32
    %51 = vector.broadcast %cst_22 : f32 to vector<8x64xf32>
    %52 = arith.maximumf %50, %51 : vector<8x64xf32>
    %53 = arith.truncf %52 : vector<8x64xf32> to vector<8x64xbf16>
    %cst_23 = arith.constant dense<0.000000e+00> : vector<8x64xf32>
    %54 = tpu.matmul %53, %2, %cst_23 {dimension_numbers = #tpu.dot_dimension_numbers<[1], [0], [0], [1], [0, 0, 1, 1], [], []>} : vector<8x64xbf16>, vector<64x64xbf16>, vector<8x64xf32> -> vector<8x64xf32>
    %55 = arith.addf %54, %15 : vector<8x64xf32>
    %cst_24 = arith.constant 0.000000e+00 : f32
    %56 = vector.broadcast %cst_24 : f32 to vector<8x64xf32>
    %57 = arith.maximumf %55, %56 : vector<8x64xf32>
    %58 = arith.truncf %57 : vector<8x64xf32> to vector<8x64xbf16>
    %cst_25 = arith.constant dense<0.000000e+00> : vector<8x16xf32>
    %59 = tpu.matmul %58, %3, %cst_25 {dimension_numbers = #tpu.dot_dimension_numbers<[1], [0], [0], [1], [0, 0, 1, 1], [], []>} : vector<8x64xbf16>, vector<64x16xbf16>, vector<8x16xf32> -> vector<8x16xf32>
    %60 = arith.addf %59, %18 : vector<8x16xf32>
    %61 = vector.extract_strided_slice %60 {offsets = [0, 0], sizes = [8, 4], strides = [1, 1]} : vector<8x16xf32> to vector<8x4xf32>
    %62 = vector.extract_strided_slice %60 {offsets = [0, 4], sizes = [8, 4], strides = [1, 1]} : vector<8x16xf32> to vector<8x4xf32>
    %cst_26 = arith.constant 2.000000e+01 : f32
    %63 = vector.broadcast %cst_26 : f32 to vector<8x4xf32>
    %64 = arith.cmpf ogt, %62, %63 : vector<8x4xf32>
    %cst_27 = arith.constant 2.000000e+01 : f32
    %65 = vector.broadcast %cst_27 : f32 to vector<8x4xf32>
    %66 = arith.minimumf %62, %65 : vector<8x4xf32>
    %67 = math.exp %66 : vector<8x4xf32>
    %68 = math.log1p %67 : vector<8x4xf32>
    %69 = arith.select %64, %62, %68 : vector<8x4xi1>, vector<8x4xf32>
    %70 = vector.extract_strided_slice %60 {offsets = [0, 8], sizes = [8, 4], strides = [1, 1]} : vector<8x16xf32> to vector<8x4xf32>
    %71 = vector.extract_strided_slice %60 {offsets = [0, 12], sizes = [8, 4], strides = [1, 1]} : vector<8x16xf32> to vector<8x4xf32>
    %cst_28 = arith.constant 2.000000e+01 : f32
    %72 = vector.broadcast %cst_28 : f32 to vector<8x4xf32>
    %73 = arith.cmpf ogt, %71, %72 : vector<8x4xf32>
    %cst_29 = arith.constant 2.000000e+01 : f32
    %74 = vector.broadcast %cst_29 : f32 to vector<8x4xf32>
    %75 = arith.minimumf %71, %74 : vector<8x4xf32>
    %76 = math.exp %75 : vector<8x4xf32>
    %77 = math.log1p %76 : vector<8x4xf32>
    %78 = arith.select %73, %71, %77 : vector<8x4xi1>, vector<8x4xf32>
    %79 = arith.mulf %69, %45 : vector<8x4xf32>
    %80 = arith.addf %61, %79 : vector<8x4xf32>
    %81 = vector.extract_strided_slice %38 {offsets = [0, 0], sizes = [8, 32], strides = [1, 1]} : vector<40x32xf32> to vector<8x32xf32>
    %82 = tpu.concatenate %80, %41 in 1 : vector<8x4xf32>, vector<8x16xf32> -> vector<8x20xf32>
    %83 = arith.truncf %82 : vector<8x20xf32> to vector<8x20xbf16>
    %cst_30 = arith.constant dense<0.000000e+00> : vector<8x32xf32>
    %84 = tpu.matmul %83, %4, %cst_30 {dimension_numbers = #tpu.dot_dimension_numbers<[1], [0], [0], [1], [0, 0, 1, 1], [], []>} : vector<8x20xbf16>, vector<20x32xbf16>, vector<8x32xf32> -> vector<8x32xf32>
    %85 = arith.addf %81, %84 : vector<8x32xf32>
    %86 = arith.addf %85, %21 : vector<8x32xf32>
    %cst_31 = arith.constant 0.000000e+00 : f32
    %87 = vector.broadcast %cst_31 : f32 to vector<8x32xf32>
    %88 = arith.maximumf %86, %87 : vector<8x32xf32>
    %89 = arith.truncf %88 : vector<8x32xf32> to vector<8x32xbf16>
    %cst_32 = arith.constant dense<0.000000e+00> : vector<8x32xf32>
    %90 = tpu.matmul %89, %5, %cst_32 {dimension_numbers = #tpu.dot_dimension_numbers<[1], [0], [0], [1], [0, 0, 1, 1], [], []>} : vector<8x32xbf16>, vector<32x32xbf16>, vector<8x32xf32> -> vector<8x32xf32>
    %91 = arith.addf %90, %24 : vector<8x32xf32>
    %cst_33 = arith.constant 0.000000e+00 : f32
    %92 = vector.broadcast %cst_33 : f32 to vector<8x32xf32>
    %93 = arith.maximumf %91, %92 : vector<8x32xf32>
    %94 = arith.truncf %93 : vector<8x32xf32> to vector<8x32xbf16>
    %cst_34 = arith.constant dense<0.000000e+00> : vector<8x8xf32>
    %95 = tpu.matmul %94, %6, %cst_34 {dimension_numbers = #tpu.dot_dimension_numbers<[1], [0], [0], [1], [0, 0, 1, 1], [], []>} : vector<8x32xbf16>, vector<32x8xbf16>, vector<8x8xf32> -> vector<8x8xf32>
    %96 = arith.addf %95, %27 : vector<8x8xf32>
    %97 = vector.extract_strided_slice %96 {offsets = [0, 0], sizes = [8, 4], strides = [1, 1]} : vector<8x8xf32> to vector<8x4xf32>
    %98 = vector.extract_strided_slice %96 {offsets = [0, 4], sizes = [8, 4], strides = [1, 1]} : vector<8x8xf32> to vector<8x4xf32>
    %cst_35 = arith.constant 2.000000e+01 : f32
    %99 = vector.broadcast %cst_35 : f32 to vector<8x4xf32>
    %100 = arith.cmpf ogt, %98, %99 : vector<8x4xf32>
    %cst_36 = arith.constant 2.000000e+01 : f32
    %101 = vector.broadcast %cst_36 : f32 to vector<8x4xf32>
    %102 = arith.minimumf %98, %101 : vector<8x4xf32>
    %103 = math.exp %102 : vector<8x4xf32>
    %104 = math.log1p %103 : vector<8x4xf32>
    %105 = arith.select %100, %98, %104 : vector<8x4xi1>, vector<8x4xf32>
    %106 = arith.mulf %78, %78 : vector<8x4xf32>
    %107 = tpu.reciprocal %106 {approx = true} : vector<8x4xf32> -> vector<8x4xf32>
    %108 = arith.subf %61, %70 : vector<8x4xf32>
    %109 = arith.divf %78, %69 : vector<8x4xf32>
    %110 = math.log %109 : vector<8x4xf32>
    %cst_37 = arith.constant 2.000000e+00 : f32
    %111 = vector.broadcast %cst_37 : f32 to vector<8x4xf32>
    %112 = arith.mulf %111, %110 : vector<8x4xf32>
    %113 = arith.mulf %69, %69 : vector<8x4xf32>
    %114 = arith.mulf %108, %108 : vector<8x4xf32>
    %115 = arith.addf %113, %114 : vector<8x4xf32>
    %116 = arith.mulf %115, %107 : vector<8x4xf32>
    %117 = arith.addf %112, %116 : vector<8x4xf32>
    %cst_38 = arith.constant 1.000000e+00 : f32
    %118 = vector.broadcast %cst_38 : f32 to vector<8x4xf32>
    %119 = arith.subf %117, %118 : vector<8x4xf32>
    %120 = arith.addf %42, %119 : vector<8x4xf32>
    %121 = arith.mulf %105, %105 : vector<8x4xf32>
    %122 = tpu.reciprocal %121 {approx = true} : vector<8x4xf32> -> vector<8x4xf32>
    %123 = arith.subf %44, %97 : vector<8x4xf32>
    %124 = arith.mulf %123, %123 : vector<8x4xf32>
    %125 = arith.mulf %124, %122 : vector<8x4xf32>
    %126 = arith.addf %43, %125 : vector<8x4xf32>
    %127 = math.log %105 : vector<8x4xf32>
    %cst_39 = arith.constant 2.000000e+00 : f32
    %128 = vector.broadcast %cst_39 : f32 to vector<8x4xf32>
    %129 = arith.mulf %128, %127 : vector<8x4xf32>
    %130 = arith.addf %126, %129 : vector<8x4xf32>
    %cst_40 = arith.constant 1.83787704 : f32
    %131 = vector.broadcast %cst_40 : f32 to vector<8x4xf32>
    %132 = arith.addf %130, %131 : vector<8x4xf32>
    %133 = vector.extract_strided_slice %39 {offsets = [0, 0], sizes = [8, 64], strides = [1, 1]} : vector<40x64xf32> to vector<8x64xf32>
    %134 = tpu.concatenate %80, %40 in 1 : vector<8x4xf32>, vector<8x16xf32> -> vector<8x20xf32>
    %135 = arith.truncf %134 : vector<8x20xf32> to vector<8x20xbf16>
    %cst_41 = arith.constant dense<0.000000e+00> : vector<8x64xf32>
    %136 = tpu.matmul %135, %7, %cst_41 {dimension_numbers = #tpu.dot_dimension_numbers<[1], [0], [0], [1], [0, 0, 1, 1], [], []>} : vector<8x20xbf16>, vector<20x64xbf16>, vector<8x64xf32> -> vector<8x64xf32>
    %137 = arith.addf %133, %136 : vector<8x64xf32>
    %138 = arith.addf %137, %30 : vector<8x64xf32>
    %139 = vector.extract_strided_slice %138 {offsets = [0, 0], sizes = [8, 16], strides = [1, 1]} : vector<8x64xf32> to vector<8x16xf32>
    %140 = arith.negf %139 : vector<8x16xf32>
    %141 = math.exp %140 : vector<8x16xf32>
    %cst_42 = arith.constant 1.000000e+00 : f32
    %142 = vector.broadcast %cst_42 : f32 to vector<8x16xf32>
    %143 = arith.addf %142, %141 : vector<8x16xf32>
    %144 = arith.divf %142, %143 : vector<8x16xf32>
    %145 = vector.extract_strided_slice %138 {offsets = [0, 16], sizes = [8, 16], strides = [1, 1]} : vector<8x64xf32> to vector<8x16xf32>
    %146 = arith.negf %145 : vector<8x16xf32>
    %147 = math.exp %146 : vector<8x16xf32>
    %cst_43 = arith.constant 1.000000e+00 : f32
    %148 = vector.broadcast %cst_43 : f32 to vector<8x16xf32>
    %149 = arith.addf %148, %147 : vector<8x16xf32>
    %150 = arith.divf %148, %149 : vector<8x16xf32>
    %151 = vector.extract_strided_slice %138 {offsets = [0, 32], sizes = [8, 16], strides = [1, 1]} : vector<8x64xf32> to vector<8x16xf32>
    %152 = vector.extract_strided_slice %138 {offsets = [0, 48], sizes = [8, 16], strides = [1, 1]} : vector<8x64xf32> to vector<8x16xf32>
    %153 = arith.mulf %144, %152 : vector<8x16xf32>
    %154 = arith.addf %151, %153 : vector<8x16xf32>
    %155 = math.tanh %154 : vector<8x16xf32>
    %cst_44 = arith.constant 1.000000e+00 : f32
    %156 = vector.broadcast %cst_44 : f32 to vector<8x16xf32>
    %157 = arith.subf %156, %150 : vector<8x16xf32>
    %158 = arith.mulf %157, %155 : vector<8x16xf32>
    %159 = arith.mulf %150, %40 : vector<8x16xf32>
    %160 = arith.addf %158, %159 : vector<8x16xf32>
    %161 = tpu.concatenate %160, %41 in 1 : vector<8x16xf32>, vector<8x16xf32> -> vector<8x32xf32>
    %162 = arith.truncf %161 : vector<8x32xf32> to vector<8x32xbf16>
    %cst_45 = arith.constant dense<0.000000e+00> : vector<8x64xf32>
    %163 = tpu.matmul %162, %8, %cst_45 {dimension_numbers = #tpu.dot_dimension_numbers<[1], [0], [0], [1], [0, 0, 1, 1], [], []>} : vector<8x32xbf16>, vector<32x64xbf16>, vector<8x64xf32> -> vector<8x64xf32>
    %164 = arith.addf %163, %33 : vector<8x64xf32>
    %165 = vector.extract_strided_slice %164 {offsets = [0, 0], sizes = [8, 16], strides = [1, 1]} : vector<8x64xf32> to vector<8x16xf32>
    %166 = arith.negf %165 : vector<8x16xf32>
    %167 = math.exp %166 : vector<8x16xf32>
    %cst_46 = arith.constant 1.000000e+00 : f32
    %168 = vector.broadcast %cst_46 : f32 to vector<8x16xf32>
    %169 = arith.addf %168, %167 : vector<8x16xf32>
    %170 = arith.divf %168, %169 : vector<8x16xf32>
    %171 = vector.extract_strided_slice %164 {offsets = [0, 16], sizes = [8, 16], strides = [1, 1]} : vector<8x64xf32> to vector<8x16xf32>
    %172 = arith.negf %171 : vector<8x16xf32>
    %173 = math.exp %172 : vector<8x16xf32>
    %cst_47 = arith.constant 1.000000e+00 : f32
    %174 = vector.broadcast %cst_47 : f32 to vector<8x16xf32>
    %175 = arith.addf %174, %173 : vector<8x16xf32>
    %176 = arith.divf %174, %175 : vector<8x16xf32>
    %177 = vector.extract_strided_slice %164 {offsets = [0, 32], sizes = [8, 16], strides = [1, 1]} : vector<8x64xf32> to vector<8x16xf32>
    %178 = vector.extract_strided_slice %164 {offsets = [0, 48], sizes = [8, 16], strides = [1, 1]} : vector<8x64xf32> to vector<8x16xf32>
    %179 = arith.mulf %170, %178 : vector<8x16xf32>
    %180 = arith.addf %177, %179 : vector<8x16xf32>
    %181 = math.tanh %180 : vector<8x16xf32>
    %cst_48 = arith.constant 1.000000e+00 : f32
    %182 = vector.broadcast %cst_48 : f32 to vector<8x16xf32>
    %183 = arith.subf %182, %176 : vector<8x16xf32>
    %184 = arith.mulf %183, %181 : vector<8x16xf32>
    %185 = arith.mulf %176, %41 : vector<8x16xf32>
    %186 = arith.addf %184, %185 : vector<8x16xf32>
    %c8 = arith.constant 8 : index
    %c0_49 = arith.constant 0 : index
    %187 = vector.load %arg0[%c8, %c0_49] : memref<40x8xf32, #tpu.memory_space<vmem>>, vector<8x4xf32>
    %c8_50 = arith.constant 8 : index
    %c0_51 = arith.constant 0 : index
    %188 = vector.load %arg1[%c8_50, %c0_51] : memref<40x4xf32, #tpu.memory_space<vmem>>, vector<8x4xf32>
    %189 = vector.extract_strided_slice %37 {offsets = [8, 0], sizes = [8, 64], strides = [1, 1]} : vector<40x64xf32> to vector<8x64xf32>
    %190 = arith.truncf %186 : vector<8x16xf32> to vector<8x16xbf16>
    %cst_52 = arith.constant dense<0.000000e+00> : vector<8x64xf32>
    %191 = tpu.matmul %190, %1, %cst_52 {dimension_numbers = #tpu.dot_dimension_numbers<[1], [0], [0], [1], [0, 0, 1, 1], [], []>} : vector<8x16xbf16>, vector<16x64xbf16>, vector<8x64xf32> -> vector<8x64xf32>
    %192 = arith.addf %189, %191 : vector<8x64xf32>
    %193 = arith.addf %192, %12 : vector<8x64xf32>
    %cst_53 = arith.constant 0.000000e+00 : f32
    %194 = vector.broadcast %cst_53 : f32 to vector<8x64xf32>
    %195 = arith.maximumf %193, %194 : vector<8x64xf32>
    %196 = arith.truncf %195 : vector<8x64xf32> to vector<8x64xbf16>
    %cst_54 = arith.constant dense<0.000000e+00> : vector<8x64xf32>
    %197 = tpu.matmul %196, %2, %cst_54 {dimension_numbers = #tpu.dot_dimension_numbers<[1], [0], [0], [1], [0, 0, 1, 1], [], []>} : vector<8x64xbf16>, vector<64x64xbf16>, vector<8x64xf32> -> vector<8x64xf32>
    %198 = arith.addf %197, %15 : vector<8x64xf32>
    %cst_55 = arith.constant 0.000000e+00 : f32
    %199 = vector.broadcast %cst_55 : f32 to vector<8x64xf32>
    %200 = arith.maximumf %198, %199 : vector<8x64xf32>
    %201 = arith.truncf %200 : vector<8x64xf32> to vector<8x64xbf16>
    %cst_56 = arith.constant dense<0.000000e+00> : vector<8x16xf32>
    %202 = tpu.matmul %201, %3, %cst_56 {dimension_numbers = #tpu.dot_dimension_numbers<[1], [0], [0], [1], [0, 0, 1, 1], [], []>} : vector<8x64xbf16>, vector<64x16xbf16>, vector<8x16xf32> -> vector<8x16xf32>
    %203 = arith.addf %202, %18 : vector<8x16xf32>
    %204 = vector.extract_strided_slice %203 {offsets = [0, 0], sizes = [8, 4], strides = [1, 1]} : vector<8x16xf32> to vector<8x4xf32>
    %205 = vector.extract_strided_slice %203 {offsets = [0, 4], sizes = [8, 4], strides = [1, 1]} : vector<8x16xf32> to vector<8x4xf32>
    %cst_57 = arith.constant 2.000000e+01 : f32
    %206 = vector.broadcast %cst_57 : f32 to vector<8x4xf32>
    %207 = arith.cmpf ogt, %205, %206 : vector<8x4xf32>
    %cst_58 = arith.constant 2.000000e+01 : f32
    %208 = vector.broadcast %cst_58 : f32 to vector<8x4xf32>
    %209 = arith.minimumf %205, %208 : vector<8x4xf32>
    %210 = math.exp %209 : vector<8x4xf32>
    %211 = math.log1p %210 : vector<8x4xf32>
    %212 = arith.select %207, %205, %211 : vector<8x4xi1>, vector<8x4xf32>
    %213 = vector.extract_strided_slice %203 {offsets = [0, 8], sizes = [8, 4], strides = [1, 1]} : vector<8x16xf32> to vector<8x4xf32>
    %214 = vector.extract_strided_slice %203 {offsets = [0, 12], sizes = [8, 4], strides = [1, 1]} : vector<8x16xf32> to vector<8x4xf32>
    %cst_59 = arith.constant 2.000000e+01 : f32
    %215 = vector.broadcast %cst_59 : f32 to vector<8x4xf32>
    %216 = arith.cmpf ogt, %214, %215 : vector<8x4xf32>
    %cst_60 = arith.constant 2.000000e+01 : f32
    %217 = vector.broadcast %cst_60 : f32 to vector<8x4xf32>
    %218 = arith.minimumf %214, %217 : vector<8x4xf32>
    %219 = math.exp %218 : vector<8x4xf32>
    %220 = math.log1p %219 : vector<8x4xf32>
    %221 = arith.select %216, %214, %220 : vector<8x4xi1>, vector<8x4xf32>
    %222 = arith.mulf %212, %188 : vector<8x4xf32>
    %223 = arith.addf %204, %222 : vector<8x4xf32>
    %224 = vector.extract_strided_slice %38 {offsets = [8, 0], sizes = [8, 32], strides = [1, 1]} : vector<40x32xf32> to vector<8x32xf32>
    %225 = tpu.concatenate %223, %186 in 1 : vector<8x4xf32>, vector<8x16xf32> -> vector<8x20xf32>
    %226 = arith.truncf %225 : vector<8x20xf32> to vector<8x20xbf16>
    %cst_61 = arith.constant dense<0.000000e+00> : vector<8x32xf32>
    %227 = tpu.matmul %226, %4, %cst_61 {dimension_numbers = #tpu.dot_dimension_numbers<[1], [0], [0], [1], [0, 0, 1, 1], [], []>} : vector<8x20xbf16>, vector<20x32xbf16>, vector<8x32xf32> -> vector<8x32xf32>
    %228 = arith.addf %224, %227 : vector<8x32xf32>
    %229 = arith.addf %228, %21 : vector<8x32xf32>
    %cst_62 = arith.constant 0.000000e+00 : f32
    %230 = vector.broadcast %cst_62 : f32 to vector<8x32xf32>
    %231 = arith.maximumf %229, %230 : vector<8x32xf32>
    %232 = arith.truncf %231 : vector<8x32xf32> to vector<8x32xbf16>
    %cst_63 = arith.constant dense<0.000000e+00> : vector<8x32xf32>
    %233 = tpu.matmul %232, %5, %cst_63 {dimension_numbers = #tpu.dot_dimension_numbers<[1], [0], [0], [1], [0, 0, 1, 1], [], []>} : vector<8x32xbf16>, vector<32x32xbf16>, vector<8x32xf32> -> vector<8x32xf32>
    %234 = arith.addf %233, %24 : vector<8x32xf32>
    %cst_64 = arith.constant 0.000000e+00 : f32
    %235 = vector.broadcast %cst_64 : f32 to vector<8x32xf32>
    %236 = arith.maximumf %234, %235 : vector<8x32xf32>
    %237 = arith.truncf %236 : vector<8x32xf32> to vector<8x32xbf16>
    %cst_65 = arith.constant dense<0.000000e+00> : vector<8x8xf32>
    %238 = tpu.matmul %237, %6, %cst_65 {dimension_numbers = #tpu.dot_dimension_numbers<[1], [0], [0], [1], [0, 0, 1, 1], [], []>} : vector<8x32xbf16>, vector<32x8xbf16>, vector<8x8xf32> -> vector<8x8xf32>
    %239 = arith.addf %238, %27 : vector<8x8xf32>
    %240 = vector.extract_strided_slice %239 {offsets = [0, 0], sizes = [8, 4], strides = [1, 1]} : vector<8x8xf32> to vector<8x4xf32>
    %241 = vector.extract_strided_slice %239 {offsets = [0, 4], sizes = [8, 4], strides = [1, 1]} : vector<8x8xf32> to vector<8x4xf32>
    %cst_66 = arith.constant 2.000000e+01 : f32
    %242 = vector.broadcast %cst_66 : f32 to vector<8x4xf32>
    %243 = arith.cmpf ogt, %241, %242 : vector<8x4xf32>
    %cst_67 = arith.constant 2.000000e+01 : f32
    %244 = vector.broadcast %cst_67 : f32 to vector<8x4xf32>
    %245 = arith.minimumf %241, %244 : vector<8x4xf32>
    %246 = math.exp %245 : vector<8x4xf32>
    %247 = math.log1p %246 : vector<8x4xf32>
    %248 = arith.select %243, %241, %247 : vector<8x4xi1>, vector<8x4xf32>
    %249 = arith.mulf %221, %221 : vector<8x4xf32>
    %250 = tpu.reciprocal %249 {approx = true} : vector<8x4xf32> -> vector<8x4xf32>
    %251 = arith.subf %204, %213 : vector<8x4xf32>
    %252 = arith.divf %221, %212 : vector<8x4xf32>
    %253 = math.log %252 : vector<8x4xf32>
    %cst_68 = arith.constant 2.000000e+00 : f32
    %254 = vector.broadcast %cst_68 : f32 to vector<8x4xf32>
    %255 = arith.mulf %254, %253 : vector<8x4xf32>
    %256 = arith.mulf %212, %212 : vector<8x4xf32>
    %257 = arith.mulf %251, %251 : vector<8x4xf32>
    %258 = arith.addf %256, %257 : vector<8x4xf32>
    %259 = arith.mulf %258, %250 : vector<8x4xf32>
    %260 = arith.addf %255, %259 : vector<8x4xf32>
    %cst_69 = arith.constant 1.000000e+00 : f32
    %261 = vector.broadcast %cst_69 : f32 to vector<8x4xf32>
    %262 = arith.subf %260, %261 : vector<8x4xf32>
    %263 = arith.addf %120, %262 : vector<8x4xf32>
    %264 = arith.mulf %248, %248 : vector<8x4xf32>
    %265 = tpu.reciprocal %264 {approx = true} : vector<8x4xf32> -> vector<8x4xf32>
    %266 = arith.subf %187, %240 : vector<8x4xf32>
    %267 = arith.mulf %266, %266 : vector<8x4xf32>
    %268 = arith.mulf %267, %265 : vector<8x4xf32>
    %269 = arith.addf %132, %268 : vector<8x4xf32>
    %270 = math.log %248 : vector<8x4xf32>
    %cst_70 = arith.constant 2.000000e+00 : f32
    %271 = vector.broadcast %cst_70 : f32 to vector<8x4xf32>
    %272 = arith.mulf %271, %270 : vector<8x4xf32>
    %273 = arith.addf %269, %272 : vector<8x4xf32>
    %cst_71 = arith.constant 1.83787704 : f32
    %274 = vector.broadcast %cst_71 : f32 to vector<8x4xf32>
    %275 = arith.addf %273, %274 : vector<8x4xf32>
    %276 = vector.extract_strided_slice %39 {offsets = [8, 0], sizes = [8, 64], strides = [1, 1]} : vector<40x64xf32> to vector<8x64xf32>
    %277 = tpu.concatenate %223, %160 in 1 : vector<8x4xf32>, vector<8x16xf32> -> vector<8x20xf32>
    %278 = arith.truncf %277 : vector<8x20xf32> to vector<8x20xbf16>
    %cst_72 = arith.constant dense<0.000000e+00> : vector<8x64xf32>
    %279 = tpu.matmul %278, %7, %cst_72 {dimension_numbers = #tpu.dot_dimension_numbers<[1], [0], [0], [1], [0, 0, 1, 1], [], []>} : vector<8x20xbf16>, vector<20x64xbf16>, vector<8x64xf32> -> vector<8x64xf32>
    %280 = arith.addf %276, %279 : vector<8x64xf32>
    %281 = arith.addf %280, %30 : vector<8x64xf32>
    %282 = vector.extract_strided_slice %281 {offsets = [0, 0], sizes = [8, 16], strides = [1, 1]} : vector<8x64xf32> to vector<8x16xf32>
    %283 = arith.negf %282 : vector<8x16xf32>
    %284 = math.exp %283 : vector<8x16xf32>
    %cst_73 = arith.constant 1.000000e+00 : f32
    %285 = vector.broadcast %cst_73 : f32 to vector<8x16xf32>
    %286 = arith.addf %285, %284 : vector<8x16xf32>
    %287 = arith.divf %285, %286 : vector<8x16xf32>
    %288 = vector.extract_strided_slice %281 {offsets = [0, 16], sizes = [8, 16], strides = [1, 1]} : vector<8x64xf32> to vector<8x16xf32>
    %289 = arith.negf %288 : vector<8x16xf32>
    %290 = math.exp %289 : vector<8x16xf32>
    %cst_74 = arith.constant 1.000000e+00 : f32
    %291 = vector.broadcast %cst_74 : f32 to vector<8x16xf32>
    %292 = arith.addf %291, %290 : vector<8x16xf32>
    %293 = arith.divf %291, %292 : vector<8x16xf32>
    %294 = vector.extract_strided_slice %281 {offsets = [0, 32], sizes = [8, 16], strides = [1, 1]} : vector<8x64xf32> to vector<8x16xf32>
    %295 = vector.extract_strided_slice %281 {offsets = [0, 48], sizes = [8, 16], strides = [1, 1]} : vector<8x64xf32> to vector<8x16xf32>
    %296 = arith.mulf %287, %295 : vector<8x16xf32>
    %297 = arith.addf %294, %296 : vector<8x16xf32>
    %298 = math.tanh %297 : vector<8x16xf32>
    %cst_75 = arith.constant 1.000000e+00 : f32
    %299 = vector.broadcast %cst_75 : f32 to vector<8x16xf32>
    %300 = arith.subf %299, %293 : vector<8x16xf32>
    %301 = arith.mulf %300, %298 : vector<8x16xf32>
    %302 = arith.mulf %293, %160 : vector<8x16xf32>
    %303 = arith.addf %301, %302 : vector<8x16xf32>
    %304 = tpu.concatenate %303, %186 in 1 : vector<8x16xf32>, vector<8x16xf32> -> vector<8x32xf32>
    %305 = arith.truncf %304 : vector<8x32xf32> to vector<8x32xbf16>
    %cst_76 = arith.constant dense<0.000000e+00> : vector<8x64xf32>
    %306 = tpu.matmul %305, %8, %cst_76 {dimension_numbers = #tpu.dot_dimension_numbers<[1], [0], [0], [1], [0, 0, 1, 1], [], []>} : vector<8x32xbf16>, vector<32x64xbf16>, vector<8x64xf32> -> vector<8x64xf32>
    %307 = arith.addf %306, %33 : vector<8x64xf32>
    %308 = vector.extract_strided_slice %307 {offsets = [0, 0], sizes = [8, 16], strides = [1, 1]} : vector<8x64xf32> to vector<8x16xf32>
    %309 = arith.negf %308 : vector<8x16xf32>
    %310 = math.exp %309 : vector<8x16xf32>
    %cst_77 = arith.constant 1.000000e+00 : f32
    %311 = vector.broadcast %cst_77 : f32 to vector<8x16xf32>
    %312 = arith.addf %311, %310 : vector<8x16xf32>
    %313 = arith.divf %311, %312 : vector<8x16xf32>
    %314 = vector.extract_strided_slice %307 {offsets = [0, 16], sizes = [8, 16], strides = [1, 1]} : vector<8x64xf32> to vector<8x16xf32>
    %315 = arith.negf %314 : vector<8x16xf32>
    %316 = math.exp %315 : vector<8x16xf32>
    %cst_78 = arith.constant 1.000000e+00 : f32
    %317 = vector.broadcast %cst_78 : f32 to vector<8x16xf32>
    %318 = arith.addf %317, %316 : vector<8x16xf32>
    %319 = arith.divf %317, %318 : vector<8x16xf32>
    %320 = vector.extract_strided_slice %307 {offsets = [0, 32], sizes = [8, 16], strides = [1, 1]} : vector<8x64xf32> to vector<8x16xf32>
    %321 = vector.extract_strided_slice %307 {offsets = [0, 48], sizes = [8, 16], strides = [1, 1]} : vector<8x64xf32> to vector<8x16xf32>
    %322 = arith.mulf %313, %321 : vector<8x16xf32>
    %323 = arith.addf %320, %322 : vector<8x16xf32>
    %324 = math.tanh %323 : vector<8x16xf32>
    %cst_79 = arith.constant 1.000000e+00 : f32
    %325 = vector.broadcast %cst_79 : f32 to vector<8x16xf32>
    %326 = arith.subf %325, %319 : vector<8x16xf32>
    %327 = arith.mulf %326, %324 : vector<8x16xf32>
    %328 = arith.mulf %319, %186 : vector<8x16xf32>
    %329 = arith.addf %327, %328 : vector<8x16xf32>
    %c16 = arith.constant 16 : index
    %c0_80 = arith.constant 0 : index
    %330 = vector.load %arg0[%c16, %c0_80] : memref<40x8xf32, #tpu.memory_space<vmem>>, vector<8x4xf32>
    %c16_81 = arith.constant 16 : index
    %c0_82 = arith.constant 0 : index
    %331 = vector.load %arg1[%c16_81, %c0_82] : memref<40x4xf32, #tpu.memory_space<vmem>>, vector<8x4xf32>
    %332 = vector.extract_strided_slice %37 {offsets = [16, 0], sizes = [8, 64], strides = [1, 1]} : vector<40x64xf32> to vector<8x64xf32>
    %333 = arith.truncf %329 : vector<8x16xf32> to vector<8x16xbf16>
    %cst_83 = arith.constant dense<0.000000e+00> : vector<8x64xf32>
    %334 = tpu.matmul %333, %1, %cst_83 {dimension_numbers = #tpu.dot_dimension_numbers<[1], [0], [0], [1], [0, 0, 1, 1], [], []>} : vector<8x16xbf16>, vector<16x64xbf16>, vector<8x64xf32> -> vector<8x64xf32>
    %335 = arith.addf %332, %334 : vector<8x64xf32>
    %336 = arith.addf %335, %12 : vector<8x64xf32>
    %cst_84 = arith.constant 0.000000e+00 : f32
    %337 = vector.broadcast %cst_84 : f32 to vector<8x64xf32>
    %338 = arith.maximumf %336, %337 : vector<8x64xf32>
    %339 = arith.truncf %338 : vector<8x64xf32> to vector<8x64xbf16>
    %cst_85 = arith.constant dense<0.000000e+00> : vector<8x64xf32>
    %340 = tpu.matmul %339, %2, %cst_85 {dimension_numbers = #tpu.dot_dimension_numbers<[1], [0], [0], [1], [0, 0, 1, 1], [], []>} : vector<8x64xbf16>, vector<64x64xbf16>, vector<8x64xf32> -> vector<8x64xf32>
    %341 = arith.addf %340, %15 : vector<8x64xf32>
    %cst_86 = arith.constant 0.000000e+00 : f32
    %342 = vector.broadcast %cst_86 : f32 to vector<8x64xf32>
    %343 = arith.maximumf %341, %342 : vector<8x64xf32>
    %344 = arith.truncf %343 : vector<8x64xf32> to vector<8x64xbf16>
    %cst_87 = arith.constant dense<0.000000e+00> : vector<8x16xf32>
    %345 = tpu.matmul %344, %3, %cst_87 {dimension_numbers = #tpu.dot_dimension_numbers<[1], [0], [0], [1], [0, 0, 1, 1], [], []>} : vector<8x64xbf16>, vector<64x16xbf16>, vector<8x16xf32> -> vector<8x16xf32>
    %346 = arith.addf %345, %18 : vector<8x16xf32>
    %347 = vector.extract_strided_slice %346 {offsets = [0, 0], sizes = [8, 4], strides = [1, 1]} : vector<8x16xf32> to vector<8x4xf32>
    %348 = vector.extract_strided_slice %346 {offsets = [0, 4], sizes = [8, 4], strides = [1, 1]} : vector<8x16xf32> to vector<8x4xf32>
    %cst_88 = arith.constant 2.000000e+01 : f32
    %349 = vector.broadcast %cst_88 : f32 to vector<8x4xf32>
    %350 = arith.cmpf ogt, %348, %349 : vector<8x4xf32>
    %cst_89 = arith.constant 2.000000e+01 : f32
    %351 = vector.broadcast %cst_89 : f32 to vector<8x4xf32>
    %352 = arith.minimumf %348, %351 : vector<8x4xf32>
    %353 = math.exp %352 : vector<8x4xf32>
    %354 = math.log1p %353 : vector<8x4xf32>
    %355 = arith.select %350, %348, %354 : vector<8x4xi1>, vector<8x4xf32>
    %356 = vector.extract_strided_slice %346 {offsets = [0, 8], sizes = [8, 4], strides = [1, 1]} : vector<8x16xf32> to vector<8x4xf32>
    %357 = vector.extract_strided_slice %346 {offsets = [0, 12], sizes = [8, 4], strides = [1, 1]} : vector<8x16xf32> to vector<8x4xf32>
    %cst_90 = arith.constant 2.000000e+01 : f32
    %358 = vector.broadcast %cst_90 : f32 to vector<8x4xf32>
    %359 = arith.cmpf ogt, %357, %358 : vector<8x4xf32>
    %cst_91 = arith.constant 2.000000e+01 : f32
    %360 = vector.broadcast %cst_91 : f32 to vector<8x4xf32>
    %361 = arith.minimumf %357, %360 : vector<8x4xf32>
    %362 = math.exp %361 : vector<8x4xf32>
    %363 = math.log1p %362 : vector<8x4xf32>
    %364 = arith.select %359, %357, %363 : vector<8x4xi1>, vector<8x4xf32>
    %365 = arith.mulf %355, %331 : vector<8x4xf32>
    %366 = arith.addf %347, %365 : vector<8x4xf32>
    %367 = vector.extract_strided_slice %38 {offsets = [16, 0], sizes = [8, 32], strides = [1, 1]} : vector<40x32xf32> to vector<8x32xf32>
    %368 = tpu.concatenate %366, %329 in 1 : vector<8x4xf32>, vector<8x16xf32> -> vector<8x20xf32>
    %369 = arith.truncf %368 : vector<8x20xf32> to vector<8x20xbf16>
    %cst_92 = arith.constant dense<0.000000e+00> : vector<8x32xf32>
    %370 = tpu.matmul %369, %4, %cst_92 {dimension_numbers = #tpu.dot_dimension_numbers<[1], [0], [0], [1], [0, 0, 1, 1], [], []>} : vector<8x20xbf16>, vector<20x32xbf16>, vector<8x32xf32> -> vector<8x32xf32>
    %371 = arith.addf %367, %370 : vector<8x32xf32>
    %372 = arith.addf %371, %21 : vector<8x32xf32>
    %cst_93 = arith.constant 0.000000e+00 : f32
    %373 = vector.broadcast %cst_93 : f32 to vector<8x32xf32>
    %374 = arith.maximumf %372, %373 : vector<8x32xf32>
    %375 = arith.truncf %374 : vector<8x32xf32> to vector<8x32xbf16>
    %cst_94 = arith.constant dense<0.000000e+00> : vector<8x32xf32>
    %376 = tpu.matmul %375, %5, %cst_94 {dimension_numbers = #tpu.dot_dimension_numbers<[1], [0], [0], [1], [0, 0, 1, 1], [], []>} : vector<8x32xbf16>, vector<32x32xbf16>, vector<8x32xf32> -> vector<8x32xf32>
    %377 = arith.addf %376, %24 : vector<8x32xf32>
    %cst_95 = arith.constant 0.000000e+00 : f32
    %378 = vector.broadcast %cst_95 : f32 to vector<8x32xf32>
    %379 = arith.maximumf %377, %378 : vector<8x32xf32>
    %380 = arith.truncf %379 : vector<8x32xf32> to vector<8x32xbf16>
    %cst_96 = arith.constant dense<0.000000e+00> : vector<8x8xf32>
    %381 = tpu.matmul %380, %6, %cst_96 {dimension_numbers = #tpu.dot_dimension_numbers<[1], [0], [0], [1], [0, 0, 1, 1], [], []>} : vector<8x32xbf16>, vector<32x8xbf16>, vector<8x8xf32> -> vector<8x8xf32>
    %382 = arith.addf %381, %27 : vector<8x8xf32>
    %383 = vector.extract_strided_slice %382 {offsets = [0, 0], sizes = [8, 4], strides = [1, 1]} : vector<8x8xf32> to vector<8x4xf32>
    %384 = vector.extract_strided_slice %382 {offsets = [0, 4], sizes = [8, 4], strides = [1, 1]} : vector<8x8xf32> to vector<8x4xf32>
    %cst_97 = arith.constant 2.000000e+01 : f32
    %385 = vector.broadcast %cst_97 : f32 to vector<8x4xf32>
    %386 = arith.cmpf ogt, %384, %385 : vector<8x4xf32>
    %cst_98 = arith.constant 2.000000e+01 : f32
    %387 = vector.broadcast %cst_98 : f32 to vector<8x4xf32>
    %388 = arith.minimumf %384, %387 : vector<8x4xf32>
    %389 = math.exp %388 : vector<8x4xf32>
    %390 = math.log1p %389 : vector<8x4xf32>
    %391 = arith.select %386, %384, %390 : vector<8x4xi1>, vector<8x4xf32>
    %392 = arith.mulf %364, %364 : vector<8x4xf32>
    %393 = tpu.reciprocal %392 {approx = true} : vector<8x4xf32> -> vector<8x4xf32>
    %394 = arith.subf %347, %356 : vector<8x4xf32>
    %395 = arith.divf %364, %355 : vector<8x4xf32>
    %396 = math.log %395 : vector<8x4xf32>
    %cst_99 = arith.constant 2.000000e+00 : f32
    %397 = vector.broadcast %cst_99 : f32 to vector<8x4xf32>
    %398 = arith.mulf %397, %396 : vector<8x4xf32>
    %399 = arith.mulf %355, %355 : vector<8x4xf32>
    %400 = arith.mulf %394, %394 : vector<8x4xf32>
    %401 = arith.addf %399, %400 : vector<8x4xf32>
    %402 = arith.mulf %401, %393 : vector<8x4xf32>
    %403 = arith.addf %398, %402 : vector<8x4xf32>
    %cst_100 = arith.constant 1.000000e+00 : f32
    %404 = vector.broadcast %cst_100 : f32 to vector<8x4xf32>
    %405 = arith.subf %403, %404 : vector<8x4xf32>
    %406 = arith.addf %263, %405 : vector<8x4xf32>
    %407 = arith.mulf %391, %391 : vector<8x4xf32>
    %408 = tpu.reciprocal %407 {approx = true} : vector<8x4xf32> -> vector<8x4xf32>
    %409 = arith.subf %330, %383 : vector<8x4xf32>
    %410 = arith.mulf %409, %409 : vector<8x4xf32>
    %411 = arith.mulf %410, %408 : vector<8x4xf32>
    %412 = arith.addf %275, %411 : vector<8x4xf32>
    %413 = math.log %391 : vector<8x4xf32>
    %cst_101 = arith.constant 2.000000e+00 : f32
    %414 = vector.broadcast %cst_101 : f32 to vector<8x4xf32>
    %415 = arith.mulf %414, %413 : vector<8x4xf32>
    %416 = arith.addf %412, %415 : vector<8x4xf32>
    %cst_102 = arith.constant 1.83787704 : f32
    %417 = vector.broadcast %cst_102 : f32 to vector<8x4xf32>
    %418 = arith.addf %416, %417 : vector<8x4xf32>
    %419 = vector.extract_strided_slice %39 {offsets = [16, 0], sizes = [8, 64], strides = [1, 1]} : vector<40x64xf32> to vector<8x64xf32>
    %420 = tpu.concatenate %366, %303 in 1 : vector<8x4xf32>, vector<8x16xf32> -> vector<8x20xf32>
    %421 = arith.truncf %420 : vector<8x20xf32> to vector<8x20xbf16>
    %cst_103 = arith.constant dense<0.000000e+00> : vector<8x64xf32>
    %422 = tpu.matmul %421, %7, %cst_103 {dimension_numbers = #tpu.dot_dimension_numbers<[1], [0], [0], [1], [0, 0, 1, 1], [], []>} : vector<8x20xbf16>, vector<20x64xbf16>, vector<8x64xf32> -> vector<8x64xf32>
    %423 = arith.addf %419, %422 : vector<8x64xf32>
    %424 = arith.addf %423, %30 : vector<8x64xf32>
    %425 = vector.extract_strided_slice %424 {offsets = [0, 0], sizes = [8, 16], strides = [1, 1]} : vector<8x64xf32> to vector<8x16xf32>
    %426 = arith.negf %425 : vector<8x16xf32>
    %427 = math.exp %426 : vector<8x16xf32>
    %cst_104 = arith.constant 1.000000e+00 : f32
    %428 = vector.broadcast %cst_104 : f32 to vector<8x16xf32>
    %429 = arith.addf %428, %427 : vector<8x16xf32>
    %430 = arith.divf %428, %429 : vector<8x16xf32>
    %431 = vector.extract_strided_slice %424 {offsets = [0, 16], sizes = [8, 16], strides = [1, 1]} : vector<8x64xf32> to vector<8x16xf32>
    %432 = arith.negf %431 : vector<8x16xf32>
    %433 = math.exp %432 : vector<8x16xf32>
    %cst_105 = arith.constant 1.000000e+00 : f32
    %434 = vector.broadcast %cst_105 : f32 to vector<8x16xf32>
    %435 = arith.addf %434, %433 : vector<8x16xf32>
    %436 = arith.divf %434, %435 : vector<8x16xf32>
    %437 = vector.extract_strided_slice %424 {offsets = [0, 32], sizes = [8, 16], strides = [1, 1]} : vector<8x64xf32> to vector<8x16xf32>
    %438 = vector.extract_strided_slice %424 {offsets = [0, 48], sizes = [8, 16], strides = [1, 1]} : vector<8x64xf32> to vector<8x16xf32>
    %439 = arith.mulf %430, %438 : vector<8x16xf32>
    %440 = arith.addf %437, %439 : vector<8x16xf32>
    %441 = math.tanh %440 : vector<8x16xf32>
    %cst_106 = arith.constant 1.000000e+00 : f32
    %442 = vector.broadcast %cst_106 : f32 to vector<8x16xf32>
    %443 = arith.subf %442, %436 : vector<8x16xf32>
    %444 = arith.mulf %443, %441 : vector<8x16xf32>
    %445 = arith.mulf %436, %303 : vector<8x16xf32>
    %446 = arith.addf %444, %445 : vector<8x16xf32>
    %447 = tpu.concatenate %446, %329 in 1 : vector<8x16xf32>, vector<8x16xf32> -> vector<8x32xf32>
    %448 = arith.truncf %447 : vector<8x32xf32> to vector<8x32xbf16>
    %cst_107 = arith.constant dense<0.000000e+00> : vector<8x64xf32>
    %449 = tpu.matmul %448, %8, %cst_107 {dimension_numbers = #tpu.dot_dimension_numbers<[1], [0], [0], [1], [0, 0, 1, 1], [], []>} : vector<8x32xbf16>, vector<32x64xbf16>, vector<8x64xf32> -> vector<8x64xf32>
    %450 = arith.addf %449, %33 : vector<8x64xf32>
    %451 = vector.extract_strided_slice %450 {offsets = [0, 0], sizes = [8, 16], strides = [1, 1]} : vector<8x64xf32> to vector<8x16xf32>
    %452 = arith.negf %451 : vector<8x16xf32>
    %453 = math.exp %452 : vector<8x16xf32>
    %cst_108 = arith.constant 1.000000e+00 : f32
    %454 = vector.broadcast %cst_108 : f32 to vector<8x16xf32>
    %455 = arith.addf %454, %453 : vector<8x16xf32>
    %456 = arith.divf %454, %455 : vector<8x16xf32>
    %457 = vector.extract_strided_slice %450 {offsets = [0, 16], sizes = [8, 16], strides = [1, 1]} : vector<8x64xf32> to vector<8x16xf32>
    %458 = arith.negf %457 : vector<8x16xf32>
    %459 = math.exp %458 : vector<8x16xf32>
    %cst_109 = arith.constant 1.000000e+00 : f32
    %460 = vector.broadcast %cst_109 : f32 to vector<8x16xf32>
    %461 = arith.addf %460, %459 : vector<8x16xf32>
    %462 = arith.divf %460, %461 : vector<8x16xf32>
    %463 = vector.extract_strided_slice %450 {offsets = [0, 32], sizes = [8, 16], strides = [1, 1]} : vector<8x64xf32> to vector<8x16xf32>
    %464 = vector.extract_strided_slice %450 {offsets = [0, 48], sizes = [8, 16], strides = [1, 1]} : vector<8x64xf32> to vector<8x16xf32>
    %465 = arith.mulf %456, %464 : vector<8x16xf32>
    %466 = arith.addf %463, %465 : vector<8x16xf32>
    %467 = math.tanh %466 : vector<8x16xf32>
    %cst_110 = arith.constant 1.000000e+00 : f32
    %468 = vector.broadcast %cst_110 : f32 to vector<8x16xf32>
    %469 = arith.subf %468, %462 : vector<8x16xf32>
    %470 = arith.mulf %469, %467 : vector<8x16xf32>
    %471 = arith.mulf %462, %329 : vector<8x16xf32>
    %472 = arith.addf %470, %471 : vector<8x16xf32>
    %c24 = arith.constant 24 : index
    %c0_111 = arith.constant 0 : index
    %473 = vector.load %arg0[%c24, %c0_111] : memref<40x8xf32, #tpu.memory_space<vmem>>, vector<8x4xf32>
    %c24_112 = arith.constant 24 : index
    %c0_113 = arith.constant 0 : index
    %474 = vector.load %arg1[%c24_112, %c0_113] : memref<40x4xf32, #tpu.memory_space<vmem>>, vector<8x4xf32>
    %475 = vector.extract_strided_slice %37 {offsets = [24, 0], sizes = [8, 64], strides = [1, 1]} : vector<40x64xf32> to vector<8x64xf32>
    %476 = arith.truncf %472 : vector<8x16xf32> to vector<8x16xbf16>
    %cst_114 = arith.constant dense<0.000000e+00> : vector<8x64xf32>
    %477 = tpu.matmul %476, %1, %cst_114 {dimension_numbers = #tpu.dot_dimension_numbers<[1], [0], [0], [1], [0, 0, 1, 1], [], []>} : vector<8x16xbf16>, vector<16x64xbf16>, vector<8x64xf32> -> vector<8x64xf32>
    %478 = arith.addf %475, %477 : vector<8x64xf32>
    %479 = arith.addf %478, %12 : vector<8x64xf32>
    %cst_115 = arith.constant 0.000000e+00 : f32
    %480 = vector.broadcast %cst_115 : f32 to vector<8x64xf32>
    %481 = arith.maximumf %479, %480 : vector<8x64xf32>
    %482 = arith.truncf %481 : vector<8x64xf32> to vector<8x64xbf16>
    %cst_116 = arith.constant dense<0.000000e+00> : vector<8x64xf32>
    %483 = tpu.matmul %482, %2, %cst_116 {dimension_numbers = #tpu.dot_dimension_numbers<[1], [0], [0], [1], [0, 0, 1, 1], [], []>} : vector<8x64xbf16>, vector<64x64xbf16>, vector<8x64xf32> -> vector<8x64xf32>
    %484 = arith.addf %483, %15 : vector<8x64xf32>
    %cst_117 = arith.constant 0.000000e+00 : f32
    %485 = vector.broadcast %cst_117 : f32 to vector<8x64xf32>
    %486 = arith.maximumf %484, %485 : vector<8x64xf32>
    %487 = arith.truncf %486 : vector<8x64xf32> to vector<8x64xbf16>
    %cst_118 = arith.constant dense<0.000000e+00> : vector<8x16xf32>
    %488 = tpu.matmul %487, %3, %cst_118 {dimension_numbers = #tpu.dot_dimension_numbers<[1], [0], [0], [1], [0, 0, 1, 1], [], []>} : vector<8x64xbf16>, vector<64x16xbf16>, vector<8x16xf32> -> vector<8x16xf32>
    %489 = arith.addf %488, %18 : vector<8x16xf32>
    %490 = vector.extract_strided_slice %489 {offsets = [0, 0], sizes = [8, 4], strides = [1, 1]} : vector<8x16xf32> to vector<8x4xf32>
    %491 = vector.extract_strided_slice %489 {offsets = [0, 4], sizes = [8, 4], strides = [1, 1]} : vector<8x16xf32> to vector<8x4xf32>
    %cst_119 = arith.constant 2.000000e+01 : f32
    %492 = vector.broadcast %cst_119 : f32 to vector<8x4xf32>
    %493 = arith.cmpf ogt, %491, %492 : vector<8x4xf32>
    %cst_120 = arith.constant 2.000000e+01 : f32
    %494 = vector.broadcast %cst_120 : f32 to vector<8x4xf32>
    %495 = arith.minimumf %491, %494 : vector<8x4xf32>
    %496 = math.exp %495 : vector<8x4xf32>
    %497 = math.log1p %496 : vector<8x4xf32>
    %498 = arith.select %493, %491, %497 : vector<8x4xi1>, vector<8x4xf32>
    %499 = vector.extract_strided_slice %489 {offsets = [0, 8], sizes = [8, 4], strides = [1, 1]} : vector<8x16xf32> to vector<8x4xf32>
    %500 = vector.extract_strided_slice %489 {offsets = [0, 12], sizes = [8, 4], strides = [1, 1]} : vector<8x16xf32> to vector<8x4xf32>
    %cst_121 = arith.constant 2.000000e+01 : f32
    %501 = vector.broadcast %cst_121 : f32 to vector<8x4xf32>
    %502 = arith.cmpf ogt, %500, %501 : vector<8x4xf32>
    %cst_122 = arith.constant 2.000000e+01 : f32
    %503 = vector.broadcast %cst_122 : f32 to vector<8x4xf32>
    %504 = arith.minimumf %500, %503 : vector<8x4xf32>
    %505 = math.exp %504 : vector<8x4xf32>
    %506 = math.log1p %505 : vector<8x4xf32>
    %507 = arith.select %502, %500, %506 : vector<8x4xi1>, vector<8x4xf32>
    %508 = arith.mulf %498, %474 : vector<8x4xf32>
    %509 = arith.addf %490, %508 : vector<8x4xf32>
    %510 = vector.extract_strided_slice %38 {offsets = [24, 0], sizes = [8, 32], strides = [1, 1]} : vector<40x32xf32> to vector<8x32xf32>
    %511 = tpu.concatenate %509, %472 in 1 : vector<8x4xf32>, vector<8x16xf32> -> vector<8x20xf32>
    %512 = arith.truncf %511 : vector<8x20xf32> to vector<8x20xbf16>
    %cst_123 = arith.constant dense<0.000000e+00> : vector<8x32xf32>
    %513 = tpu.matmul %512, %4, %cst_123 {dimension_numbers = #tpu.dot_dimension_numbers<[1], [0], [0], [1], [0, 0, 1, 1], [], []>} : vector<8x20xbf16>, vector<20x32xbf16>, vector<8x32xf32> -> vector<8x32xf32>
    %514 = arith.addf %510, %513 : vector<8x32xf32>
    %515 = arith.addf %514, %21 : vector<8x32xf32>
    %cst_124 = arith.constant 0.000000e+00 : f32
    %516 = vector.broadcast %cst_124 : f32 to vector<8x32xf32>
    %517 = arith.maximumf %515, %516 : vector<8x32xf32>
    %518 = arith.truncf %517 : vector<8x32xf32> to vector<8x32xbf16>
    %cst_125 = arith.constant dense<0.000000e+00> : vector<8x32xf32>
    %519 = tpu.matmul %518, %5, %cst_125 {dimension_numbers = #tpu.dot_dimension_numbers<[1], [0], [0], [1], [0, 0, 1, 1], [], []>} : vector<8x32xbf16>, vector<32x32xbf16>, vector<8x32xf32> -> vector<8x32xf32>
    %520 = arith.addf %519, %24 : vector<8x32xf32>
    %cst_126 = arith.constant 0.000000e+00 : f32
    %521 = vector.broadcast %cst_126 : f32 to vector<8x32xf32>
    %522 = arith.maximumf %520, %521 : vector<8x32xf32>
    %523 = arith.truncf %522 : vector<8x32xf32> to vector<8x32xbf16>
    %cst_127 = arith.constant dense<0.000000e+00> : vector<8x8xf32>
    %524 = tpu.matmul %523, %6, %cst_127 {dimension_numbers = #tpu.dot_dimension_numbers<[1], [0], [0], [1], [0, 0, 1, 1], [], []>} : vector<8x32xbf16>, vector<32x8xbf16>, vector<8x8xf32> -> vector<8x8xf32>
    %525 = arith.addf %524, %27 : vector<8x8xf32>
    %526 = vector.extract_strided_slice %525 {offsets = [0, 0], sizes = [8, 4], strides = [1, 1]} : vector<8x8xf32> to vector<8x4xf32>
    %527 = vector.extract_strided_slice %525 {offsets = [0, 4], sizes = [8, 4], strides = [1, 1]} : vector<8x8xf32> to vector<8x4xf32>
    %cst_128 = arith.constant 2.000000e+01 : f32
    %528 = vector.broadcast %cst_128 : f32 to vector<8x4xf32>
    %529 = arith.cmpf ogt, %527, %528 : vector<8x4xf32>
    %cst_129 = arith.constant 2.000000e+01 : f32
    %530 = vector.broadcast %cst_129 : f32 to vector<8x4xf32>
    %531 = arith.minimumf %527, %530 : vector<8x4xf32>
    %532 = math.exp %531 : vector<8x4xf32>
    %533 = math.log1p %532 : vector<8x4xf32>
    %534 = arith.select %529, %527, %533 : vector<8x4xi1>, vector<8x4xf32>
    %535 = arith.mulf %507, %507 : vector<8x4xf32>
    %536 = tpu.reciprocal %535 {approx = true} : vector<8x4xf32> -> vector<8x4xf32>
    %537 = arith.subf %490, %499 : vector<8x4xf32>
    %538 = arith.divf %507, %498 : vector<8x4xf32>
    %539 = math.log %538 : vector<8x4xf32>
    %cst_130 = arith.constant 2.000000e+00 : f32
    %540 = vector.broadcast %cst_130 : f32 to vector<8x4xf32>
    %541 = arith.mulf %540, %539 : vector<8x4xf32>
    %542 = arith.mulf %498, %498 : vector<8x4xf32>
    %543 = arith.mulf %537, %537 : vector<8x4xf32>
    %544 = arith.addf %542, %543 : vector<8x4xf32>
    %545 = arith.mulf %544, %536 : vector<8x4xf32>
    %546 = arith.addf %541, %545 : vector<8x4xf32>
    %cst_131 = arith.constant 1.000000e+00 : f32
    %547 = vector.broadcast %cst_131 : f32 to vector<8x4xf32>
    %548 = arith.subf %546, %547 : vector<8x4xf32>
    %549 = arith.addf %406, %548 : vector<8x4xf32>
    %550 = arith.mulf %534, %534 : vector<8x4xf32>
    %551 = tpu.reciprocal %550 {approx = true} : vector<8x4xf32> -> vector<8x4xf32>
    %552 = arith.subf %473, %526 : vector<8x4xf32>
    %553 = arith.mulf %552, %552 : vector<8x4xf32>
    %554 = arith.mulf %553, %551 : vector<8x4xf32>
    %555 = arith.addf %418, %554 : vector<8x4xf32>
    %556 = math.log %534 : vector<8x4xf32>
    %cst_132 = arith.constant 2.000000e+00 : f32
    %557 = vector.broadcast %cst_132 : f32 to vector<8x4xf32>
    %558 = arith.mulf %557, %556 : vector<8x4xf32>
    %559 = arith.addf %555, %558 : vector<8x4xf32>
    %cst_133 = arith.constant 1.83787704 : f32
    %560 = vector.broadcast %cst_133 : f32 to vector<8x4xf32>
    %561 = arith.addf %559, %560 : vector<8x4xf32>
    %562 = vector.extract_strided_slice %39 {offsets = [24, 0], sizes = [8, 64], strides = [1, 1]} : vector<40x64xf32> to vector<8x64xf32>
    %563 = tpu.concatenate %509, %446 in 1 : vector<8x4xf32>, vector<8x16xf32> -> vector<8x20xf32>
    %564 = arith.truncf %563 : vector<8x20xf32> to vector<8x20xbf16>
    %cst_134 = arith.constant dense<0.000000e+00> : vector<8x64xf32>
    %565 = tpu.matmul %564, %7, %cst_134 {dimension_numbers = #tpu.dot_dimension_numbers<[1], [0], [0], [1], [0, 0, 1, 1], [], []>} : vector<8x20xbf16>, vector<20x64xbf16>, vector<8x64xf32> -> vector<8x64xf32>
    %566 = arith.addf %562, %565 : vector<8x64xf32>
    %567 = arith.addf %566, %30 : vector<8x64xf32>
    %568 = vector.extract_strided_slice %567 {offsets = [0, 0], sizes = [8, 16], strides = [1, 1]} : vector<8x64xf32> to vector<8x16xf32>
    %569 = arith.negf %568 : vector<8x16xf32>
    %570 = math.exp %569 : vector<8x16xf32>
    %cst_135 = arith.constant 1.000000e+00 : f32
    %571 = vector.broadcast %cst_135 : f32 to vector<8x16xf32>
    %572 = arith.addf %571, %570 : vector<8x16xf32>
    %573 = arith.divf %571, %572 : vector<8x16xf32>
    %574 = vector.extract_strided_slice %567 {offsets = [0, 16], sizes = [8, 16], strides = [1, 1]} : vector<8x64xf32> to vector<8x16xf32>
    %575 = arith.negf %574 : vector<8x16xf32>
    %576 = math.exp %575 : vector<8x16xf32>
    %cst_136 = arith.constant 1.000000e+00 : f32
    %577 = vector.broadcast %cst_136 : f32 to vector<8x16xf32>
    %578 = arith.addf %577, %576 : vector<8x16xf32>
    %579 = arith.divf %577, %578 : vector<8x16xf32>
    %580 = vector.extract_strided_slice %567 {offsets = [0, 32], sizes = [8, 16], strides = [1, 1]} : vector<8x64xf32> to vector<8x16xf32>
    %581 = vector.extract_strided_slice %567 {offsets = [0, 48], sizes = [8, 16], strides = [1, 1]} : vector<8x64xf32> to vector<8x16xf32>
    %582 = arith.mulf %573, %581 : vector<8x16xf32>
    %583 = arith.addf %580, %582 : vector<8x16xf32>
    %584 = math.tanh %583 : vector<8x16xf32>
    %cst_137 = arith.constant 1.000000e+00 : f32
    %585 = vector.broadcast %cst_137 : f32 to vector<8x16xf32>
    %586 = arith.subf %585, %579 : vector<8x16xf32>
    %587 = arith.mulf %586, %584 : vector<8x16xf32>
    %588 = arith.mulf %579, %446 : vector<8x16xf32>
    %589 = arith.addf %587, %588 : vector<8x16xf32>
    %590 = tpu.concatenate %589, %472 in 1 : vector<8x16xf32>, vector<8x16xf32> -> vector<8x32xf32>
    %591 = arith.truncf %590 : vector<8x32xf32> to vector<8x32xbf16>
    %cst_138 = arith.constant dense<0.000000e+00> : vector<8x64xf32>
    %592 = tpu.matmul %591, %8, %cst_138 {dimension_numbers = #tpu.dot_dimension_numbers<[1], [0], [0], [1], [0, 0, 1, 1], [], []>} : vector<8x32xbf16>, vector<32x64xbf16>, vector<8x64xf32> -> vector<8x64xf32>
    %593 = arith.addf %592, %33 : vector<8x64xf32>
    %594 = vector.extract_strided_slice %593 {offsets = [0, 0], sizes = [8, 16], strides = [1, 1]} : vector<8x64xf32> to vector<8x16xf32>
    %595 = arith.negf %594 : vector<8x16xf32>
    %596 = math.exp %595 : vector<8x16xf32>
    %cst_139 = arith.constant 1.000000e+00 : f32
    %597 = vector.broadcast %cst_139 : f32 to vector<8x16xf32>
    %598 = arith.addf %597, %596 : vector<8x16xf32>
    %599 = arith.divf %597, %598 : vector<8x16xf32>
    %600 = vector.extract_strided_slice %593 {offsets = [0, 16], sizes = [8, 16], strides = [1, 1]} : vector<8x64xf32> to vector<8x16xf32>
    %601 = arith.negf %600 : vector<8x16xf32>
    %602 = math.exp %601 : vector<8x16xf32>
    %cst_140 = arith.constant 1.000000e+00 : f32
    %603 = vector.broadcast %cst_140 : f32 to vector<8x16xf32>
    %604 = arith.addf %603, %602 : vector<8x16xf32>
    %605 = arith.divf %603, %604 : vector<8x16xf32>
    %606 = vector.extract_strided_slice %593 {offsets = [0, 32], sizes = [8, 16], strides = [1, 1]} : vector<8x64xf32> to vector<8x16xf32>
    %607 = vector.extract_strided_slice %593 {offsets = [0, 48], sizes = [8, 16], strides = [1, 1]} : vector<8x64xf32> to vector<8x16xf32>
    %608 = arith.mulf %599, %607 : vector<8x16xf32>
    %609 = arith.addf %606, %608 : vector<8x16xf32>
    %610 = math.tanh %609 : vector<8x16xf32>
    %cst_141 = arith.constant 1.000000e+00 : f32
    %611 = vector.broadcast %cst_141 : f32 to vector<8x16xf32>
    %612 = arith.subf %611, %605 : vector<8x16xf32>
    %613 = arith.mulf %612, %610 : vector<8x16xf32>
    %614 = arith.mulf %605, %472 : vector<8x16xf32>
    %615 = arith.addf %613, %614 : vector<8x16xf32>
    %c32 = arith.constant 32 : index
    %c0_142 = arith.constant 0 : index
    %616 = vector.load %arg0[%c32, %c0_142] : memref<40x8xf32, #tpu.memory_space<vmem>>, vector<8x4xf32>
    %c32_143 = arith.constant 32 : index
    %c0_144 = arith.constant 0 : index
    %617 = vector.load %arg1[%c32_143, %c0_144] : memref<40x4xf32, #tpu.memory_space<vmem>>, vector<8x4xf32>
    %618 = vector.extract_strided_slice %37 {offsets = [32, 0], sizes = [8, 64], strides = [1, 1]} : vector<40x64xf32> to vector<8x64xf32>
    %619 = arith.truncf %615 : vector<8x16xf32> to vector<8x16xbf16>
    %cst_145 = arith.constant dense<0.000000e+00> : vector<8x64xf32>
    %620 = tpu.matmul %619, %1, %cst_145 {dimension_numbers = #tpu.dot_dimension_numbers<[1], [0], [0], [1], [0, 0, 1, 1], [], []>} : vector<8x16xbf16>, vector<16x64xbf16>, vector<8x64xf32> -> vector<8x64xf32>
    %621 = arith.addf %618, %620 : vector<8x64xf32>
    %622 = arith.addf %621, %12 : vector<8x64xf32>
    %cst_146 = arith.constant 0.000000e+00 : f32
    %623 = vector.broadcast %cst_146 : f32 to vector<8x64xf32>
    %624 = arith.maximumf %622, %623 : vector<8x64xf32>
    %625 = arith.truncf %624 : vector<8x64xf32> to vector<8x64xbf16>
    %cst_147 = arith.constant dense<0.000000e+00> : vector<8x64xf32>
    %626 = tpu.matmul %625, %2, %cst_147 {dimension_numbers = #tpu.dot_dimension_numbers<[1], [0], [0], [1], [0, 0, 1, 1], [], []>} : vector<8x64xbf16>, vector<64x64xbf16>, vector<8x64xf32> -> vector<8x64xf32>
    %627 = arith.addf %626, %15 : vector<8x64xf32>
    %cst_148 = arith.constant 0.000000e+00 : f32
    %628 = vector.broadcast %cst_148 : f32 to vector<8x64xf32>
    %629 = arith.maximumf %627, %628 : vector<8x64xf32>
    %630 = arith.truncf %629 : vector<8x64xf32> to vector<8x64xbf16>
    %cst_149 = arith.constant dense<0.000000e+00> : vector<8x16xf32>
    %631 = tpu.matmul %630, %3, %cst_149 {dimension_numbers = #tpu.dot_dimension_numbers<[1], [0], [0], [1], [0, 0, 1, 1], [], []>} : vector<8x64xbf16>, vector<64x16xbf16>, vector<8x16xf32> -> vector<8x16xf32>
    %632 = arith.addf %631, %18 : vector<8x16xf32>
    %633 = vector.extract_strided_slice %632 {offsets = [0, 0], sizes = [8, 4], strides = [1, 1]} : vector<8x16xf32> to vector<8x4xf32>
    %634 = vector.extract_strided_slice %632 {offsets = [0, 4], sizes = [8, 4], strides = [1, 1]} : vector<8x16xf32> to vector<8x4xf32>
    %cst_150 = arith.constant 2.000000e+01 : f32
    %635 = vector.broadcast %cst_150 : f32 to vector<8x4xf32>
    %636 = arith.cmpf ogt, %634, %635 : vector<8x4xf32>
    %cst_151 = arith.constant 2.000000e+01 : f32
    %637 = vector.broadcast %cst_151 : f32 to vector<8x4xf32>
    %638 = arith.minimumf %634, %637 : vector<8x4xf32>
    %639 = math.exp %638 : vector<8x4xf32>
    %640 = math.log1p %639 : vector<8x4xf32>
    %641 = arith.select %636, %634, %640 : vector<8x4xi1>, vector<8x4xf32>
    %642 = vector.extract_strided_slice %632 {offsets = [0, 8], sizes = [8, 4], strides = [1, 1]} : vector<8x16xf32> to vector<8x4xf32>
    %643 = vector.extract_strided_slice %632 {offsets = [0, 12], sizes = [8, 4], strides = [1, 1]} : vector<8x16xf32> to vector<8x4xf32>
    %cst_152 = arith.constant 2.000000e+01 : f32
    %644 = vector.broadcast %cst_152 : f32 to vector<8x4xf32>
    %645 = arith.cmpf ogt, %643, %644 : vector<8x4xf32>
    %cst_153 = arith.constant 2.000000e+01 : f32
    %646 = vector.broadcast %cst_153 : f32 to vector<8x4xf32>
    %647 = arith.minimumf %643, %646 : vector<8x4xf32>
    %648 = math.exp %647 : vector<8x4xf32>
    %649 = math.log1p %648 : vector<8x4xf32>
    %650 = arith.select %645, %643, %649 : vector<8x4xi1>, vector<8x4xf32>
    %651 = arith.mulf %641, %617 : vector<8x4xf32>
    %652 = arith.addf %633, %651 : vector<8x4xf32>
    %653 = vector.extract_strided_slice %38 {offsets = [32, 0], sizes = [8, 32], strides = [1, 1]} : vector<40x32xf32> to vector<8x32xf32>
    %654 = tpu.concatenate %652, %615 in 1 : vector<8x4xf32>, vector<8x16xf32> -> vector<8x20xf32>
    %655 = arith.truncf %654 : vector<8x20xf32> to vector<8x20xbf16>
    %cst_154 = arith.constant dense<0.000000e+00> : vector<8x32xf32>
    %656 = tpu.matmul %655, %4, %cst_154 {dimension_numbers = #tpu.dot_dimension_numbers<[1], [0], [0], [1], [0, 0, 1, 1], [], []>} : vector<8x20xbf16>, vector<20x32xbf16>, vector<8x32xf32> -> vector<8x32xf32>
    %657 = arith.addf %653, %656 : vector<8x32xf32>
    %658 = arith.addf %657, %21 : vector<8x32xf32>
    %cst_155 = arith.constant 0.000000e+00 : f32
    %659 = vector.broadcast %cst_155 : f32 to vector<8x32xf32>
    %660 = arith.maximumf %658, %659 : vector<8x32xf32>
    %661 = arith.truncf %660 : vector<8x32xf32> to vector<8x32xbf16>
    %cst_156 = arith.constant dense<0.000000e+00> : vector<8x32xf32>
    %662 = tpu.matmul %661, %5, %cst_156 {dimension_numbers = #tpu.dot_dimension_numbers<[1], [0], [0], [1], [0, 0, 1, 1], [], []>} : vector<8x32xbf16>, vector<32x32xbf16>, vector<8x32xf32> -> vector<8x32xf32>
    %663 = arith.addf %662, %24 : vector<8x32xf32>
    %cst_157 = arith.constant 0.000000e+00 : f32
    %664 = vector.broadcast %cst_157 : f32 to vector<8x32xf32>
    %665 = arith.maximumf %663, %664 : vector<8x32xf32>
    %666 = arith.truncf %665 : vector<8x32xf32> to vector<8x32xbf16>
    %cst_158 = arith.constant dense<0.000000e+00> : vector<8x8xf32>
    %667 = tpu.matmul %666, %6, %cst_158 {dimension_numbers = #tpu.dot_dimension_numbers<[1], [0], [0], [1], [0, 0, 1, 1], [], []>} : vector<8x32xbf16>, vector<32x8xbf16>, vector<8x8xf32> -> vector<8x8xf32>
    %668 = arith.addf %667, %27 : vector<8x8xf32>
    %669 = vector.extract_strided_slice %668 {offsets = [0, 0], sizes = [8, 4], strides = [1, 1]} : vector<8x8xf32> to vector<8x4xf32>
    %670 = vector.extract_strided_slice %668 {offsets = [0, 4], sizes = [8, 4], strides = [1, 1]} : vector<8x8xf32> to vector<8x4xf32>
    %cst_159 = arith.constant 2.000000e+01 : f32
    %671 = vector.broadcast %cst_159 : f32 to vector<8x4xf32>
    %672 = arith.cmpf ogt, %670, %671 : vector<8x4xf32>
    %cst_160 = arith.constant 2.000000e+01 : f32
    %673 = vector.broadcast %cst_160 : f32 to vector<8x4xf32>
    %674 = arith.minimumf %670, %673 : vector<8x4xf32>
    %675 = math.exp %674 : vector<8x4xf32>
    %676 = math.log1p %675 : vector<8x4xf32>
    %677 = arith.select %672, %670, %676 : vector<8x4xi1>, vector<8x4xf32>
    %678 = arith.mulf %650, %650 : vector<8x4xf32>
    %679 = tpu.reciprocal %678 {approx = true} : vector<8x4xf32> -> vector<8x4xf32>
    %680 = arith.subf %633, %642 : vector<8x4xf32>
    %681 = arith.divf %650, %641 : vector<8x4xf32>
    %682 = math.log %681 : vector<8x4xf32>
    %cst_161 = arith.constant 2.000000e+00 : f32
    %683 = vector.broadcast %cst_161 : f32 to vector<8x4xf32>
    %684 = arith.mulf %683, %682 : vector<8x4xf32>
    %685 = arith.mulf %641, %641 : vector<8x4xf32>
    %686 = arith.mulf %680, %680 : vector<8x4xf32>
    %687 = arith.addf %685, %686 : vector<8x4xf32>
    %688 = arith.mulf %687, %679 : vector<8x4xf32>
    %689 = arith.addf %684, %688 : vector<8x4xf32>
    %cst_162 = arith.constant 1.000000e+00 : f32
    %690 = vector.broadcast %cst_162 : f32 to vector<8x4xf32>
    %691 = arith.subf %689, %690 : vector<8x4xf32>
    %692 = arith.addf %549, %691 : vector<8x4xf32>
    %693 = arith.mulf %677, %677 : vector<8x4xf32>
    %694 = tpu.reciprocal %693 {approx = true} : vector<8x4xf32> -> vector<8x4xf32>
    %695 = arith.subf %616, %669 : vector<8x4xf32>
    %696 = arith.mulf %695, %695 : vector<8x4xf32>
    %697 = arith.mulf %696, %694 : vector<8x4xf32>
    %698 = arith.addf %561, %697 : vector<8x4xf32>
    %699 = math.log %677 : vector<8x4xf32>
    %cst_163 = arith.constant 2.000000e+00 : f32
    %700 = vector.broadcast %cst_163 : f32 to vector<8x4xf32>
    %701 = arith.mulf %700, %699 : vector<8x4xf32>
    %702 = arith.addf %698, %701 : vector<8x4xf32>
    %cst_164 = arith.constant 1.83787704 : f32
    %703 = vector.broadcast %cst_164 : f32 to vector<8x4xf32>
    %704 = arith.addf %702, %703 : vector<8x4xf32>
    %705 = vector.shape_cast %692 : vector<8x4xf32> to vector<1x8x4xf32>
    %cst_165 = arith.constant dense<0.000000e+00> : vector<1xf32>
    %706 = vector.multi_reduction <add>, %705, %cst_165 [1, 2] : vector<1x8x4xf32> to vector<1xf32>
    %707 = vector.shape_cast %706 : vector<1xf32> to vector<1x1x1xf32>
    %708 = vector.extract %707[0, 0, 0] : f32 from vector<1x1x1xf32>
    %709 = vector.broadcast %708 : f32 to vector<1x1xf32>
    %cst_166 = arith.constant 5.000000e-01 : f32
    %710 = vector.broadcast %cst_166 : f32 to vector<1x1xf32>
    %711 = arith.mulf %710, %709 : vector<1x1xf32>
    %712 = vector.shape_cast %704 : vector<8x4xf32> to vector<1x8x4xf32>
    %cst_167 = arith.constant dense<0.000000e+00> : vector<1xf32>
    %713 = vector.multi_reduction <add>, %712, %cst_167 [1, 2] : vector<1x8x4xf32> to vector<1xf32>
    %714 = vector.shape_cast %713 : vector<1xf32> to vector<1x1x1xf32>
    %715 = vector.extract %714[0, 0, 0] : f32 from vector<1x1x1xf32>
    %716 = vector.broadcast %715 : f32 to vector<1x1xf32>
    %cst_168 = arith.constant 5.000000e-01 : f32
    %717 = vector.broadcast %cst_168 : f32 to vector<1x1xf32>
    %718 = arith.mulf %717, %716 : vector<1x1xf32>
    %719 = tpu.iota {dimensions = array<i32: 1>} : vector<1x2xi32>
    %c0_i32 = arith.constant 0 : i32
    %720 = vector.broadcast %c0_i32 : i32 to vector<1x2xi32>
    %721 = arith.cmpi eq, %719, %720 : vector<1x2xi32>
    %722 = vector.shape_cast %711 : vector<1x1xf32> to vector<1x1xf32>
    %723 = vector.broadcast %722 : vector<1x1xf32> to vector<1x2xf32>
    %724 = vector.shape_cast %718 : vector<1x1xf32> to vector<1x1xf32>
    %725 = vector.broadcast %724 : vector<1x1xf32> to vector<1x2xf32>
    %726 = arith.select %721, %723, %725 : vector<1x2xi1>, vector<1x2xf32>
    %c0_169 = arith.constant 0 : index
    %c0_170 = arith.constant 0 : index
    %727 = vector.load %arg4[%c0_169, %c0_170] : memref<1x2xf32, #tpu.memory_space<vmem>>, vector<1x2xf32>
    tpu.vector_store %arg4[%c0_169, %c0_170], %726 {strides = array<i32>} : memref<1x2xf32, #tpu.memory_space<vmem>>, vector<1x2xf32>,
    return
  }
}

</mosaic_0001>

<bundles_post_ra>
// kernel: tpu_custom_call.1
= control target key start
LH: loop header
LB: loop body
LE: loop exit
PB: predicated region body
PF: predicated region fallthrough
CT: control target
= control target key end

     0   :  { %9 = vsyncpa [#allocation3], 0  ;;  %s4537_s0 = inlined_call_operand.vmem [shape: f32[40,8], index: 0, kind: input, shape index: {}]   ;;  %s4538_s1 = inlined_call_operand.vmem [shape: f32[40,4], index: 1, kind: input, shape index: {}]   ;;  %s4539_s2 = inlined_call_operand.hbm [shape: bf16[64,1280], index: 2, kind: input, shape index: {}]   ;;  %s4540_s3 = inlined_call_operand.vmem [shape: f32[8,64], index: 3, kind: input, shape index: {}]   ;;  %s4541_s4 = inlined_call_operand.hbm [shape: f32[1,2], index: 4, kind: output, shape index: {}]  }
   0x1   :  { %10 = vsyncpa [#allocation4], 0  ;;  %s3656_s15 = smov [#allocation2]  }
   0x2   :  { %s20_s16 = sshll.u32 %s3656_s15, 4  ;;  %s21_s16 = int_to_ptr.vmem [resolvable:$true] %s20_s16 }
   0x3   :  { %s3620_s17 = scalar_lea.vmem %s21_s16, 5120  ;;  %p3625_p1 = scmp.lt.s32.totalorder %s21_s16, %s21_s16 }
   0x4   :  { %p3621_p0 = scmp.ne.s32.totalorder %s21_s16, %s3620_s17  ;;  %p3626_p2 = scmp.lt.s32.totalorder %s3620_s17, %s3620_s17 }
   0x6   :  { %p3627_p3 = por %p3626_p2, %p3625_p1 }
   0x8   :  { %p3628_p4 = pnand %p3627_p3, %p3621_p0 }
   0xa   :  { %3631 = shalt.err (!%p3628_p4)
}
   0xb   :  { %s3657_s18 = smov 640   ;;  %s3658_s19 = smov 40  }
   0xc   :  { %26 = dma.hbm_to_vmem [thread:$0]  %s4539_s2, 5120, %s21_s16, [#allocation3], %s3657_s18, %s3657_s18, %s3658_s19  }
   0xd   :  { %3652 = dma.done.wait [#allocation3], 5120  }
   0xe   :  { %3653 = vsyncadd [#allocation3], 4294962176  ;;  %v3659_v0 = vmov 0.0   ;;  %vm3660_vm0 = vmmov 0   ;;  %v3661_v1 = vmov 0   ;;  %v33_v2 = vld [vmem:[#allocation2] sm:$0xff]  ;;  %v71_v22 = vlaneseq }
   0xf   :  { %3077 = vmatprep.subr.bf16.mxu1 %v3659_v0  ;;  %3079 = vmatprep.mubr.msk.bf16.mxu1 %vm3660_vm0, %v3659_v0  ;;  %vm126_vm1 = vcmask 1043456   ;;  %v2874_v3 = vcombine.high %v33_v2, %v33_v2  ;;  %v3706_v4 = vld [vmem:[#allocation2 + $0x8] ss:$40 sps:$4 sm:$0xff]   ;;  %v2873_v5 = vcombine.low %v33_v2, %v33_v2  ;;  %v103_v6 = vld [vmem:[%s4537_s0] sm:$0xff]  ;;  %vm116_vm2 = vcmask 64512   ;;  %v106_v16 = vld [vmem:[%s4537_s0 + $0x18] sm:$0xff] }
  0x10   :  { %165 = vmatprep.mubr.bf16.mxu0 %v3661_v1  ;;  %v104_v7 = vld [vmem:[%s4537_s0 + $0x8] sm:$0xff]  ;;  %v3714_v8 = vld [vmem:[#allocation2 + $0xfc] ss:$40 sps:$4 sm:$0xff]   ;;  %3078 = vmatpush3.bf16.msra.mxu1 %v3706_v4  ;;  %v105_v15 = vld [vmem:[%s4537_s0 + $0x10] sm:$0xff]  ;;  %v3762_v23 = vshrl.u32 %v71_v22, 7  ;;  %vm273_vm3 = vcmask 523264  }
  0x11   :  { %2875 = vmatprep.subr.msk.bf16.mxu0 %vm126_vm1, %v2874_v3  ;;  %v128_v9 = vsel %vm126_vm1, %v2873_v5, 0  ;;  %v108_v10 = vpack.c.bf16 %v104_v7, %v103_v6  ;;  %3083 = vmatprep.subr.bf16.mxu1 %v3659_v0  ;;  %v3718_v11 = vld [vmem:[#allocation2 + $0xac] ss:$40 sps:$4 sm:$0xff]   ;;  %v3728_v12 = vld [vmem:[#allocation2 + $0x5c] ss:$40 sps:$4 sm:$0xff]   ;;  %v109_v17 = vpack.c.bf16 %v106_v16, %v105_v15  ;;  %s3662_s9 = smov 4  }
  0x12   :  { %148 = vmatpush1.bf16.msra.mxu0 %v128_v9  ;;  %v3732_v13 = vld [vmem:[#allocation2 + $0xc] ss:$40 sps:$4 sm:$0xff]   ;;  %v3736_v14 = vld [vmem:[#allocation2 + $0x100] ss:$40 sps:$4 sm:$0xff]   ;;  %v3745_v18 = vld [vmem:[#allocation2 + $0xb0] ss:$40 sps:$4 sm:$0xff]  }
  0x13   :  { %3095 = vmatprep.subr.bf16.mxu0 %v3659_v0  ;;  %3080 = vmatmul.mubr.bf16.vlgmr.msra.gmra.mxu1 %v3661_v1  ;;  %v107_v19 = vld [vmem:[%s4537_s0 + $0x20] sm:$0xff]  ;;  %v73_v24 = vsub.s32 0, %v3762_v23  ;;  %v3784_v38 = vld [vmem:[#allocation2 + $0x10] ss:$40 sps:$4 sm:$0xff]   ;;  %v77_v49 = vsub.s32 1, %v3762_v23  ;;  %vm426_vm4 = vcmask 1041408  }
  0x14   :  { %3084 = vmatpush3.bf16.msra.mxu1 %v3714_v8  ;;  %3091 = vmatprep.mubr.msk.bf16.mxu1 %vm3660_vm0, %v3659_v0  ;;  %v3753_v20 = vld [vmem:[#allocation2 + $0x60] ss:$40 sps:$4 sm:$0xff]   ;;  %v110_v21 = vpack.c.bf16 %v107_v19, %v107_v19  ;;  %v3445_v58 = vld [vmem:[#allocation2 + $0x64] ss:$0 sps:$4 sm:$0x33]   ;;  %v81_v60 = vsub.s32 2, %v3762_v23 }
  0x15   :  { %2876 = vmatmul.mubr.msk.bf16.vlgmr.msra.gmra.mxu0 %vm116_vm2, %v108_v10  ;;  %3085 = vmatprep.subr.bf16.mxu1 %v3659_v0  ;;  %v3768_v25 = vld [vmem:[%s4540_s3] sm:$0xff]  ;;  %v3813_v59 = vsel %vm426_vm4, %v3445_v58, 0  ;;  %v3825_v15 = vld [vmem:[#allocation2 + $0x14] ss:$40 sps:$4 sm:$0xff]   ;;  %s3663_s10 = smov 124   ;;  %vm410_vm7 = vcmask 31744  }
  0x16   :  { %175 = vmatprep.mubr.bf16.mxu0 %v3661_v1  ;;  %3096 = vmatpush3.bf16.msra.mxu0 %v3736_v14  ;;  %v3771_v27 = vrot.slane %v3768_v25, %v73_v24  ;;  %v194_v40 = vld [vmem:[%s4538_s1] sm:$0xff]  ;;  %v3806_v50 = vrot.slane %v3768_v25, %v77_v49  ;;  %v3819_v61 = vrot.slane %v3768_v25, %v81_v60  ;;  %vm422_vm8 = vcmask 162816   ;;  %s3664_s11 = smov 64   ;;  %s3665_s12 = smov 96  }
  0x17   :  { %3097 = vmatprep.subr.bf16.mxu0 %v3659_v0  ;;  %401 = vrot.lane.b32.xlu0 %v194_v40, %s3662_s9  ;;  %v85_v40 = vsub.s32 3, %v3762_v23  ;;  %vm497_vm9 = vcmask 261120   ;;  %s3666_s13 = smov 80   ;;  %s3667_s14 = smov 32   ;;  %vm201_vm10 = vcmask 130048  }
  0x18   :  { %3086 = vmatpush3.bf16.msra.mxu1 %v3718_v11  ;;  %s3668_s15 = smov 112   ;;  %s3669_s16 = smov 16  }
  0x19   :  { %3087 = vmatprep.subr.bf16.mxu1 %v3659_v0  ;;  %v86_v49 = vrot.slane %v3768_v25, %v85_v40  ;;  %s3670_s19 = smov 116   ;;  %s3671_s20 = smov 20  }
  0x1a   :  { %3098 = vmatpush3.bf16.msra.mxu0 %v3745_v18  ;;  %s3673_s26 = smov 8  }
  0x1b   :  { %3099 = vmatprep.subr.bf16.mxu0 %v3659_v0 }
  0x1c   :  { %3088 = vmatpush3.bf16.msra.mxu1 %v3728_v12 }
  0x1d   :  { %3089 = vmatprep.subr.bf16.mxu1 %v3659_v0  ;;  %2877 = vmatmul.mubr.msk.bf16.gmra.mxu0 %vm116_vm2, %v109_v17 }
  0x1e   :  { %185 = vmatprep.mubr.bf16.mxu0 %v3661_v1  ;;  %3100 = vmatpush3.bf16.msra.mxu0 %v3753_v20 }
  0x1f   :  { %3101 = vmatprep.subr.bf16.mxu0 %v3659_v0 }
  0x20   :  { %3090 = vmatpush3.bf16.msra.mxu1 %v3732_v13 }
  0x21   :  { %3107 = vmatprep.subr.bf16.mxu1 %v3659_v0 }
  0x22   :  { %3102 = vmatpush3.bf16.msra.mxu0 %v3784_v38 }
  0x23   :  { %3115 = vmatprep.subr.bf16.mxu0 %v3659_v0 }
  0x25   :  { %2878 = vmatmul.mubr.msk.bf16.gmra.mxu0 %vm116_vm2, %v110_v21 }
  0x26   :  { %3103 = vmatprep.mubr.msk.bf16.mxu0 %vm3660_vm0, %v3659_v0 }
  0xd3   :  { %v239_v26 = vpop.f32.mrf.mxu1 }
  0xd5   :  { %v3773_v28 = vpop.f32.mrf.mxu0  ;;  %v3081_v30 = vpop.f32.mrf.mxu1 }
  0xd6   :  { %v245_v29 = vadd.f32 %v239_v26, %v3773_v28  ;;  %v402_v26 = vpop.permute.xlu0 %401 }
  0xd7   :  { %v242_v32 = vpop.f32.mrf.mxu1  ;;  %v3780_v36 = vpop.f32.mrf.mxu0 }
  0xd8   :  { %v246_v31 = vadd.f32 %v245_v29, %v3771_v27 }
  0xd9   :  { %v3082_v34 = vpop.f32.mrf.mxu1  ;;  %v3782_v37 = vpop.f32.mrf.mxu0 }
  0xda   :  { %v247_v33 = vmax.f32 %v246_v31, 0.0 }
  0xdb   :  { %v3786_v39 = vpop.f32.mrf.mxu0 }
  0xdc   :  { %v248_v35 = vpack.c.bf16 %v247_v33, %v247_v33 }
  0xdd   :  { %v3793_v41 = vpop.f32.mrf.mxu0 }
  0xde   :  { %3092 = vmatmul.mubr.msk.bf16.vlgmr.msra.gmra.mxu1 %vm273_vm3, %v248_v35 }
  0xdf   :  { %3111 = vmatprep.mubr.msk.bf16.mxu1 %vm3660_vm0, %v3659_v0  ;;  %v3796_v42 = vpop.f32.mrf.mxu0  ;;  %3108 = vmatpush3.bf16.msra.mxu1 %v3813_v59 }
  0xe0   :  { %3109 = vmatprep.subr.bf16.mxu1 %v3659_v0 }
  0xe1   :  { %v3798_v43 = vpop.f32.mrf.mxu0 }
  0xe3   :  { %v3800_v44 = vpop.f32.mrf.mxu0  ;;  %3110 = vmatpush3.bf16.msra.mxu1 %v3825_v15 }
  0xe4   :  { %3123 = vmatprep.subr.bf16.mxu1 %v3659_v0 }
  0xe5   :  { %v3802_v45 = vpop.f32.mrf.mxu0 }
  0xe7   :  { %v189_v46 = vpop.f32.mrf.mxu0 }
  0xe8   :  { %v3841_v46 = vld [vmem:[#allocation2 + $0x68] ss:$40 sps:$4 sm:$0xff]  }
  0xe9   :  { %v190_v47 = vpop.f32.mrf.mxu0 }
  0xeb   :  { %v191_v48 = vpop.f32.mrf.mxu0 }
  0xec   :  { %v3844_v48 = vld [vmem:[#allocation2 + $0x18] ss:$40 sps:$4 sm:$0xff]  }
 0x19e   :  { %v311_v51 = vpop.f32.mrf.mxu1 }
 0x19f   :  { %v312_v52 = vadd.f32 %v311_v51, %v3806_v50 }
 0x1a0   :  { %v3093_v53 = vpop.f32.mrf.mxu1 }
 0x1a1   :  { %v317_v54 = vmax.f32 %v312_v52, 0.0 }
 0x1a2   :  { %v314_v55 = vpop.f32.mrf.mxu1 }
 0x1a3   :  { %v318_v56 = vpack.c.bf16 %v317_v54, %v317_v54 }
 0x1a4   :  { %v3094_v57 = vpop.f32.mrf.mxu1 }
 0x1a5   :  { %3104 = vmatmul.mubr.msk.bf16.vlgmr.msra.gmra.mxu0 %vm273_vm3, %v318_v56 }
 0x1a6   :  { %3119 = vmatprep.mubr.msk.bf16.mxu0 %vm3660_vm0, %v3659_v0  ;;  %3116 = vmatpush3.bf16.msra.mxu0 %v3841_v46 }
 0x1a7   :  { %3117 = vmatprep.subr.bf16.mxu0 %v3659_v0 }
 0x1aa   :  { %3118 = vmatpush3.bf16.msra.mxu0 %v3844_v48 }
 0x1ab   :  { %3131 = vmatprep.subr.bf16.mxu0 %v3659_v0 }
 0x265   :  { %v380_v62 = vpop.f32.mrf.mxu0 }
 0x266   :  { %v3822_v63 = vadd.f32 %v380_v62, %v3819_v61  ;;  %v3449_v62 = vld [vmem:[#allocation2 + $0x70] ss:$0 sps:$4 sm:$0x33]  }
 0x267   :  { %v3105_v1 = vpop.f32.mrf.mxu0 }
 0x268   :  { %v387_v2 = vmin.f32 %v3822_v63, 20.0  ;;  %vm386_vm6 = vcmp.gt.f32.partialorder %v3822_v63, 20.0  ;;  %v3858_v1 = vsel %vm426_vm4, %v3449_v62, 0 }
 0x269   :  { %v383_v3 = vpop.f32.mrf.mxu0 }
 0x26a   :  { %v388_v5 = vmul.f32 1.442695, %v387_v2  ;;  %v3862_v3 = vld [vmem:[#allocation2 + $0x20] ss:$40 sps:$4 sm:$0xff]  }
 0x26b   :  { %v3106_v6 = vpop.f32.mrf.mxu0 }
 0x26c   :  { %3455 = vpow2.f32 %v388_v5  ;;  %v3874_v5 = vld [vmem:[#allocation2 + $0x6c] ss:$40 sps:$4 sm:$0xff]   ;;  %v3878_v6 = vld [vmem:[#allocation2 + $0x1c] ss:$40 sps:$4 sm:$0xff]  }
 0x279   :  { %v3456_v7 = vpop.eup %3455 }
 0x27a   :  { %v390_v9 = vadd.f32 1.0, %v3456_v7  ;;  %v393_v10 = vmul.f32 -0.5, %v3456_v7  ;;  %v396_v17 = vand.u32 2147483647, %v3456_v7 }
 0x27c   :  { %3457 = vlog2.f32 %v390_v9  ;;  %v394_v16 = vadd.f32 1.0, %v393_v10  ;;  %vm397_vm5 = vcmp.lt.f32.partialorder %v396_v17, 0.0004427343  ;;  %v89_v10 = vsub.s32 4, %v3762_v23 }
 0x27e   :  { %v395_v24 = vmul.f32 %v3456_v7, %v394_v16  ;;  %v97_v7 = vsub.s32 6, %v3762_v23  ;;  %v3887_v16 = vrot.slane %v3768_v25, %v89_v10 }
 0x280   :  { %v98_v9 = vrot.slane %v3768_v25, %v97_v7 }
 0x289   :  { %v3458_v19 = vpop.eup %3457 }
 0x28a   :  { %v392_v21 = vmul.f32 0.6931472, %v3458_v19 }
 0x28c   :  { %v398_v29 = vsel %vm397_vm5, %v395_v24, %v392_v21 }
 0x28d   :  { %v3831_v30 = vsel %vm386_vm6, %v3822_v63, %v398_v29 }
 0x28e   :  { %v404_v31 = vmul.f32 %v402_v26, %v3831_v30 }
 0x290   :  { %406 = vrot.lane.b32.xlu0 %v404_v31, %s3663_s10 }
 0x302   :  { %v407_v32 = vpop.permute.xlu0 %406 }
 0x303   :  { %v409_v33 = vadd.f32 %v407_v32, %v3822_v63 }
 0x305   :  { %v411_v34 = vsel %vm410_vm7, %v409_v33, 0.0 }
 0x306   :  { %v412_v35 = vpack.c.bf16 %v411_v34, %v411_v34 }
 0x308   :  { %3112 = vmatmul.mubr.msk.bf16.vlgmr.msra.gmra.mxu1 %vm422_vm8, %v412_v35 }
 0x309   :  { %3127 = vmatprep.mubr.msk.bf16.mxu1 %vm3660_vm0, %v3659_v0  ;;  %3124 = vmatpush3.bf16.msra.mxu1 %v3874_v5 }
 0x30a   :  { %3125 = vmatprep.subr.bf16.mxu1 %v3659_v0 }
 0x30d   :  { %3126 = vmatpush3.bf16.msra.mxu1 %v3878_v6 }
 0x30e   :  { %3139 = vmatprep.subr.bf16.mxu1 %v3659_v0 }
 0x3c8   :  { %v464_v47 = vpop.f32.mrf.mxu1 }
 0x3c9   :  { %471 = vrot.lane.b32.xlu1 %v464_v47, %s3664_s11 }
 0x3ca   :  { %v3113_v51 = vpop.f32.mrf.mxu1 }
 0x3cc   :  { %v467_v52 = vpop.f32.mrf.mxu1 }
 0x3cd   :  { %476 = vrot.lane.b32.xlu1 %v86_v49, %s3664_s11 }
 0x3ce   :  { %v3114_v53 = vpop.f32.mrf.mxu1 }
 0x43b   :  { %v472_v54 = vpop.permute.xlu1 %471 }
 0x43c   :  { %v474_v55 = vadd.f32 %v472_v54, %v3773_v28 }
 0x43f   :  { %v3853_v56 = vpop.permute.xlu1 %476 }
 0x440   :  { %v479_v57 = vadd.f32 %v3853_v56, %v474_v55 }
 0x442   :  { %v480_v58 = vmax.f32 %v479_v57, 0.0 }
 0x444   :  { %v481_v60 = vpack.c.bf16 %v480_v58, %v480_v58 }
 0x446   :  { %483 = vrot.lane.b32.xlu0 %v481_v60, %s3664_s11 }
 0x44a   :  { %724 = vrot.lane.b32.xlu0 %v98_v9, %s3665_s12 }
 0x4b8   :  { %v484_v2 = vpop.permute.xlu0 %483 }
 0x4b9   :  { %3120 = vmatmul.mubr.msk.bf16.vlgmr.msra.gmra.mxu0 %vm497_vm9, %v484_v2 }
 0x4ba   :  { %3132 = vmatpush3.bf16.msra.mxu0 %v3858_v1  ;;  %3135 = vmatprep.mubr.msk.bf16.mxu0 %vm3660_vm0, %v3659_v0 }
 0x4bb   :  { %3133 = vmatprep.subr.bf16.mxu0 %v3659_v0 }
 0x4bc   :  { %v3894_v47 = vpop.permute.xlu0 %724 }
 0x4be   :  { %3134 = vmatpush3.bf16.msra.mxu0 %v3862_v3 }
 0x4bf   :  { %3147 = vmatprep.subr.bf16.mxu0 %v3659_v0 }
 0x4c1   :  { %3136 = vmatmul.mubr.msk.bf16.vlgmr.msra.gmra.mxu0 %vm422_vm8, %v412_v35 }
 0x4c2   :  { %3148 = vmatpush3.bf16.msra.mxu0 %v3706_v4  ;;  %3149 = vmatprep.mubr.msk.bf16.mxu0 %vm3660_vm0, %v3659_v0 }
 0x4c3   :  { %3165 = vmatprep.subr.bf16.mxu0 %v3659_v0 }
 0x579   :  { %v535_v17 = vpop.f32.mrf.mxu0 }
 0x57a   :  { %v536_v19 = vadd.f32 %v535_v17, %v3887_v16  ;;  %v3904_v17 = vld [vmem:[#allocation2 + $0x74] ss:$40 sps:$4 sm:$0xff]  }
 0x57b   :  { %v3121_v21 = vpop.f32.mrf.mxu0 }
 0x57c   :  { %v541_v24 = vmax.f32 %v536_v19, 0.0  ;;  %v3907_v19 = vld [vmem:[#allocation2 + $0x24] ss:$40 sps:$4 sm:$0xff]  }
 0x57d   :  { %v538_v26 = vpop.f32.mrf.mxu0 }
 0x57e   :  { %v542_v29 = vpack.c.bf16 %v541_v24, %v541_v24 }
 0x57f   :  { %v3122_v31 = vpop.f32.mrf.mxu0 }
 0x580   :  { %3128 = vmatmul.mubr.msk.bf16.vlgmr.msra.gmra.mxu1 %vm497_vm9, %v542_v29 }
 0x581   :  { %v711_v32 = vpop.f32.mrf.mxu0  ;;  %3143 = vmatprep.mubr.msk.bf16.mxu1 %vm3660_vm0, %v3659_v0  ;;  %3140 = vmatpush3.bf16.msra.mxu1 %v3904_v17 }
 0x582   :  { %718 = vrot.lane.b32.xlu1 %v711_v32, %s3665_s12  ;;  %3141 = vmatprep.subr.bf16.mxu1 %v3659_v0 }
 0x583   :  { %v3137_v33 = vpop.f32.mrf.mxu0 }
 0x585   :  { %v714_v34 = vpop.f32.mrf.mxu0  ;;  %3142 = vmatpush3.bf16.msra.mxu1 %v3907_v19 }
 0x586   :  { %3153 = vmatprep.subr.bf16.mxu1 %v3659_v0 }
 0x587   :  { %v3138_v35 = vpop.f32.mrf.mxu0 }
 0x5f4   :  { %v719_v40 = vpop.permute.xlu1 %718 }
 0x5f5   :  { %v722_v49 = vadd.f32 %v719_v40, %v3780_v36  ;;  %v721_v52 = vadd.f32 %v719_v40, %v3773_v28  ;;  %v101_v40 = vsub.s32 7, %v3762_v23 }
 0x5f7   :  { %v728_v51 = vadd.f32 %v3894_v47, %v722_v49  ;;  %v727_v54 = vadd.f32 %v3894_v47, %v721_v52  ;;  %v3931_v49 = vrot.slane %v3768_v25, %v101_v40 }
 0x5f9   :  { %736 = vrot.lane.b32.xlu1 %v728_v51, %s3666_s13  ;;  %v2903_v58 = vmul.f32 -1.442695, %v727_v54 }
 0x5fb   :  { %3459 = vpow2.f32 %v2903_v58 }
 0x608   :  { %v3460_v62 = vpop.eup %3459 }
 0x609   :  { %v732_v2 = vadd.f32 1.0, %v3460_v62 }
 0x60b   :  { %3461 = vrcp.f32 %v732_v2 }
 0x618   :  { %v3462_v36 = vpop.eup %3461 }
 0x619   :  { %v746_v24 = vsub.f32 1.0, %v3462_v36  ;;  %v752_v29 = vmul.f32 0.0, %v3462_v36 }
 0x640   :  { %v3900_v53 = vpop.f32.mrf.mxu1 }
 0x642   :  { %v3129_v55 = vpop.f32.mrf.mxu1 }
 0x644   :  { %v595_v57 = vpop.f32.mrf.mxu1 }
 0x646   :  { %v3130_v60 = vpop.f32.mrf.mxu1 }
 0x66b   :  { %v737_v7 = vpop.permute.xlu1 %736 }
 0x66c   :  { %v739_v9 = vmul.f32 %v3462_v36, %v737_v7 }
 0x66e   :  { %741 = vrot.lane.b32.xlu0 %v739_v9, %s3667_s14 }
 0x6e0   :  { %v742_v10 = vpop.permute.xlu0 %741 }
 0x6e1   :  { %v744_v28 = vadd.f32 %v742_v10, %v728_v51 }
 0x6e3   :  { %3463 = vtanh.f32 %v744_v28  ;;  %v841_v28 = vld [vmem:[%s4538_s1 + $0x8] sm:$0xff] }
 0x6f0   :  { %v3464_v21 = vpop.eup %3463 }
 0x6f1   :  { %748 = vrot.lane.b32.xlu1 %v3464_v21, %s3668_s15 }
 0x763   :  { %v749_v26 = vpop.permute.xlu1 %748 }
 0x764   :  { %v751_v31 = vmul.f32 %v749_v26, %v746_v24 }
 0x766   :  { %v3913_v32 = vadd.f32 %v752_v29, %v751_v31 }
 0x768   :  { %755 = vrot.lane.b32.xlu0 %v3913_v32, %s3669_s16 }
 0x7da   :  { %v756_v33 = vpop.permute.xlu0 %755 }
 0x7db   :  { %v758_v34 = vsel %vm201_vm10, %v756_v33, 0.0 }
 0x7dc   :  { %v759_v35 = vpack.c.bf16 %v758_v34, %v758_v34 }
 0x7de   :  { %3144 = vmatmul.mubr.msk.bf16.vlgmr.msra.gmra.mxu1 %vm497_vm9, %v759_v35 }
 0x7df   :  { %3154 = vmatpush3.bf16.msra.mxu1 %v3714_v8  ;;  %3161 = vmatprep.mubr.msk.bf16.mxu1 %vm3660_vm0, %v3659_v0 }
 0x7e0   :  { %3155 = vmatprep.subr.bf16.mxu1 %v3659_v0 }
 0x7e3   :  { %3156 = vmatpush3.bf16.msra.mxu1 %v3718_v11 }
 0x7e4   :  { %3157 = vmatprep.subr.bf16.mxu1 %v3659_v0 }
 0x7e7   :  { %3158 = vmatpush3.bf16.msra.mxu1 %v3728_v12 }
 0x7e8   :  { %3159 = vmatprep.subr.bf16.mxu1 %v3659_v0 }
 0x7eb   :  { %3160 = vmatpush3.bf16.msra.mxu1 %v3732_v13 }
 0x7ec   :  { %3177 = vmatprep.subr.bf16.mxu1 %v3659_v0 }
 0x89e   :  { %v809_v51 = vpop.f32.mrf.mxu1 }
 0x89f   :  { %v810_v52 = vadd.f32 %v809_v51, %v3931_v49 }
 0x8a0   :  { %v3145_v54 = vpop.f32.mrf.mxu1 }
 0x8a1   :  { %822 = vrot.lane.b32.xlu1 %v810_v52, %s3666_s13  ;;  %v2907_v58 = vmul.f32 -1.442695, %v810_v52 }
 0x8a2   :  { %v812_v55 = vpop.f32.mrf.mxu1 }
 0x8a3   :  { %3465 = vpow2.f32 %v2907_v58 }
 0x8a4   :  { %v3146_v57 = vpop.f32.mrf.mxu1 }
 0x8b0   :  { %v3466_v60 = vpop.eup %3465 }
 0x8b1   :  { %v818_v62 = vadd.f32 1.0, %v3466_v60 }
 0x8b3   :  { %3467 = vrcp.f32 %v818_v62 }
 0x8c0   :  { %v3468_v2 = vpop.eup %3467 }
 0x8c1   :  { %v832_v21 = vsub.f32 1.0, %v3468_v2  ;;  %v838_v26 = vmul.f32 0.0, %v3468_v2 }
 0x913   :  { %v823_v36 = vpop.permute.xlu1 %822 }
 0x914   :  { %v825_v7 = vmul.f32 %v3468_v2, %v823_v36 }
 0x916   :  { %827 = vrot.lane.b32.xlu0 %v825_v7, %s3667_s14 }
 0x988   :  { %v828_v25 = vpop.permute.xlu0 %827 }
 0x989   :  { %v830_v9 = vadd.f32 %v828_v25, %v810_v52 }
 0x98b   :  { %3469 = vtanh.f32 %v830_v9 }
 0x998   :  { %v3470_v10 = vpop.eup %3469 }
 0x999   :  { %834 = vrot.lane.b32.xlu1 %v3470_v10, %s3668_s15 }
 0x99d   :  { %996 = vrot.lane.b32.xlu1 %v841_v28, %s3662_s9 }
 0xa0b   :  { %v835_v24 = vpop.permute.xlu1 %834 }
 0xa0c   :  { %v837_v29 = vmul.f32 %v835_v24, %v832_v21 }
 0xa0e   :  { %v3941_v31 = vadd.f32 %v838_v26, %v837_v29 }
 0xa10   :  { %1006 = vrot.lane.b32.xlu1 %v3941_v31, %s3670_s19  ;;  %v842_v33 = vpack.c.bf16 %v3941_v31, %v3941_v31 }
 0xa12   :  { %844 = vrot.lane.b32.xlu0 %v842_v33, %s3668_s15 }
 0xa84   :  { %v845_v34 = vpop.permute.xlu0 %844 }
 0xa85   :  { %3150 = vmatmul.mubr.msk.bf16.vlgmr.msra.gmra.mxu0 %vm201_vm10, %v845_v34 }
 0xa86   :  { %3166 = vmatpush3.bf16.msra.mxu0 %v3736_v14  ;;  %3173 = vmatprep.mubr.msk.bf16.mxu0 %vm3660_vm0, %v3659_v0 }
 0xa87   :  { %3167 = vmatprep.subr.bf16.mxu0 %v3659_v0 }
 0xa8a   :  { %3168 = vmatpush3.bf16.msra.mxu0 %v3745_v18 }
 0xa8b   :  { %3169 = vmatprep.subr.bf16.mxu0 %v3659_v0 }
 0xa8e   :  { %3170 = vmatpush3.bf16.msra.mxu0 %v3753_v20 }
 0xa8f   :  { %3171 = vmatprep.subr.bf16.mxu0 %v3659_v0 }
 0xa92   :  { %3172 = vmatpush3.bf16.msra.mxu0 %v3784_v38 }
 0xa93   :  { %3185 = vmatprep.subr.bf16.mxu0 %v3659_v0 }
 0xb45   :  { %v883_v35 = vpop.f32.mrf.mxu0 }
 0xb46   :  { %v889_v40 = vadd.f32 %v883_v35, %v3782_v37 }
 0xb47   :  { %v3151_v51 = vpop.f32.mrf.mxu0 }
 0xb48   :  { %v890_v52 = vadd.f32 %v889_v40, %v3771_v27 }
 0xb49   :  { %v886_v54 = vpop.f32.mrf.mxu0 }
 0xb4a   :  { %v891_v55 = vmax.f32 %v890_v52, 0.0 }
 0xb4b   :  { %v3152_v57 = vpop.f32.mrf.mxu0 }
 0xb4c   :  { %v892_v58 = vpack.c.bf16 %v891_v55, %v891_v55 }
 0xb4e   :  { %3162 = vmatmul.mubr.msk.bf16.vlgmr.msra.gmra.mxu1 %vm273_vm3, %v892_v58 }
 0xb4f   :  { %3178 = vmatpush3.bf16.msra.mxu1 %v3813_v59  ;;  %3181 = vmatprep.mubr.msk.bf16.mxu1 %vm3660_vm0, %v3659_v0 }
 0xb50   :  { %3179 = vmatprep.subr.bf16.mxu1 %v3659_v0 }
 0xb53   :  { %3180 = vmatpush3.bf16.msra.mxu1 %v3825_v15 }
 0xb54   :  { %3193 = vmatprep.subr.bf16.mxu1 %v3659_v0 }
 0xc0e   :  { %v930_v60 = vpop.f32.mrf.mxu1 }
 0xc0f   :  { %v931_v62 = vadd.f32 %v930_v60, %v3806_v50  ;;  %v997_v60 = vpop.permute.xlu1 %996 }
 0xc10   :  { %v3163_v2 = vpop.f32.mrf.mxu1 }
 0xc11   :  { %v936_v36 = vmax.f32 %v931_v62, 0.0 }
 0xc12   :  { %v933_v7 = vpop.f32.mrf.mxu1 }
 0xc13   :  { %v937_v25 = vpack.c.bf16 %v936_v36, %v936_v36 }
 0xc14   :  { %v3164_v9 = vpop.f32.mrf.mxu1 }
 0xc15   :  { %3174 = vmatmul.mubr.msk.bf16.vlgmr.msra.gmra.mxu0 %vm273_vm3, %v937_v25  ;;  %v1007_v25 = vpop.permute.xlu1 %1006 }
 0xc16   :  { %3186 = vmatpush3.bf16.msra.mxu0 %v3841_v46  ;;  %3189 = vmatprep.mubr.msk.bf16.mxu0 %vm3660_vm0, %v3659_v0 }
 0xc17   :  { %3187 = vmatprep.subr.bf16.mxu0 %v3659_v0 }
 0xc1a   :  { %3188 = vmatpush3.bf16.msra.mxu0 %v3844_v48 }
 0xc1b   :  { %3201 = vmatprep.subr.bf16.mxu0 %v3659_v0 }
 0xcd5   :  { %v975_v10 = vpop.f32.mrf.mxu0 }
 0xcd6   :  { %v3977_v28 = vadd.f32 %v975_v10, %v3819_v61 }
 0xcd7   :  { %v3175_v21 = vpop.f32.mrf.mxu0 }
 0xcd8   :  { %v982_v24 = vmin.f32 %v3977_v28, 20.0  ;;  %vm981_vm12 = vcmp.gt.f32.partialorder %v3977_v28, 20.0 }
 0xcd9   :  { %v978_v26 = vpop.f32.mrf.mxu0 }
 0xcda   :  { %v983_v29 = vmul.f32 1.442695, %v982_v24 }
 0xcdb   :  { %v3176_v33 = vpop.f32.mrf.mxu0 }
 0xcdc   :  { %3471 = vpow2.f32 %v983_v29 }
 0xce9   :  { %v3472_v34 = vpop.eup %3471 }
 0xcea   :  { %v985_v35 = vadd.f32 1.0, %v3472_v34  ;;  %v988_v40 = vmul.f32 -0.5, %v3472_v34  ;;  %v991_v52 = vand.u32 2147483647, %v3472_v34 }
 0xcec   :  { %3473 = vlog2.f32 %v985_v35  ;;  %v989_v51 = vadd.f32 1.0, %v988_v40  ;;  %vm992_vm11 = vcmp.lt.f32.partialorder %v991_v52, 0.0004427343 }
 0xcee   :  { %v990_v57 = vmul.f32 %v3472_v34, %v989_v51 }
 0xcf9   :  { %v3474_v54 = vpop.eup %3473 }
 0xcfa   :  { %v987_v55 = vmul.f32 0.6931472, %v3474_v54 }
 0xcfc   :  { %v993_v58 = vsel %vm992_vm11, %v990_v57, %v987_v55 }
 0xcfd   :  { %v3982_v62 = vsel %vm981_vm12, %v3977_v28, %v993_v58 }
 0xcfe   :  { %v999_v2 = vmul.f32 %v997_v60, %v3982_v62 }
 0xd00   :  { %1001 = vrot.lane.b32.xlu0 %v999_v2, %s3663_s10 }
 0xd72   :  { %v1002_v36 = vpop.permute.xlu0 %1001 }
 0xd73   :  { %v1004_v7 = vadd.f32 %v1002_v36, %v3977_v28 }
 0xd75   :  { %v1009_v9 = vsel %vm410_vm7, %v1004_v7, %v1007_v25 }
 0xd76   :  { %v1010_v10 = vpack.c.bf16 %v1009_v9, %v1009_v9 }
 0xd78   :  { %3182 = vmatmul.mubr.msk.bf16.vlgmr.msra.gmra.mxu1 %vm422_vm8, %v1010_v10 }
 0xd79   :  { %3194 = vmatpush3.bf16.msra.mxu1 %v3874_v5  ;;  %3197 = vmatprep.mubr.msk.bf16.mxu1 %vm3660_vm0, %v3659_v0 }
 0xd7a   :  { %3195 = vmatprep.subr.bf16.mxu1 %v3659_v0 }
 0xd7d   :  { %3196 = vmatpush3.bf16.msra.mxu1 %v3878_v6 }
 0xd7e   :  { %3209 = vmatprep.subr.bf16.mxu1 %v3659_v0 }
 0xe38   :  { %v1048_v21 = vpop.f32.mrf.mxu1 }
 0xe39   :  { %1055 = vrot.lane.b32.xlu0 %v1048_v21, %s3664_s11 }
 0xe3a   :  { %v3183_v24 = vpop.f32.mrf.mxu1 }
 0xe3c   :  { %v1051_v26 = vpop.f32.mrf.mxu1 }
 0xe3d   :  { %1220 = vrot.lane.b32.xlu0 %v3913_v32, %s3671_s20 }
 0xe3e   :  { %v3184_v29 = vpop.f32.mrf.mxu1 }
 0xeab   :  { %v1056_v33 = vpop.permute.xlu0 %1055 }
 0xeac   :  { %v1058_v34 = vadd.f32 %v1056_v33, %v3782_v37 }
 0xeae   :  { %v1059_v35 = vadd.f32 %v1058_v34, %v3853_v56 }
 0xeaf   :  { %v1221_v54 = vpop.permute.xlu0 %1220 }
 0xeb0   :  { %v1060_v40 = vmax.f32 %v1059_v35, 0.0  ;;  %v1223_v55 = vsel %vm410_vm7, %v1004_v7, %v1221_v54 }
 0xeb1   :  { %v1224_v57 = vpack.c.bf16 %v1223_v55, %v1223_v55 }
 0xeb2   :  { %v1061_v51 = vpack.c.bf16 %v1060_v40, %v1060_v40 }
 0xeb4   :  { %1063 = vrot.lane.b32.xlu1 %v1061_v51, %s3664_s11 }
 0xf26   :  { %v1064_v52 = vpop.permute.xlu1 %1063 }
 0xf27   :  { %3190 = vmatmul.mubr.msk.bf16.vlgmr.msra.gmra.mxu0 %vm497_vm9, %v1064_v52 }
 0xf28   :  { %3202 = vmatpush3.bf16.msra.mxu0 %v3858_v1  ;;  %3205 = vmatprep.mubr.msk.bf16.mxu0 %vm3660_vm0, %v3659_v0 }
 0xf29   :  { %3203 = vmatprep.subr.bf16.mxu0 %v3659_v0 }
 0xf2c   :  { %3204 = vmatpush3.bf16.msra.mxu0 %v3862_v3 }
 0xf2d   :  { %3217 = vmatprep.subr.bf16.mxu0 %v3659_v0 }
 0xf2f   :  { %3206 = vmatmul.mubr.msk.bf16.vlgmr.msra.gmra.mxu0 %vm422_vm8, %v1224_v57 }
 0xf30   :  { %3218 = vmatpush3.bf16.msra.mxu0 %v3706_v4  ;;  %3219 = vmatprep.mubr.msk.bf16.mxu0 %vm3660_vm0, %v3659_v0 }
 0xf31   :  { %3235 = vmatprep.subr.bf16.mxu0 %v3659_v0 }
 0xfe7   :  { %v1102_v58 = vpop.f32.mrf.mxu0 }
 0xfe8   :  { %v1103_v60 = vadd.f32 %v1102_v58, %v3887_v16 }
 0xfe9   :  { %v3191_v2 = vpop.f32.mrf.mxu0 }
 0xfea   :  { %v1108_v36 = vmax.f32 %v1103_v60, 0.0 }
 0xfeb   :  { %v1105_v7 = vpop.f32.mrf.mxu0 }
 0xfec   :  { %v1109_v25 = vpack.c.bf16 %v1108_v36, %v1108_v36 }
 0xfed   :  { %v3192_v9 = vpop.f32.mrf.mxu0 }
 0xfee   :  { %3198 = vmatmul.mubr.msk.bf16.vlgmr.msra.gmra.mxu1 %vm497_vm9, %v1109_v25 }
 0xfef   :  { %v1262_v10 = vpop.f32.mrf.mxu0  ;;  %3210 = vmatpush3.bf16.msra.mxu1 %v3904_v17  ;;  %3213 = vmatprep.mubr.msk.bf16.mxu1 %vm3660_vm0, %v3659_v0 }
 0xff0   :  { %1269 = vrot.lane.b32.xlu1 %v1262_v10, %s3665_s12  ;;  %3211 = vmatprep.subr.bf16.mxu1 %v3659_v0 }
 0xff1   :  { %v3207_v4 = vpop.f32.mrf.mxu0 }
 0xff3   :  { %v1265_v21 = vpop.f32.mrf.mxu0  ;;  %3212 = vmatpush3.bf16.msra.mxu1 %v3907_v19 }
 0xff4   :  { %3223 = vmatprep.subr.bf16.mxu1 %v3659_v0 }
 0xff5   :  { %v3208_v24 = vpop.f32.mrf.mxu0 }
0x1062   :  { %v1270_v26 = vpop.permute.xlu1 %1269 }
0x1063   :  { %v1273_v29 = vadd.f32 %v1270_v26, %v3786_v39  ;;  %v1272_v34 = vadd.f32 %v1270_v26, %v3782_v37 }
0x1065   :  { %v1275_v33 = vadd.f32 %v1273_v29, %v3894_v47  ;;  %v1274_v40 = vadd.f32 %v1272_v34, %v3894_v47 }
0x1067   :  { %1283 = vrot.lane.b32.xlu0 %v1275_v33, %s3666_s13  ;;  %v2916_v54 = vmul.f32 -1.442695, %v1274_v40 }
0x1069   :  { %3475 = vpow2.f32 %v2916_v54 }
0x1076   :  { %v3476_v57 = vpop.eup %3475 }
0x1077   :  { %v1279_v58 = vadd.f32 1.0, %v3476_v57 }
0x1079   :  { %3477 = vrcp.f32 %v1279_v58 }
0x1086   :  { %v3478_v60 = vpop.eup %3477 }
0x1087   :  { %v1293_v25 = vsub.f32 1.0, %v3478_v60  ;;  %v1299_v10 = vmul.f32 %v3478_v60, %v3913_v32 }
0x10ae   :  { %v4027_v35 = vpop.f32.mrf.mxu1 }
0x10b0   :  { %v3199_v51 = vpop.f32.mrf.mxu1 }
0x10b2   :  { %v1150_v52 = vpop.f32.mrf.mxu1 }
0x10b4   :  { %v3200_v55 = vpop.f32.mrf.mxu1 }
0x10d9   :  { %v1284_v39 = vpop.permute.xlu0 %1283 }
0x10da   :  { %v1286_v2 = vmul.f32 %v3478_v60, %v1284_v39  ;;  %v1376_v60 = vld [vmem:[%s4538_s1 + $0x10] sm:$0xff] }
0x10dc   :  { %1288 = vrot.lane.b32.xlu1 %v1286_v2, %s3667_s14 }
0x114e   :  { %v1289_v36 = vpop.permute.xlu1 %1288 }
0x114f   :  { %v1291_v7 = vadd.f32 %v1289_v36, %v1275_v33 }
0x1151   :  { %3479 = vtanh.f32 %v1291_v7 }
0x115e   :  { %v3480_v37 = vpop.eup %3479 }
0x115f   :  { %1295 = vrot.lane.b32.xlu0 %v3480_v37, %s3668_s15 }
0x11d1   :  { %v1296_v9 = vpop.permute.xlu0 %1295 }
0x11d2   :  { %v1298_v4 = vmul.f32 %v1296_v9, %v1293_v25 }
0x11d4   :  { %v4033_v21 = vadd.f32 %v1299_v10, %v1298_v4 }
0x11d6   :  { %1302 = vrot.lane.b32.xlu1 %v4033_v21, %s3669_s16 }
0x1248   :  { %v1303_v24 = vpop.permute.xlu1 %1302 }
0x1249   :  { %v1305_v26 = vsel %vm201_vm10, %v1303_v24, %v3941_v31 }
0x124a   :  { %v1306_v29 = vpack.c.bf16 %v1305_v26, %v1305_v26 }
0x124c   :  { %3214 = vmatmul.mubr.msk.bf16.vlgmr.msra.gmra.mxu1 %vm497_vm9, %v1306_v29 }
0x124d   :  { %3224 = vmatpush3.bf16.msra.mxu1 %v3714_v8  ;;  %3231 = vmatprep.mubr.msk.bf16.mxu1 %vm3660_vm0, %v3659_v0 }
0x124e   :  { %3225 = vmatprep.subr.bf16.mxu1 %v3659_v0 }
0x1251   :  { %3226 = vmatpush3.bf16.msra.mxu1 %v3718_v11 }
0x1252   :  { %3227 = vmatprep.subr.bf16.mxu1 %v3659_v0 }
0x1255   :  { %3228 = vmatpush3.bf16.msra.mxu1 %v3728_v12 }
0x1256   :  { %3229 = vmatprep.subr.bf16.mxu1 %v3659_v0 }
0x1259   :  { %3230 = vmatpush3.bf16.msra.mxu1 %v3732_v13 }
0x125a   :  { %3247 = vmatprep.subr.bf16.mxu1 %v3659_v0 }
0x130c   :  { %v1344_v32 = vpop.f32.mrf.mxu1 }
0x130d   :  { %v1345_v8 = vadd.f32 %v1344_v32, %v3931_v49 }
0x130e   :  { %v3215_v33 = vpop.f32.mrf.mxu1 }
0x130f   :  { %1357 = vrot.lane.b32.xlu0 %v1345_v8, %s3666_s13  ;;  %v2918_v51 = vmul.f32 -1.442695, %v1345_v8 }
0x1310   :  { %v1347_v34 = vpop.f32.mrf.mxu1 }
0x1311   :  { %3481 = vpow2.f32 %v2918_v51 }
0x1312   :  { %v3216_v40 = vpop.f32.mrf.mxu1 }
0x131e   :  { %v3482_v11 = vpop.eup %3481 }
0x131f   :  { %v1353_v52 = vadd.f32 1.0, %v3482_v11 }
0x1321   :  { %3483 = vrcp.f32 %v1353_v52 }
0x132e   :  { %v3484_v12 = vpop.eup %3483 }
0x132f   :  { %v1367_v39 = vsub.f32 1.0, %v3484_v12  ;;  %v1373_v36 = vmul.f32 %v3484_v12, %v3941_v31 }
0x1381   :  { %v1358_v54 = vpop.permute.xlu0 %1357 }
0x1382   :  { %v1360_v55 = vmul.f32 %v3484_v12, %v1358_v54 }
0x1384   :  { %1362 = vrot.lane.b32.xlu1 %v1360_v55, %s3667_s14 }
0x13f6   :  { %v1363_v13 = vpop.permute.xlu1 %1362 }
0x13f7   :  { %v1365_v57 = vadd.f32 %v1363_v13, %v1345_v8 }
0x13f9   :  { %3485 = vtanh.f32 %v1365_v57 }
0x1406   :  { %v3486_v58 = vpop.eup %3485 }
0x1407   :  { %1369 = vrot.lane.b32.xlu0 %v3486_v58, %s3668_s15 }
0x140b   :  { %1531 = vrot.lane.b32.xlu0 %v1376_v60, %s3662_s9 }
0x1479   :  { %v1370_v2 = vpop.permute.xlu0 %1369 }
0x147a   :  { %v1372_v7 = vmul.f32 %v1370_v2, %v1367_v39 }
0x147c   :  { %v4059_v37 = vadd.f32 %v1373_v36, %v1372_v7 }
0x147d   :  { %v1532_v7 = vpop.permute.xlu0 %1531 }
0x147e   :  { %1541 = vrot.lane.b32.xlu0 %v4059_v37, %s3670_s19  ;;  %v1377_v25 = vpack.c.bf16 %v4059_v37, %v4059_v37 }
0x1480   :  { %1379 = vrot.lane.b32.xlu1 %v1377_v25, %s3668_s15 }
0x14f2   :  { %v1380_v9 = vpop.permute.xlu1 %1379 }
0x14f3   :  { %3220 = vmatmul.mubr.msk.bf16.vlgmr.msra.gmra.mxu0 %vm201_vm10, %v1380_v9 }
0x14f4   :  { %3236 = vmatpush3.bf16.msra.mxu0 %v3736_v14  ;;  %3243 = vmatprep.mubr.msk.bf16.mxu0 %vm3660_vm0, %v3659_v0 }
0x14f5   :  { %3237 = vmatprep.subr.bf16.mxu0 %v3659_v0 }
0x14f8   :  { %3238 = vmatpush3.bf16.msra.mxu0 %v3745_v18 }
0x14f9   :  { %3239 = vmatprep.subr.bf16.mxu0 %v3659_v0 }
0x14fc   :  { %3240 = vmatpush3.bf16.msra.mxu0 %v3753_v20 }
0x14fd   :  { %3241 = vmatprep.subr.bf16.mxu0 %v3659_v0 }
0x1500   :  { %3242 = vmatpush3.bf16.msra.mxu0 %v3784_v38 }
0x1501   :  { %3255 = vmatprep.subr.bf16.mxu0 %v3659_v0 }
0x15b3   :  { %v1418_v31 = vpop.f32.mrf.mxu0 }
0x15b4   :  { %v1424_v14 = vadd.f32 %v1418_v31, %v3793_v41 }
0x15b5   :  { %v3221_v10 = vpop.f32.mrf.mxu0 }
0x15b6   :  { %v1425_v4 = vadd.f32 %v1424_v14, %v3771_v27  ;;  %v1542_v10 = vpop.permute.xlu0 %1541 }
0x15b7   :  { %v1421_v24 = vpop.f32.mrf.mxu0 }
0x15b8   :  { %v1426_v26 = vmax.f32 %v1425_v4, 0.0 }
0x15b9   :  { %v3222_v29 = vpop.f32.mrf.mxu0 }
0x15ba   :  { %v1427_v18 = vpack.c.bf16 %v1426_v26, %v1426_v26 }
0x15bc   :  { %3232 = vmatmul.mubr.msk.bf16.vlgmr.msra.gmra.mxu1 %vm273_vm3, %v1427_v18 }
0x15bd   :  { %3248 = vmatpush3.bf16.msra.mxu1 %v3813_v59  ;;  %3251 = vmatprep.mubr.msk.bf16.mxu1 %vm3660_vm0, %v3659_v0 }
0x15be   :  { %3249 = vmatprep.subr.bf16.mxu1 %v3659_v0 }
0x15c1   :  { %3250 = vmatpush3.bf16.msra.mxu1 %v3825_v15 }
0x15c2   :  { %3263 = vmatprep.subr.bf16.mxu1 %v3659_v0 }
0x167c   :  { %v1465_v20 = vpop.f32.mrf.mxu1 }
0x167d   :  { %v1466_v38 = vadd.f32 %v1465_v20, %v3806_v50 }
0x167e   :  { %v3233_v32 = vpop.f32.mrf.mxu1 }
0x167f   :  { %v1471_v8 = vmax.f32 %v1466_v38, 0.0 }
0x1680   :  { %v1468_v33 = vpop.f32.mrf.mxu1 }
0x1681   :  { %v1472_v34 = vpack.c.bf16 %v1471_v8, %v1471_v8 }
0x1682   :  { %v3234_v40 = vpop.f32.mrf.mxu1 }
0x1683   :  { %3244 = vmatmul.mubr.msk.bf16.vlgmr.msra.gmra.mxu0 %vm273_vm3, %v1472_v34 }
0x1684   :  { %3256 = vmatpush3.bf16.msra.mxu0 %v3841_v46  ;;  %3259 = vmatprep.mubr.msk.bf16.mxu0 %vm3660_vm0, %v3659_v0 }
0x1685   :  { %3257 = vmatprep.subr.bf16.mxu0 %v3659_v0 }
0x1688   :  { %3258 = vmatpush3.bf16.msra.mxu0 %v3844_v48 }
0x1689   :  { %3271 = vmatprep.subr.bf16.mxu0 %v3659_v0 }
0x1743   :  { %v1510_v15 = vpop.f32.mrf.mxu0 }
0x1744   :  { %v4095_v51 = vadd.f32 %v1510_v15, %v3819_v61 }
0x1745   :  { %v3245_v11 = vpop.f32.mrf.mxu0 }
0x1746   :  { %v1517_v52 = vmin.f32 %v4095_v51, 20.0  ;;  %vm1516_vm14 = vcmp.gt.f32.partialorder %v4095_v51, 20.0  ;;  %v4128_v11 = vld [vmem:[#allocation2 + $0x8] ss:$40 sps:$4 sm:$0xff]  }
0x1747   :  { %v1513_v12 = vpop.f32.mrf.mxu0 }
0x1748   :  { %v1518_v54 = vmul.f32 1.442695, %v1517_v52 }
0x1749   :  { %v3246_v55 = vpop.f32.mrf.mxu0 }
0x174a   :  { %3487 = vpow2.f32 %v1518_v54 }
0x1757   :  { %v3488_v46 = vpop.eup %3487 }
0x1758   :  { %v1520_v13 = vadd.f32 1.0, %v3488_v46  ;;  %v1523_v57 = vmul.f32 -0.5, %v3488_v46  ;;  %v1526_v60 = vand.u32 2147483647, %v3488_v46 }
0x175a   :  { %3489 = vlog2.f32 %v1520_v13  ;;  %v1524_v58 = vadd.f32 1.0, %v1523_v57  ;;  %vm1527_vm13 = vcmp.lt.f32.partialorder %v1526_v60, 0.0004427343 }
0x175c   :  { %v1525_v2 = vmul.f32 %v3488_v46, %v1524_v58 }
0x1767   :  { %v3490_v48 = vpop.eup %3489 }
0x1768   :  { %v1522_v39 = vmul.f32 0.6931472, %v3490_v48 }
0x176a   :  { %v1528_v36 = vsel %vm1527_vm13, %v1525_v2, %v1522_v39 }
0x176b   :  { %v4100_v25 = vsel %vm1516_vm14, %v4095_v51, %v1528_v36  ;;  %vm2856_vm14 = vcmask 8192  }
0x176c   :  { %v1534_v9 = vmul.f32 %v1532_v7, %v4100_v25 }
0x176e   :  { %1536 = vrot.lane.b32.xlu1 %v1534_v9, %s3663_s10 }
0x17e0   :  { %v1537_v31 = vpop.permute.xlu1 %1536 }
0x17e1   :  { %v1539_v14 = vadd.f32 %v1537_v31, %v4095_v51 }
0x17e3   :  { %v1544_v4 = vsel %vm410_vm7, %v1539_v14, %v1542_v10 }
0x17e4   :  { %v1545_v24 = vpack.c.bf16 %v1544_v4, %v1544_v4 }
0x17e6   :  { %3252 = vmatmul.mubr.msk.bf16.vlgmr.msra.gmra.mxu1 %vm422_vm8, %v1545_v24 }
0x17e7   :  { %3264 = vmatpush3.bf16.msra.mxu1 %v3874_v5  ;;  %3267 = vmatprep.mubr.msk.bf16.mxu1 %vm3660_vm0, %v3659_v0 }
0x17e8   :  { %3265 = vmatprep.subr.bf16.mxu1 %v3659_v0 }
0x17eb   :  { %3266 = vmatpush3.bf16.msra.mxu1 %v3878_v6 }
0x17ec   :  { %3279 = vmatprep.subr.bf16.mxu1 %v3659_v0 }
0x18a6   :  { %v1583_v26 = vpop.f32.mrf.mxu1 }
0x18a7   :  { %1590 = vrot.lane.b32.xlu1 %v1583_v26, %s3664_s11 }
0x18a8   :  { %v3253_v29 = vpop.f32.mrf.mxu1 }
0x18aa   :  { %v1586_v18 = vpop.f32.mrf.mxu1 }
0x18ab   :  { %1755 = vrot.lane.b32.xlu1 %v4033_v21, %s3671_s20 }
0x18ac   :  { %v3254_v20 = vpop.f32.mrf.mxu1 }
0x1919   :  { %v1591_v38 = vpop.permute.xlu1 %1590 }
0x191a   :  { %v1593_v5 = vadd.f32 %v1591_v38, %v3793_v41 }
0x191c   :  { %v1594_v32 = vadd.f32 %v1593_v5, %v3853_v56 }
0x191d   :  { %v1756_v34 = vpop.permute.xlu1 %1755 }
0x191e   :  { %v1595_v8 = vmax.f32 %v1594_v32, 0.0  ;;  %v1758_v40 = vsel %vm410_vm7, %v1539_v14, %v1756_v34 }
0x191f   :  { %v1759_v15 = vpack.c.bf16 %v1758_v40, %v1758_v40 }
0x1920   :  { %v1596_v33 = vpack.c.bf16 %v1595_v8, %v1595_v8 }
0x1922   :  { %1598 = vrot.lane.b32.xlu0 %v1596_v33, %s3664_s11 }
0x1994   :  { %v1599_v6 = vpop.permute.xlu0 %1598 }
0x1995   :  { %3260 = vmatmul.mubr.msk.bf16.vlgmr.msra.gmra.mxu0 %vm497_vm9, %v1599_v6 }
0x1996   :  { %3272 = vmatpush3.bf16.msra.mxu0 %v3858_v1  ;;  %3275 = vmatprep.mubr.msk.bf16.mxu0 %vm3660_vm0, %v3659_v0 }
0x1997   :  { %3273 = vmatprep.subr.bf16.mxu0 %v3659_v0 }
0x199a   :  { %3274 = vmatpush3.bf16.msra.mxu0 %v3862_v3 }
0x199b   :  { %3287 = vmatprep.subr.bf16.mxu0 %v3659_v0 }
0x199d   :  { %3276 = vmatmul.mubr.msk.bf16.vlgmr.msra.gmra.mxu0 %vm422_vm8, %v1759_v15  ;;  %v4160_v15 = vld [vmem:[#allocation2 + $0xfc] ss:$40 sps:$4 sm:$0xff]  }
0x199e   :  { %3288 = vmatpush3.bf16.msra.mxu0 %v4128_v11  ;;  %3289 = vmatprep.mubr.msk.bf16.mxu0 %vm3660_vm0, %v3659_v0 }
0x199f   :  { %3305 = vmatprep.subr.bf16.mxu0 %v3659_v0 }
0x1a55   :  { %v1637_v52 = vpop.f32.mrf.mxu0 }
0x1a56   :  { %v1638_v12 = vadd.f32 %v1637_v52, %v3887_v16  ;;  %v4170_v52 = vld [vmem:[#allocation2 + $0x5c] ss:$40 sps:$4 sm:$0xff]  }
0x1a57   :  { %v3261_v54 = vpop.f32.mrf.mxu0 }
0x1a58   :  { %v1643_v55 = vmax.f32 %v1638_v12, 0.0  ;;  %v4174_v12 = vld [vmem:[#allocation2 + $0xc] ss:$40 sps:$4 sm:$0xff]  }
0x1a59   :  { %v1640_v3 = vpop.f32.mrf.mxu0 }
0x1a5a   :  { %v1644_v46 = vpack.c.bf16 %v1643_v55, %v1643_v55 }
0x1a5b   :  { %v3262_v13 = vpop.f32.mrf.mxu0 }
0x1a5c   :  { %3268 = vmatmul.mubr.msk.bf16.vlgmr.msra.gmra.mxu1 %vm497_vm9, %v1644_v46 }
0x1a5d   :  { %v1797_v57 = vpop.f32.mrf.mxu0  ;;  %3280 = vmatpush3.bf16.msra.mxu1 %v3904_v17  ;;  %3283 = vmatprep.mubr.msk.bf16.mxu1 %vm3660_vm0, %v3659_v0 }
0x1a5e   :  { %1804 = vrot.lane.b32.xlu0 %v1797_v57, %s3665_s12  ;;  %3281 = vmatprep.subr.bf16.mxu1 %v3659_v0 }
0x1a5f   :  { %v3277_v58 = vpop.f32.mrf.mxu0 }
0x1a61   :  { %v1800_v60 = vpop.f32.mrf.mxu0  ;;  %3282 = vmatpush3.bf16.msra.mxu1 %v3907_v19 }
0x1a62   :  { %3293 = vmatprep.subr.bf16.mxu1 %v3659_v0 }
0x1a63   :  { %v3278_v48 = vpop.f32.mrf.mxu0 }
0x1ad0   :  { %v1805_v39 = vpop.permute.xlu0 %1804 }
0x1ad1   :  { %v1808_v2 = vadd.f32 %v1805_v39, %v3796_v42  ;;  %v1807_v17 = vadd.f32 %v1805_v39, %v3793_v41 }
0x1ad3   :  { %v1810_v36 = vadd.f32 %v1808_v2, %v3894_v47  ;;  %v1809_v9 = vadd.f32 %v1807_v17, %v3894_v47 }
0x1ad5   :  { %1818 = vrot.lane.b32.xlu1 %v1810_v36, %s3666_s13  ;;  %v2927_v10 = vmul.f32 -1.442695, %v1809_v9 }
0x1ad7   :  { %3491 = vpow2.f32 %v2927_v10 }
0x1ae4   :  { %v3492_v4 = vpop.eup %3491 }
0x1ae5   :  { %v1814_v24 = vadd.f32 1.0, %v3492_v4 }
0x1ae7   :  { %3493 = vrcp.f32 %v1814_v24 }
0x1af4   :  { %v3494_v26 = vpop.eup %3493 }
0x1af5   :  { %v1828_v38 = vsub.f32 1.0, %v3494_v26  ;;  %v1834_v32 = vmul.f32 %v3494_v26, %v4033_v21  ;;  %v4166_v21 = vld [vmem:[#allocation2 + $0xac] ss:$40 sps:$4 sm:$0xff]  }
0x1b1c   :  { %v4147_v7 = vpop.f32.mrf.mxu1 }
0x1b1e   :  { %v3269_v31 = vpop.f32.mrf.mxu1 }
0x1b1f   :  { %v1911_v31 = vld [vmem:[%s4538_s1 + $0x18] sm:$0xff] }
0x1b20   :  { %v1685_v14 = vpop.f32.mrf.mxu1 }
0x1b22   :  { %v3270_v19 = vpop.f32.mrf.mxu1 }
0x1b47   :  { %v1819_v42 = vpop.permute.xlu1 %1818 }
0x1b48   :  { %v1821_v29 = vmul.f32 %v3494_v26, %v1819_v42 }
0x1b4a   :  { %1823 = vrot.lane.b32.xlu0 %v1821_v29, %s3667_s14  ;;  %v4195_v29 = vld [vmem:[#allocation2 + $0x100] ss:$40 sps:$4 sm:$0xff]  }
0x1bbc   :  { %v1824_v18 = vpop.permute.xlu0 %1823 }
0x1bbd   :  { %v1826_v20 = vadd.f32 %v1824_v18, %v1810_v36  ;;  %v4205_v18 = vld [vmem:[#allocation2 + $0x60] ss:$40 sps:$4 sm:$0xff]  }
0x1bbf   :  { %3495 = vtanh.f32 %v1826_v20  ;;  %v4209_v20 = vld [vmem:[#allocation2 + $0x10] ss:$40 sps:$4 sm:$0xff]  }
0x1bcc   :  { %v3496_v41 = vpop.eup %3495 }
0x1bcd   :  { %1830 = vrot.lane.b32.xlu1 %v3496_v41, %s3668_s15 }
0x1c3f   :  { %v1831_v5 = vpop.permute.xlu1 %1830 }
0x1c40   :  { %v1833_v8 = vmul.f32 %v1831_v5, %v1828_v38 }
0x1c42   :  { %v4153_v33 = vadd.f32 %v1834_v32, %v1833_v8 }
0x1c44   :  { %1837 = vrot.lane.b32.xlu0 %v4153_v33, %s3669_s16 }
0x1cb6   :  { %v1838_v6 = vpop.permute.xlu0 %1837 }
0x1cb7   :  { %v1840_v34 = vsel %vm201_vm10, %v1838_v6, %v4059_v37 }
0x1cb8   :  { %v1841_v40 = vpack.c.bf16 %v1840_v34, %v1840_v34 }
0x1cba   :  { %3284 = vmatmul.mubr.msk.bf16.vlgmr.msra.gmra.mxu1 %vm497_vm9, %v1841_v40 }
0x1cbb   :  { %3294 = vmatpush3.bf16.msra.mxu1 %v4160_v15  ;;  %3301 = vmatprep.mubr.msk.bf16.mxu1 %vm3660_vm0, %v3659_v0 }
0x1cbc   :  { %3295 = vmatprep.subr.bf16.mxu1 %v3659_v0 }
0x1cbf   :  { %3296 = vmatpush3.bf16.msra.mxu1 %v4166_v21 }
0x1cc0   :  { %3297 = vmatprep.subr.bf16.mxu1 %v3659_v0 }
0x1cc3   :  { %3298 = vmatpush3.bf16.msra.mxu1 %v4170_v52 }
0x1cc4   :  { %3299 = vmatprep.subr.bf16.mxu1 %v3659_v0 }
0x1cc7   :  { %3300 = vmatpush3.bf16.msra.mxu1 %v4174_v12 }
0x1cc8   :  { %3317 = vmatprep.subr.bf16.mxu1 %v3659_v0 }
0x1d7a   :  { %v1879_v54 = vpop.f32.mrf.mxu1 }
0x1d7b   :  { %v1880_v55 = vadd.f32 %v1879_v54, %v3931_v49  ;;  %v4220_v54 = vld [vmem:[#allocation2 + $0x14] ss:$40 sps:$4 sm:$0xff]  }
0x1d7c   :  { %v3285_v3 = vpop.f32.mrf.mxu1 }
0x1d7d   :  { %1892 = vrot.lane.b32.xlu1 %v1880_v55, %s3666_s13  ;;  %v2929_v57 = vmul.f32 -1.442695, %v1880_v55 }
0x1d7e   :  { %v1882_v46 = vpop.f32.mrf.mxu1 }
0x1d7f   :  { %3497 = vpow2.f32 %v2929_v57 }
0x1d80   :  { %v3286_v13 = vpop.f32.mrf.mxu1 }
0x1d8c   :  { %v3498_v58 = vpop.eup %3497 }
0x1d8d   :  { %v1888_v60 = vadd.f32 1.0, %v3498_v58 }
0x1d8f   :  { %3499 = vrcp.f32 %v1888_v60 }
0x1d9c   :  { %v3500_v48 = vpop.eup %3499 }
0x1d9d   :  { %v1902_v14 = vsub.f32 1.0, %v3500_v48  ;;  %v1908_v19 = vmul.f32 %v3500_v48, %v4059_v37  ;;  %v4201_v37 = vld [vmem:[#allocation2 + $0xb0] ss:$40 sps:$4 sm:$0xff]  }
0x1def   :  { %v1893_v39 = vpop.permute.xlu1 %1892 }
0x1df0   :  { %v1895_v2 = vmul.f32 %v3500_v48, %v1893_v39  ;;  %v4226_v48 = vld [vmem:[#allocation2 + $0x68] ss:$40 sps:$4 sm:$0xff]   ;;  %v4232_v39 = vld [vmem:[#allocation2 + $0x18] ss:$40 sps:$4 sm:$0xff]  }
0x1df2   :  { %1897 = vrot.lane.b32.xlu0 %v1895_v2, %s3667_s14 }
0x1e64   :  { %v1898_v36 = vpop.permute.xlu0 %1897 }
0x1e65   :  { %v1900_v17 = vadd.f32 %v1898_v36, %v1880_v55 }
0x1e67   :  { %3501 = vtanh.f32 %v1900_v17 }
0x1e74   :  { %v3502_v9 = vpop.eup %3501 }
0x1e75   :  { %1904 = vrot.lane.b32.xlu1 %v3502_v9, %s3668_s15 }
0x1e79   :  { %2066 = vrot.lane.b32.xlu1 %v1911_v31, %s3662_s9 }
0x1ee7   :  { %v1905_v10 = vpop.permute.xlu1 %1904 }
0x1ee8   :  { %v1907_v4 = vmul.f32 %v1905_v10, %v1902_v14 }
0x1eea   :  { %v4187_v24 = vadd.f32 %v1908_v19, %v1907_v4 }
0x1eec   :  { %2076 = vrot.lane.b32.xlu1 %v4187_v24, %s3670_s19  ;;  %v1912_v26 = vpack.c.bf16 %v4187_v24, %v4187_v24 }
0x1eee   :  { %1914 = vrot.lane.b32.xlu0 %v1912_v26, %s3668_s15 }
0x1f60   :  { %v1915_v42 = vpop.permute.xlu0 %1914 }
0x1f61   :  { %3290 = vmatmul.mubr.msk.bf16.vlgmr.msra.gmra.mxu0 %vm201_vm10, %v1915_v42 }
0x1f62   :  { %3306 = vmatpush3.bf16.msra.mxu0 %v4195_v29  ;;  %3313 = vmatprep.mubr.msk.bf16.mxu0 %vm3660_vm0, %v3659_v0 }
0x1f63   :  { %3307 = vmatprep.subr.bf16.mxu0 %v3659_v0 }
0x1f66   :  { %3308 = vmatpush3.bf16.msra.mxu0 %v4201_v37 }
0x1f67   :  { %3309 = vmatprep.subr.bf16.mxu0 %v3659_v0 }
0x1f6a   :  { %3310 = vmatpush3.bf16.msra.mxu0 %v4205_v18 }
0x1f6b   :  { %3311 = vmatprep.subr.bf16.mxu0 %v3659_v0 }
0x1f6e   :  { %3312 = vmatpush3.bf16.msra.mxu0 %v4209_v20 }
0x1f6f   :  { %3325 = vmatprep.subr.bf16.mxu0 %v3659_v0 }
0x2021   :  { %v1953_v41 = vpop.f32.mrf.mxu0 }
0x2022   :  { %v1959_v38 = vadd.f32 %v1953_v41, %v3798_v43 }
0x2023   :  { %v3291_v5 = vpop.f32.mrf.mxu0 }
0x2024   :  { %v1960_v32 = vadd.f32 %v1959_v38, %v3771_v27 }
0x2025   :  { %v1956_v8 = vpop.f32.mrf.mxu0 }
0x2026   :  { %v1961_v6 = vmax.f32 %v1960_v32, 0.0 }
0x2027   :  { %v3292_v34 = vpop.f32.mrf.mxu0 }
0x2028   :  { %v1962_v40 = vpack.c.bf16 %v1961_v6, %v1961_v6  ;;  %v2067_v6 = vpop.permute.xlu1 %2066 }
0x202a   :  { %3302 = vmatmul.mubr.msk.bf16.vlgmr.msra.gmra.mxu1 %vm273_vm3, %v1962_v40 }
0x202b   :  { %3318 = vmatpush3.bf16.msra.mxu1 %v3813_v59  ;;  %3321 = vmatprep.mubr.msk.bf16.mxu1 %vm3660_vm0, %v3659_v0 }
0x202c   :  { %3319 = vmatprep.subr.bf16.mxu1 %v3659_v0 }
0x202f   :  { %3320 = vmatpush3.bf16.msra.mxu1 %v4220_v54 }
0x2030   :  { %3333 = vmatprep.subr.bf16.mxu1 %v3659_v0 }
0x20ea   :  { %v2000_v55 = vpop.f32.mrf.mxu1 }
0x20eb   :  { %v2001_v3 = vadd.f32 %v2000_v55, %v3806_v50 }
0x20ec   :  { %v3303_v46 = vpop.f32.mrf.mxu1 }
0x20ed   :  { %v2006_v13 = vmax.f32 %v2001_v3, 0.0  ;;  %v2077_v46 = vpop.permute.xlu1 %2076 }
0x20ee   :  { %v2003_v57 = vpop.f32.mrf.mxu1 }
0x20ef   :  { %v2007_v58 = vpack.c.bf16 %v2006_v13, %v2006_v13 }
0x20f0   :  { %v3304_v60 = vpop.f32.mrf.mxu1 }
0x20f1   :  { %3314 = vmatmul.mubr.msk.bf16.vlgmr.msra.gmra.mxu0 %vm273_vm3, %v2007_v58  ;;  %v4249_v58 = vld [vmem:[#allocation2 + $0x6c] ss:$40 sps:$4 sm:$0xff]   ;;  %v4255_v60 = vld [vmem:[#allocation2 + $0x1c] ss:$40 sps:$4 sm:$0xff]  }
0x20f2   :  { %3326 = vmatpush3.bf16.msra.mxu0 %v4226_v48  ;;  %3329 = vmatprep.mubr.msk.bf16.mxu0 %vm3660_vm0, %v3659_v0 }
0x20f3   :  { %3327 = vmatprep.subr.bf16.mxu0 %v3659_v0 }
0x20f6   :  { %3328 = vmatpush3.bf16.msra.mxu0 %v4232_v39 }
0x20f7   :  { %3341 = vmatprep.subr.bf16.mxu0 %v3659_v0 }
0x21b1   :  { %v2045_v2 = vpop.f32.mrf.mxu0 }
0x21b2   :  { %v4237_v36 = vadd.f32 %v2045_v2, %v3819_v61 }
0x21b3   :  { %v3315_v17 = vpop.f32.mrf.mxu0 }
0x21b4   :  { %v2052_v9 = vmin.f32 %v4237_v36, 20.0  ;;  %vm2051_vm1 = vcmp.gt.f32.partialorder %v4237_v36, 20.0 }
0x21b5   :  { %v2048_v31 = vpop.f32.mrf.mxu0 }
0x21b6   :  { %v2053_v14 = vmul.f32 1.442695, %v2052_v9 }
0x21b7   :  { %v3316_v10 = vpop.f32.mrf.mxu0 }
0x21b8   :  { %3503 = vpow2.f32 %v2053_v14 }
0x21c5   :  { %v3504_v19 = vpop.eup %3503 }
0x21c6   :  { %v2055_v4 = vadd.f32 1.0, %v3504_v19  ;;  %v2058_v26 = vmul.f32 -0.5, %v3504_v19  ;;  %v2061_v41 = vand.u32 2147483647, %v3504_v19 }
0x21c8   :  { %3505 = vlog2.f32 %v2055_v4  ;;  %v2059_v42 = vadd.f32 1.0, %v2058_v26  ;;  %vm2062_vm15 = vcmp.lt.f32.partialorder %v2061_v41, 0.0004427343 }
0x21ca   :  { %v2060_v32 = vmul.f32 %v3504_v19, %v2059_v42 }
0x21d5   :  { %v3506_v38 = vpop.eup %3505 }
0x21d6   :  { %v2057_v5 = vmul.f32 0.6931472, %v3506_v38 }
0x21d8   :  { %v2063_v8 = vsel %vm2062_vm15, %v2060_v32, %v2057_v5  ;;  %v3607_v5 = vld [vmem:[#allocation2 + $0x20] ss:$40 sps:$4 sm:$0xff]  }
0x21d9   :  { %v4242_v34 = vsel %vm2051_vm1, %v4237_v36, %v2063_v8 }
0x21da   :  { %v2069_v40 = vmul.f32 %v2067_v6, %v4242_v34 }
0x21dc   :  { %2071 = vrot.lane.b32.xlu0 %v2069_v40, %s3663_s10 }
0x224e   :  { %v2072_v55 = vpop.permute.xlu0 %2071 }
0x224f   :  { %v2074_v3 = vadd.f32 %v2072_v55, %v4237_v36 }
0x2251   :  { %v2079_v13 = vsel %vm410_vm7, %v2074_v3, %v2077_v46 }
0x2252   :  { %v2080_v57 = vpack.c.bf16 %v2079_v13, %v2079_v13 }
0x2254   :  { %3322 = vmatmul.mubr.msk.bf16.vlgmr.msra.gmra.mxu1 %vm422_vm8, %v2080_v57  ;;  %v3608_v57 = vld [vmem:[#allocation2 + $0x74] ss:$40 sps:$4 sm:$0xff]  }
0x2255   :  { %3334 = vmatpush3.bf16.msra.mxu1 %v4249_v58  ;;  %3337 = vmatprep.mubr.msk.bf16.mxu1 %vm3660_vm0, %v3659_v0 }
0x2256   :  { %3335 = vmatprep.subr.bf16.mxu1 %v3659_v0 }
0x2259   :  { %3336 = vmatpush3.bf16.msra.mxu1 %v4255_v60 }
0x225a   :  { %3349 = vmatprep.subr.bf16.mxu1 %v3659_v0 }
0x2314   :  { %v2118_v2 = vpop.f32.mrf.mxu1 }
0x2315   :  { %2125 = vrot.lane.b32.xlu0 %v2118_v2, %s3664_s11 }
0x2316   :  { %v3323_v17 = vpop.f32.mrf.mxu1 }
0x2317   :  { %v3609_v17 = vld [vmem:[#allocation2 + $0x24] ss:$40 sps:$4 sm:$0xff]  }
0x2318   :  { %v2121_v9 = vpop.f32.mrf.mxu1 }
0x2319   :  { %2290 = vrot.lane.b32.xlu0 %v4153_v33, %s3671_s20 }
0x231a   :  { %v3324_v31 = vpop.f32.mrf.mxu1 }
0x2387   :  { %v2126_v14 = vpop.permute.xlu0 %2125 }
0x2388   :  { %v2128_v10 = vadd.f32 %v2126_v14, %v3798_v43 }
0x238a   :  { %v2129_v19 = vadd.f32 %v2128_v10, %v3853_v56 }
0x238b   :  { %v2291_v41 = vpop.permute.xlu0 %2290 }
0x238c   :  { %v2130_v4 = vmax.f32 %v2129_v19, 0.0  ;;  %v2293_v38 = vsel %vm410_vm7, %v2074_v3, %v2291_v41 }
0x238d   :  { %v2294_v32 = vpack.c.bf16 %v2293_v38, %v2293_v38 }
0x238e   :  { %v2131_v26 = vpack.c.bf16 %v2130_v4, %v2130_v4 }
0x2390   :  { %2133 = vrot.lane.b32.xlu1 %v2131_v26, %s3664_s11 }
0x2402   :  { %v2134_v42 = vpop.permute.xlu1 %2133 }
0x2403   :  { %3330 = vmatmul.mubr.msk.bf16.vlgmr.msra.gmra.mxu0 %vm497_vm9, %v2134_v42 }
0x2404   :  { %3342 = vmatpush3.bf16.msra.mxu0 %v3858_v1  ;;  %3345 = vmatprep.mubr.msk.bf16.mxu0 %vm3660_vm0, %v3659_v0 }
0x2405   :  { %3343 = vmatprep.subr.bf16.mxu0 %v3659_v0 }
0x2408   :  { %3344 = vmatpush3.bf16.msra.mxu0 %v3607_v5 }
0x2409   :  { %3357 = vmatprep.subr.bf16.mxu0 %v3659_v0 }
0x240b   :  { %3346 = vmatmul.mubr.msk.bf16.vlgmr.msra.gmra.mxu0 %vm422_vm8, %v2294_v32 }
0x240c   :  { %3358 = vmatpush3.bf16.msra.mxu0 %v4128_v11  ;;  %3359 = vmatprep.mubr.msk.bf16.mxu0 %vm3660_vm0, %v3659_v0 }
0x240d   :  { %3375 = vmatprep.subr.bf16.mxu0 %v3659_v0 }
0x24c3   :  { %v2172_v1 = vpop.f32.mrf.mxu0 }
0x24c4   :  { %v2173_v8 = vadd.f32 %v2172_v1, %v3887_v16 }
0x24c5   :  { %v3331_v6 = vpop.f32.mrf.mxu0 }
0x24c6   :  { %v2178_v40 = vmax.f32 %v2173_v8, 0.0 }
0x24c7   :  { %v2175_v55 = vpop.f32.mrf.mxu0 }
0x24c8   :  { %v2179_v3 = vpack.c.bf16 %v2178_v40, %v2178_v40 }
0x24c9   :  { %v3332_v46 = vpop.f32.mrf.mxu0 }
0x24ca   :  { %3338 = vmatmul.mubr.msk.bf16.vlgmr.msra.gmra.mxu1 %vm497_vm9, %v2179_v3 }
0x24cb   :  { %v2332_v13 = vpop.f32.mrf.mxu0  ;;  %3350 = vmatpush3.bf16.msra.mxu1 %v3608_v57  ;;  %3353 = vmatprep.mubr.msk.bf16.mxu1 %vm3660_vm0, %v3659_v0 }
0x24cc   :  { %2339 = vrot.lane.b32.xlu1 %v2332_v13, %s3665_s12  ;;  %3351 = vmatprep.subr.bf16.mxu1 %v3659_v0 }
0x24cd   :  { %v3347_v11 = vpop.f32.mrf.mxu0 }
0x24cf   :  { %v2335_v2 = vpop.f32.mrf.mxu0  ;;  %3352 = vmatpush3.bf16.msra.mxu1 %v3609_v17 }
0x24d0   :  { %3363 = vmatprep.subr.bf16.mxu1 %v3659_v0 }
0x24d1   :  { %v3348_v9 = vpop.f32.mrf.mxu0 }
0x253e   :  { %v2340_v31 = vpop.permute.xlu1 %2339 }
0x253f   :  { %v2343_v14 = vadd.f32 %v2340_v31, %v3800_v44  ;;  %v2342_v19 = vadd.f32 %v2340_v31, %v3798_v43 }
0x2541   :  { %v2345_v10 = vadd.f32 %v2343_v14, %v3894_v47  ;;  %v2344_v26 = vadd.f32 %v2342_v19, %v3894_v47 }
0x2543   :  { %2353 = vrot.lane.b32.xlu0 %v2345_v10, %s3666_s13  ;;  %v2938_v38 = vmul.f32 -1.442695, %v2344_v26 }
0x2545   :  { %3507 = vpow2.f32 %v2938_v38 }
0x2552   :  { %v3508_v32 = vpop.eup %3507 }
0x2553   :  { %v2349_v1 = vadd.f32 1.0, %v3508_v32 }
0x2555   :  { %3509 = vrcp.f32 %v2349_v1 }
0x2562   :  { %v3510_v8 = vpop.eup %3509 }
0x2563   :  { %v2363_v47 = vsub.f32 1.0, %v3510_v8  ;;  %v2369_v46 = vmul.f32 %v3510_v8, %v4153_v33 }
0x258a   :  { %v4288_v4 = vpop.f32.mrf.mxu1 }
0x258c   :  { %v3339_v42 = vpop.f32.mrf.mxu1 }
0x258e   :  { %v2220_v41 = vpop.f32.mrf.mxu1 }
0x2590   :  { %v3340_v5 = vpop.f32.mrf.mxu1 }
0x25b5   :  { %v2354_v44 = vpop.permute.xlu0 %2353 }
0x25b6   :  { %v2356_v6 = vmul.f32 %v3510_v8, %v2354_v44 }
0x25b8   :  { %2358 = vrot.lane.b32.xlu1 %v2356_v6, %s3667_s14 }
0x262a   :  { %v2359_v40 = vpop.permute.xlu1 %2358 }
0x262b   :  { %v2361_v55 = vadd.f32 %v2359_v40, %v2345_v10 }
0x262d   :  { %3511 = vtanh.f32 %v2361_v55 }
0x263a   :  { %v3512_v43 = vpop.eup %3511 }
0x263b   :  { %2365 = vrot.lane.b32.xlu0 %v3512_v43, %s3668_s15 }
0x26ad   :  { %v2366_v3 = vpop.permute.xlu0 %2365 }
0x26ae   :  { %v2368_v13 = vmul.f32 %v2366_v3, %v2363_v47 }
0x26b0   :  { %v2370_v57 = vadd.f32 %v2369_v46, %v2368_v13 }
0x26b2   :  { %2372 = vrot.lane.b32.xlu1 %v2370_v57, %s3669_s16 }
0x2724   :  { %v2373_v11 = vpop.permute.xlu1 %2372 }
0x2725   :  { %v2375_v2 = vsel %vm201_vm10, %v2373_v11, %v4187_v24 }
0x2726   :  { %v2376_v17 = vpack.c.bf16 %v2375_v2, %v2375_v2 }
0x2728   :  { %3354 = vmatmul.mubr.msk.bf16.vlgmr.msra.gmra.mxu1 %vm497_vm9, %v2376_v17 }
0x2729   :  { %3364 = vmatpush3.bf16.msra.mxu1 %v4160_v15  ;;  %3371 = vmatprep.mubr.msk.bf16.mxu1 %vm3660_vm0, %v3659_v0 }
0x272a   :  { %3365 = vmatprep.subr.bf16.mxu1 %v3659_v0 }
0x272d   :  { %3366 = vmatpush3.bf16.msra.mxu1 %v4166_v21 }
0x272e   :  { %3367 = vmatprep.subr.bf16.mxu1 %v3659_v0 }
0x2731   :  { %3368 = vmatpush3.bf16.msra.mxu1 %v4170_v52 }
0x2732   :  { %3369 = vmatprep.subr.bf16.mxu1 %v3659_v0 }
0x2735   :  { %3370 = vmatpush3.bf16.msra.mxu1 %v4174_v12 }
0x2736   :  { %3387 = vmatprep.subr.bf16.mxu1 %v3659_v0 }
0x27e8   :  { %v2414_v33 = vpop.f32.mrf.mxu1 }
0x27e9   :  { %v2415_v15 = vadd.f32 %v2414_v33, %v3931_v49  ;;  %v2445_v49 = vld [vmem:[%s4538_s1 + $0x20] sm:$0xff]  ;;  %s3672_s1 = smov 120  }
0x27ea   :  { %v3355_v9 = vpop.f32.mrf.mxu1 }
0x27eb   :  { %2427 = vrot.lane.b32.xlu0 %v2415_v15, %s3666_s13  ;;  %v2940_v10 = vmul.f32 -1.442695, %v2415_v15  ;;  %s3674_s13 = smov [#allocation5]  }
0x27ec   :  { %v2417_v31 = vpop.f32.mrf.mxu1 }
0x27ed   :  { %3513 = vpow2.f32 %v2940_v10 }
0x27ee   :  { %v3356_v14 = vpop.f32.mrf.mxu1 }
0x27fa   :  { %v3514_v21 = vpop.eup %3513 }
0x27fb   :  { %v2423_v19 = vadd.f32 1.0, %v3514_v21 }
0x27fd   :  { %3515 = vrcp.f32 %v2423_v19 }
0x280a   :  { %v3516_v52 = vpop.eup %3515 }
0x280b   :  { %v2437_v5 = vsub.f32 1.0, %v3516_v52  ;;  %v2443_v1 = vmul.f32 %v3516_v52, %v4187_v24 }
0x285d   :  { %v2428_v26 = vpop.permute.xlu0 %2427 }
0x285e   :  { %v2430_v42 = vmul.f32 %v3516_v52, %v2428_v26 }
0x2860   :  { %2432 = vrot.lane.b32.xlu1 %v2430_v42, %s3667_s14  ;;  %s2864_s14 = sshll.u32 %s3674_s13, 4  ;;  %s2865_s14 = int_to_ptr.vmem [resolvable:$true] %s2864_s14 }
0x2861   :  { %s3636_s16 = scalar_lea.vmem %s2865_s14, 32  ;;  %p3637_p6 = scmp.lt.s32.totalorder %s2865_s14, %s2865_s14 }
0x28d2   :  { %v2433_v12 = vpop.permute.xlu1 %2432 }
0x28d3   :  { %v2435_v41 = vadd.f32 %v2433_v12, %v2415_v15 }
0x28d5   :  { %3517 = vtanh.f32 %v2435_v41 }
0x28e2   :  { %v3518_v38 = vpop.eup %3517 }
0x28e3   :  { %2439 = vrot.lane.b32.xlu0 %v3518_v38, %s3668_s15 }
0x28e7   :  { %2600 = vrot.lane.b32.xlu0 %v2445_v49, %s3662_s9 }
0x2955   :  { %v2440_v32 = vpop.permute.xlu0 %2439 }
0x2956   :  { %v2442_v8 = vmul.f32 %v2440_v32, %v2437_v5 }
0x2958   :  { %v2444_v44 = vadd.f32 %v2443_v1, %v2442_v8 }
0x2959   :  { %v2601_v26 = vpop.permute.xlu0 %2600 }
0x295a   :  { %2610 = vrot.lane.b32.xlu0 %v2444_v44, %s3670_s19  ;;  %v2446_v6 = vpack.c.bf16 %v2444_v44, %v2444_v44 }
0x295c   :  { %2448 = vrot.lane.b32.xlu1 %v2446_v6, %s3668_s15  ;;  %s3632_s15 = scalar_lea.vmem %s2865_s14, 16 }
0x295d   :  { %p3633_p5 = scmp.ne.s32.totalorder %s2865_s14, %s3632_s15  ;;  %p3638_p7 = scmp.lt.s32.totalorder %s3636_s16, %s3632_s15 }
0x295f   :  { %p3639_p8 = por %p3638_p7, %p3637_p6 }
0x2961   :  { %p3640_p9 = pnand %p3639_p8, %p3633_p5 }
0x29cc   :  { %v2611_v49 = vpop.permute.xlu0 %2610 }
0x29ce   :  { %v2449_v40 = vpop.permute.xlu1 %2448 }
0x29cf   :  { %3360 = vmatmul.mubr.msk.bf16.vlgmr.msra.gmra.mxu0 %vm201_vm10, %v2449_v40 }
0x29d0   :  { %3376 = vmatpush3.bf16.msra.mxu0 %v4195_v29  ;;  %3383 = vmatprep.mubr.msk.bf16.mxu0 %vm3660_vm0, %v3659_v0 }
0x29d1   :  { %3377 = vmatprep.subr.bf16.mxu0 %v3659_v0 }
0x29d4   :  { %3378 = vmatpush3.bf16.msra.mxu0 %v4201_v37 }
0x29d5   :  { %3379 = vmatprep.subr.bf16.mxu0 %v3659_v0 }
0x29d8   :  { %3380 = vmatpush3.bf16.msra.mxu0 %v4205_v18 }
0x29d9   :  { %3381 = vmatprep.subr.bf16.mxu0 %v3659_v0 }
0x29dc   :  { %3382 = vmatpush3.bf16.msra.mxu0 %v4209_v20 }
0x29dd   :  { %3395 = vmatprep.subr.bf16.mxu0 %v3659_v0 }
0x2a8f   :  { %v2487_v24 = vpop.f32.mrf.mxu0 }
0x2a90   :  { %v2493_v29 = vadd.f32 %v2487_v24, %v3802_v45  ;;  %v612_v24 = vmul.f32 %v3831_v30, %v3831_v30 }
0x2a91   :  { %v3361_v55 = vpop.f32.mrf.mxu0 }
0x2a92   :  { %v2494_v43 = vadd.f32 %v2493_v29, %v3771_v27 }
0x2a93   :  { %v2490_v47 = vpop.f32.mrf.mxu0 }
0x2a94   :  { %v2495_v3 = vmax.f32 %v2494_v43, 0.0 }
0x2a95   :  { %v3362_v46 = vpop.f32.mrf.mxu0 }
0x2a96   :  { %v2496_v37 = vpack.c.bf16 %v2495_v3, %v2495_v3 }
0x2a98   :  { %3372 = vmatmul.mubr.msk.bf16.vlgmr.msra.gmra.mxu1 %vm273_vm3, %v2496_v37  ;;  %v4387_v37 = vmul.f32 %v3982_v62, %v3982_v62 }
0x2a99   :  { %3388 = vmatpush3.bf16.msra.mxu1 %v3813_v59  ;;  %3391 = vmatprep.mubr.msk.bf16.mxu1 %vm3660_vm0, %v3659_v0 }
0x2a9a   :  { %3389 = vmatprep.subr.bf16.mxu1 %v3659_v0 }
0x2a9d   :  { %3390 = vmatpush3.bf16.msra.mxu1 %v4220_v54 }
0x2a9e   :  { %3403 = vmatprep.subr.bf16.mxu1 %v3659_v0 }
0x2b58   :  { %v2534_v18 = vpop.f32.mrf.mxu1 }
0x2b59   :  { %v2535_v27 = vadd.f32 %v2534_v18, %v3806_v50 }
0x2b5a   :  { %v3373_v20 = vpop.f32.mrf.mxu1 }
0x2b5b   :  { %v2540_v13 = vmax.f32 %v2535_v27, 0.0 }
0x2b5c   :  { %v2537_v57 = vpop.f32.mrf.mxu1 }
0x2b5d   :  { %v2541_v11 = vpack.c.bf16 %v2540_v13, %v2540_v13 }
0x2b5e   :  { %v3374_v2 = vpop.f32.mrf.mxu1 }
0x2b5f   :  { %3384 = vmatmul.mubr.msk.bf16.vlgmr.msra.gmra.mxu0 %vm273_vm3, %v2541_v11 }
0x2b60   :  { %3396 = vmatpush3.bf16.msra.mxu0 %v4226_v48  ;;  %3399 = vmatprep.mubr.msk.bf16.mxu0 %vm3660_vm0, %v3659_v0 }
0x2b61   :  { %3397 = vmatprep.subr.bf16.mxu0 %v3659_v0 }
0x2b64   :  { %3398 = vmatpush3.bf16.msra.mxu0 %v4232_v39 }
0x2c1f   :  { %v2579_v59 = vpop.f32.mrf.mxu0 }
0x2c20   :  { %v4347_v54 = vadd.f32 %v2579_v59, %v3819_v61 }
0x2c21   :  { %v3385_v50 = vpop.f32.mrf.mxu0 }
0x2c22   :  { %v2586_v17 = vmin.f32 %v4347_v54, 20.0  ;;  %vm2585_vm3 = vcmp.gt.f32.partialorder %v4347_v54, 20.0 }
0x2c23   :  { %v2582_v33 = vpop.f32.mrf.mxu0 }
0x2c24   :  { %v2587_v15 = vmul.f32 1.442695, %v2586_v17 }
0x2c25   :  { %v3386_v9 = vpop.f32.mrf.mxu0 }
0x2c26   :  { %3519 = vpow2.f32 %v2587_v15 }
0x2c33   :  { %v3520_v31 = vpop.eup %3519 }
0x2c34   :  { %v2589_v48 = vadd.f32 1.0, %v3520_v31  ;;  %v2592_v14 = vmul.f32 -0.5, %v3520_v31  ;;  %v2595_v21 = vand.u32 2147483647, %v3520_v31 }
0x2c36   :  { %3521 = vlog2.f32 %v2589_v48  ;;  %v2593_v10 = vadd.f32 1.0, %v2592_v14  ;;  %vm2596_vm2 = vcmp.lt.f32.partialorder %v2595_v21, 0.0004427343  ;;  %v3610_v21 = vld [vmem:[%s4540_s3] sm:$0xff] }
0x2c37   :  { %3523 = vrcp.f32 %v612_v24 }
0x2c38   :  { %v2594_v39 = vmul.f32 %v3520_v31, %v2593_v10  ;;  %3525 = vrcp.f32 %v4387_v37  ;;  %v93_v10 = vsub.s32 5, %v3762_v23 }
0x2c43   :  { %v3522_v19 = vpop.eup %3521 }
0x2c44   :  { %v2591_v52 = vmul.f32 0.6931472, %v3522_v19  ;;  %v3524_v3 = vpop.eup %3523  ;;  %v4431_v19 = vrot.slane %v3610_v21, %v93_v10 }
0x2c45   :  { %v3526_v33 = vpop.eup %3525 }
0x2c46   :  { %v2597_v61 = vsel %vm2596_vm2, %v2594_v39, %v2591_v52  ;;  %v4435_v52 = vadd.f32 %v3900_v53, %v4431_v19  ;;  %v4445_v23 = vadd.f32 %v4147_v7, %v4431_v19  ;;  %v4450_v53 = vadd.f32 %v4288_v4, %v4431_v19 }
0x2c47   :  { %v4352_v42 = vsel %vm2585_vm3, %v4347_v54, %v2597_v61  ;;  %v4440_v61 = vadd.f32 %v4027_v35, %v4431_v19 }
0x2c48   :  { %v2603_v12 = vmul.f32 %v2601_v26, %v4352_v42  ;;  %v4404_v13 = vmul.f32 %v4352_v42, %v4352_v42  ;;  %v599_v39 = vmin.f32 %v4435_v52, 20.0  ;;  %v2224_v35 = vmin.f32 %v4450_v53, 20.0 }
0x2c49   :  { %vm598_vm4 = vcmp.gt.f32.partialorder %v4435_v52, 20.0  ;;  %vm1153_vm6 = vcmp.gt.f32.partialorder %v4440_v61, 20.0  ;;  %vm1688_vm10 = vcmp.gt.f32.partialorder %v4445_v23, 20.0  ;;  %vm2223_vm12 = vcmp.gt.f32.partialorder %v4450_v53, 20.0 }
0x2c4a   :  { %2605 = vrot.lane.b32.xlu1 %v2603_v12, %s3663_s10  ;;  %v600_v26 = vmul.f32 1.442695, %v599_v39  ;;  %v1154_v12 = vmin.f32 %v4440_v61, 20.0 }
0x2cbc   :  { %v2606_v41 = vpop.permute.xlu1 %2605 }
0x2cbd   :  { %v2608_v38 = vadd.f32 %v2606_v41, %v4347_v54  ;;  %v1155_v41 = vmul.f32 1.442695, %v1154_v12 }
0x2cbf   :  { %v2613_v5 = vsel %vm410_vm7, %v2608_v38, %v2611_v49  ;;  %v1689_v38 = vmin.f32 %v4445_v23, 20.0 }
0x2cc0   :  { %v2614_v32 = vpack.c.bf16 %v2613_v5, %v2613_v5  ;;  %v2225_v5 = vmul.f32 1.442695, %v2224_v35 }
0x2cc1   :  { %v1690_v49 = vmul.f32 1.442695, %v1689_v38 }
0x2cc2   :  { %3392 = vmatmul.mubr.msk.bf16.vlgmr.msra.gmra.mxu1 %vm422_vm8, %v2614_v32 }
0x2cc3   :  { %3404 = vmatpush3.bf16.msra.mxu1 %v4249_v58  ;;  %3407 = vmatprep.mubr.msk.bf16.mxu1 %vm3660_vm0, %v3659_v0 }
0x2cc4   :  { %3405 = vmatprep.subr.bf16.mxu1 %v3659_v0 }
0x2cc7   :  { %3406 = vmatpush3.bf16.msra.mxu1 %v4255_v60 }
0x2d82   :  { %v2652_v1 = vpop.f32.mrf.mxu1 }
0x2d83   :  { %2659 = vrot.lane.b32.xlu1 %v2652_v1, %s3664_s11 }
0x2d84   :  { %v3393_v8 = vpop.f32.mrf.mxu1 }
0x2d86   :  { %v2655_v44 = vpop.f32.mrf.mxu1 }
0x2d87   :  { %615 = vrot.lane.b32.xlu1 %v3822_v63, %s3672_s1 }
0x2d88   :  { %v3394_v6 = vpop.f32.mrf.mxu1 }
0x2d8b   :  { %1705 = vrot.lane.b32.xlu1 %v4095_v51, %s3672_s1 }
0x2d8f   :  { %2774 = vrot.lane.b32.xlu1 %v4347_v54, %s3672_s1 }
0x2df5   :  { %v2660_v58 = vpop.permute.xlu1 %2659 }
0x2df6   :  { %v2662_v0 = vadd.f32 %v2660_v58, %v3802_v45 }
0x2df8   :  { %v2663_v60 = vadd.f32 %v2662_v0, %v3853_v56 }
0x2df9   :  { %v616_v55 = vpop.permute.xlu1 %615 }
0x2dfa   :  { %v2664_v40 = vmax.f32 %v2663_v60, 0.0  ;;  %v618_v43 = vsub.f32 %v3822_v63, %v616_v55  ;;  %v4392_v63 = vmul.f32 %v4100_v25, %v4100_v25 }
0x2dfc   :  { %v2665_v29 = vpack.c.bf16 %v2664_v40, %v2664_v40  ;;  %v628_v45 = vmul.f32 %v618_v43, %v618_v43  ;;  %3527 = vrcp.f32 %v4392_v63 }
0x2dfd   :  { %v1706_v47 = vpop.permute.xlu1 %1705 }
0x2dfe   :  { %2667 = vrot.lane.b32.xlu0 %v2665_v29, %s3664_s11  ;;  %v1708_v56 = vsub.f32 %v4095_v51, %v1706_v47  ;;  %v4398_v51 = vmul.f32 %v4242_v34, %v4242_v34 }
0x2e00   :  { %v1718_v46 = vmul.f32 %v1708_v56, %v1708_v56  ;;  %3529 = vrcp.f32 %v4398_v51 }
0x2e01   :  { %v2775_v11 = vpop.permute.xlu1 %2774  ;;  %3531 = vrcp.f32 %v4404_v13 }
0x2e02   :  { %1170 = vrot.lane.b32.xlu0 %v3977_v28, %s3672_s1  ;;  %v2777_v50 = vsub.f32 %v4347_v54, %v2775_v11  ;;  %3533 = vpow2.f32 %v600_v26 }
0x2e03   :  { %3535 = vpow2.f32 %v1155_v41 }
0x2e04   :  { %3537 = vpow2.f32 %v1690_v49 }
0x2e05   :  { %3539 = vpow2.f32 %v2225_v5 }
0x2e06   :  { %2240 = vrot.lane.b32.xlu0 %v4237_v36, %s3672_s1 }
0x2e09   :  { %v3528_v15 = vpop.eup %3527 }
0x2e0a   :  { %630 = vrot.lane.b32.xlu0 %v628_v45, %s3662_s9 }
0x2e0d   :  { %v3530_v9 = vpop.eup %3529 }
0x2e0e   :  { %635 = vrot.lane.b32.xlu0 %v3524_v3, %s3672_s1 }
0x2e12   :  { %1720 = vrot.lane.b32.xlu0 %v1718_v46, %s3662_s9 }
0x2e70   :  { %v2668_v18 = vpop.permute.xlu0 %2667 }
0x2e71   :  { %3400 = vmatmul.mubr.msk.bf16.vlgmr.msra.gmra.mxu0 %vm497_vm9, %v2668_v18 }
0x2e74   :  { %v1171_v27 = vpop.permute.xlu0 %1170 }
0x2e75   :  { %v1173_v20 = vsub.f32 %v3977_v28, %v1171_v27  ;;  %v2787_v28 = vmul.f32 %v2777_v50, %v2777_v50 }
0x2e77   :  { %v1183_v57 = vmul.f32 %v1173_v20, %v1173_v20 }
0x2e78   :  { %v2241_v2 = vpop.permute.xlu0 %2240 }
0x2e79   :  { %v2243_v59 = vsub.f32 %v4237_v36, %v2241_v2  ;;  %1185 = vrot.lane.b32.xlu1 %v1183_v57, %s3662_s9  ;;  %v3532_v36 = vpop.eup %3531 }
0x2e7a   :  { %v3534_v32 = vpop.eup %3533 }
0x2e7b   :  { %v2253_v17 = vmul.f32 %v2243_v59, %v2243_v59  ;;  %v602_v1 = vadd.f32 1.0, %v3534_v32  ;;  %v3536_v8 = vpop.eup %3535  ;;  %v605_v4 = vmul.f32 -0.5, %v3534_v32  ;;  %v608_v29 = vand.u32 2147483647, %v3534_v32 }
0x2e7c   :  { %v631_v54 = vpop.permute.xlu0 %630  ;;  %v1157_v7 = vadd.f32 1.0, %v3536_v8  ;;  %v3538_v44 = vpop.eup %3537  ;;  %v1163_v3 = vand.u32 2147483647, %v3536_v8 }
0x2e7d   :  { %1190 = vrot.lane.b32.xlu1 %v3526_v33, %s3672_s1  ;;  %2255 = vrot.lane.b32.xlu0 %v2253_v17, %s3662_s9  ;;  %v633_v48 = vadd.f32 %v631_v54, %v612_v24  ;;  %3541 = vlog2.f32 %v602_v1  ;;  %v1692_v6 = vadd.f32 1.0, %v3538_v44  ;;  %v3540_v58 = vpop.eup %3539  ;;  %v606_v40 = vadd.f32 1.0, %v605_v4 }
0x2e7e   :  { %3543 = vlog2.f32 %v1157_v7  ;;  %v2227_v0 = vadd.f32 1.0, %v3540_v58  ;;  %v1160_v24 = vmul.f32 -0.5, %v3536_v8  ;;  %v1695_v56 = vmul.f32 -0.5, %v3538_v44 }
0x2e7f   :  { %3545 = vlog2.f32 %v1692_v6  ;;  %v607_v45 = vmul.f32 %v3534_v32, %v606_v40  ;;  %vm609_vm0 = vcmp.lt.f32.partialorder %v608_v29, 0.0004427343  ;;  %vm1164_vm5 = vcmp.lt.f32.partialorder %v1163_v3, 0.0004427343 }
0x2e80   :  { %v636_v31 = vpop.permute.xlu0 %635  ;;  %3547 = vlog2.f32 %v2227_v0  ;;  %v1161_v47 = vadd.f32 1.0, %v1160_v24  ;;  %v1696_v57 = vadd.f32 1.0, %v1695_v56  ;;  %v1698_v2 = vand.u32 2147483647, %v3538_v44 }
0x2e81   :  { %1725 = vrot.lane.b32.xlu1 %v3528_v15, %s3672_s1  ;;  %2789 = vrot.lane.b32.xlu0 %v2787_v28, %s3662_s9  ;;  %v638_v14 = vmul.f32 %v636_v31, %v633_v48  ;;  %v2230_v59 = vmul.f32 -0.5, %v3540_v58  ;;  %v2233_v48 = vand.u32 2147483647, %v3540_v58 }
0x2e82   :  { %v1162_v20 = vmul.f32 %v3536_v8, %v1161_v47  ;;  %v1697_v15 = vmul.f32 %v3538_v44, %v1696_v57  ;;  %vm1699_vm8 = vcmp.lt.f32.partialorder %v1698_v2, 0.0004427343 }
0x2e83   :  { %v2231_v54 = vadd.f32 1.0, %v2230_v59  ;;  %vm2234_vm11 = vcmp.lt.f32.partialorder %v2233_v48, 0.0004427343 }
0x2e85   :  { %2260 = vrot.lane.b32.xlu1 %v3530_v9, %s3672_s1  ;;  %620 = vrot.lane.b32.xlu0 %v3831_v30, %s3673_s26  ;;  %v2232_v41 = vmul.f32 %v3540_v58, %v2231_v54 }
0x2e89   :  { %2794 = vrot.lane.b32.xlu1 %v3532_v36, %s3672_s1  ;;  %1710 = vrot.lane.b32.xlu0 %v4100_v25, %s3673_s26 }
0x2e8a   :  { %v3542_v60 = vpop.eup %3541 }
0x2e8b   :  { %v604_v55 = vmul.f32 0.6931472, %v3542_v60  ;;  %v3544_v43 = vpop.eup %3543 }
0x2e8c   :  { %v1159_v18 = vmul.f32 0.6931472, %v3544_v43  ;;  %v3546_v27 = vpop.eup %3545 }
0x2e8d   :  { %1175 = vrot.lane.b32.xlu1 %v3982_v62, %s3673_s26  ;;  %2779 = vrot.lane.b32.xlu0 %v4352_v42, %s3673_s26  ;;  %v610_v46 = vsel %vm609_vm0, %v607_v45, %v604_v55  ;;  %v1694_v17 = vmul.f32 0.6931472, %v3546_v27  ;;  %v3548_v33 = vpop.eup %3547 }
0x2e8e   :  { %v611_v11 = vsel %vm598_vm4, %v4435_v52, %v610_v46  ;;  %v1165_v50 = vsel %vm1164_vm5, %v1162_v20, %v1159_v18  ;;  %v2229_v10 = vmul.f32 0.6931472, %v3548_v33 }
0x2e8f   :  { %v646_v28 = vmul.f32 %v611_v11, %v611_v11  ;;  %v1166_v36 = vsel %vm1153_vm6, %v4440_v61, %v1165_v50  ;;  %3549 = vlog2.f32 %v611_v11  ;;  %v1700_v31 = vsel %vm1699_vm8, %v1697_v15, %v1694_v17 }
0x2e90   :  { %v1201_v39 = vmul.f32 %v1166_v36, %v1166_v36  ;;  %v1701_v12 = vsel %vm1688_vm10, %v4445_v23, %v1700_v31  ;;  %v2235_v35 = vsel %vm2234_vm11, %v2232_v41, %v2229_v10 }
0x2e91   :  { %2245 = vrot.lane.b32.xlu1 %v4242_v34, %s3673_s26  ;;  %3551 = vrcp.f32 %v646_v28  ;;  %v1736_v32 = vmul.f32 %v1701_v12, %v1701_v12  ;;  %v2236_v8 = vsel %vm2223_vm12, %v4450_v53, %v2235_v35 }
0x2e92   :  { %3553 = vlog2.f32 %v1166_v36  ;;  %v2271_v58 = vmul.f32 %v2236_v8, %v2236_v8 }
0x2e93   :  { %3555 = vrcp.f32 %v1201_v39 }
0x2e94   :  { %3557 = vlog2.f32 %v1701_v12 }
0x2e95   :  { %640 = vrot.lane.b32.xlu1 %v638_v14, %s3673_s26  ;;  %v1721_v14 = vpop.permute.xlu0 %1720  ;;  %3559 = vrcp.f32 %v1736_v32 }
0x2e96   :  { %v1723_v5 = vadd.f32 %v1721_v14, %v4392_v63  ;;  %3561 = vlog2.f32 %v2236_v8 }
0x2e97   :  { %3563 = vrcp.f32 %v2271_v58 }
0x2e9c   :  { %v3550_v0 = vpop.eup %3549 }
0x2e9d   :  { %v657_v29 = vmul.f32 0.6931472, %v3550_v0 }
0x2e9e   :  { %v3552_v40 = vpop.eup %3551 }
0x2e9f   :  { %v3554_v55 = vpop.eup %3553  ;;  %v658_v43 = vmul.f32 2.0, %v657_v29 }
0x2ea0   :  { %v1212_v45 = vmul.f32 0.6931472, %v3554_v55 }
0x2ea2   :  { %v1213_v56 = vmul.f32 2.0, %v1212_v45 }
0x2eeb   :  { %v1186_v9 = vpop.permute.xlu1 %1185 }
0x2eec   :  { %v1188_v21 = vadd.f32 %v1186_v9, %v4387_v37 }
0x2eef   :  { %v1191_v26 = vpop.permute.xlu1 %1190  ;;  %v2256_v49 = vpop.permute.xlu0 %2255 }
0x2ef0   :  { %v1193_v38 = vmul.f32 %v1191_v26, %v1188_v21  ;;  %v2258_v7 = vadd.f32 %v2256_v49, %v4398_v51  ;;  %v3556_v51 = vpop.eup %3555  ;;  %v840_v26 = vld [vmem:[%s4537_s0 + $0x8] sm:$0xff] }
0x2ef1   :  { %v3558_v47 = vpop.eup %3557  ;;  %v1203_v49 = vsub.f32 %v840_v26, %v4440_v61  ;;  %v1910_v61 = vld [vmem:[%s4537_s0 + $0x18] sm:$0xff] }
0x2ef2   :  { %1195 = vrot.lane.b32.xlu0 %v1193_v38, %s3673_s26  ;;  %v1747_v3 = vmul.f32 0.6931472, %v3558_v47 }
0x2ef3   :  { %v1726_v37 = vpop.permute.xlu1 %1725  ;;  %v2790_v44 = vpop.permute.xlu0 %2789 }
0x2ef4   :  { %v1728_v1 = vmul.f32 %v1726_v37, %v1723_v5  ;;  %v2792_v4 = vadd.f32 %v2790_v44, %v4404_v13  ;;  %v3560_v13 = vpop.eup %3559  ;;  %v1748_v18 = vmul.f32 2.0, %v1747_v3  ;;  %v1375_v37 = vld [vmem:[%s4537_s0 + $0x10] sm:$0xff] }
0x2ef5   :  { %v3562_v46 = vpop.eup %3561  ;;  %v1738_v44 = vsub.f32 %v1375_v37, %v4445_v23 }
0x2ef6   :  { %1730 = vrot.lane.b32.xlu1 %v1728_v1, %s3673_s26  ;;  %v2282_v27 = vmul.f32 0.6931472, %v3562_v46  ;;  %v3564_v20 = vpop.eup %3563  ;;  %v1204_v1 = vmul.f32 %v1203_v49, %v1203_v49 }
0x2ef7   :  { %v2261_v6 = vpop.permute.xlu1 %2260  ;;  %v621_v15 = vpop.permute.xlu0 %620  ;;  %v1739_v0 = vmul.f32 %v1738_v44, %v1738_v44 }
0x2ef8   :  { %v2263_v63 = vmul.f32 %v2261_v6, %v2258_v7  ;;  %v2283_v57 = vmul.f32 2.0, %v2282_v27  ;;  %3565 = vrcp.f32 %v621_v15 }
0x2efa   :  { %2265 = vrot.lane.b32.xlu0 %v2263_v63, %s3673_s26 }
0x2efb   :  { %v2795_v60 = vpop.permute.xlu1 %2794  ;;  %v1711_v36 = vpop.permute.xlu0 %1710 }
0x2efc   :  { %v2797_v24 = vmul.f32 %v2795_v60, %v2792_v4 }
0x2efe   :  { %651 = vrot.lane.b32.xlu0 %v3552_v40, %s3663_s10  ;;  %2799 = vrot.lane.b32.xlu1 %v2797_v24, %s3673_s26  ;;  %v2273_v24 = vsub.f32 %v1910_v61, %v4450_v53 }
0x2eff   :  { %v1176_v9 = vpop.permute.xlu1 %1175  ;;  %v2780_v31 = vpop.permute.xlu0 %2779 }
0x2f00   :  { %3567 = vrcp.f32 %v1176_v9 }
0x2f01   :  { %3569 = vrcp.f32 %v1711_v36 }
0x2f02   :  { %1206 = vrot.lane.b32.xlu0 %v3556_v51, %s3663_s10  ;;  %660 = vrot.lane.b32.xlu1 %v658_v43, %s3663_s10  ;;  %v2274_v43 = vmul.f32 %v2273_v24, %v2273_v24 }
0x2f03   :  { %v2246_v54 = vpop.permute.xlu1 %2245 }
0x2f04   :  { %3571 = vrcp.f32 %v2246_v54 }
0x2f06   :  { %1741 = vrot.lane.b32.xlu0 %v3560_v13, %s3663_s10  ;;  %1215 = vrot.lane.b32.xlu1 %v1213_v56, %s3663_s10 }
0x2f07   :  { %v4479_v48 = vpop.permute.xlu1 %640 }
0x2f0a   :  { %2276 = vrot.lane.b32.xlu0 %v3564_v20, %s3663_s10  ;;  %1750 = vrot.lane.b32.xlu1 %v1748_v18, %s3663_s10 }
0x2f0e   :  { %2285 = vrot.lane.b32.xlu1 %v2283_v57, %s3663_s10  ;;  %v3566_v57 = vpop.eup %3565 }
0x2f31   :  { %v2706_v11 = vpop.f32.mrf.mxu0 }
0x2f32   :  { %v2707_v2 = vadd.f32 %v2706_v11, %v3887_v16  ;;  %v193_v16 = vld [vmem:[%s4537_s0] sm:$0xff]  ;;  %v3568_v11 = vpop.eup %3567 }
0x2f33   :  { %v3401_v59 = vpop.f32.mrf.mxu0  ;;  %v648_v39 = vsub.f32 %v193_v16, %v4435_v52 }
0x2f34   :  { %v2712_v50 = vmax.f32 %v2707_v2, 0.0  ;;  %v624_v2 = vmul.f32 %v3566_v57, %v3831_v30  ;;  %v3570_v59 = vpop.eup %3569 }
0x2f35   :  { %v2709_v17 = vpop.f32.mrf.mxu0  ;;  %v649_v38 = vmul.f32 %v648_v39, %v648_v39 }
0x2f36   :  { %v2713_v33 = vpack.c.bf16 %v2712_v50, %v2712_v50  ;;  %v1179_v50 = vmul.f32 %v3568_v11, %v3982_v62 }
0x2f37   :  { %v3402_v28 = vpop.f32.mrf.mxu0 }
0x2f38   :  { %3408 = vmatmul.mubr.msk.bf16.vlgmr.msra.gmra.mxu1 %vm497_vm9, %v2713_v33  ;;  %v1714_v33 = vmul.f32 %v3570_v59, %v4100_v25 }
0x2f64   :  { %v4481_v14 = vpop.permute.xlu0 %1195 }
0x2f68   :  { %v4486_v10 = vpop.permute.xlu1 %1730 }
0x2f6c   :  { %v4488_v21 = vpop.permute.xlu0 %2265 }
0x2f70   :  { %v652_v12 = vpop.permute.xlu0 %651  ;;  %v4494_v41 = vpop.permute.xlu1 %2799 }
0x2f71   :  { %v654_v35 = vmul.f32 %v652_v12, %v649_v38 }
0x2f74   :  { %v1207_v5 = vpop.permute.xlu0 %1206  ;;  %v661_v32 = vpop.permute.xlu1 %660 }
0x2f75   :  { %v663_v8 = vadd.f32 %v661_v32, %v654_v35  ;;  %v1209_v52 = vmul.f32 %v1207_v5, %v1204_v1 }
0x2f77   :  { %v664_v7 = vadd.f32 1.837877, %v663_v8 }
0x2f78   :  { %v1742_v58 = vpop.permute.xlu0 %1741  ;;  %v1216_v63 = vpop.permute.xlu1 %1215 }
0x2f79   :  { %v1210_v6 = vadd.f32 %v1209_v52, %v664_v7  ;;  %v1744_v60 = vmul.f32 %v1742_v58, %v1739_v0 }
0x2f7b   :  { %v1218_v4 = vadd.f32 %v1216_v63, %v1210_v6 }
0x2f7c   :  { %v2277_v55 = vpop.permute.xlu0 %2276  ;;  %v1751_v51 = vpop.permute.xlu1 %1750 }
0x2f7d   :  { %v1219_v40 = vadd.f32 1.837877, %v1218_v4  ;;  %v2279_v47 = vmul.f32 %v2277_v55, %v2274_v43 }
0x2f7f   :  { %v1745_v29 = vadd.f32 %v1744_v60, %v1219_v40 }
0x2f81   :  { %v1753_v45 = vadd.f32 %v1751_v51, %v1745_v29 }
0x2f83   :  { %v1754_v23 = vadd.f32 1.837877, %v1753_v45 }
0x2f85   :  { %v4505_v13 = vadd.f32 %v2279_v47, %v1754_v23 }
0x2ff8   :  { %v2751_v56 = vpop.f32.mrf.mxu1 }
0x2ff9   :  { %v4508_v3 = vadd.f32 %v2751_v56, %v4431_v19  ;;  %v3572_v19 = vpop.eup %3571 }
0x2ffa   :  { %v3409_v46 = vpop.f32.mrf.mxu1  ;;  %v2249_v9 = vmul.f32 %v3572_v19, %v4242_v34 }
0x2ffb   :  { %v2758_v18 = vmin.f32 %v4508_v3, 20.0  ;;  %vm2757_vm13 = vcmp.gt.f32.partialorder %v4508_v3, 20.0  ;;  %v2286_v46 = vpop.permute.xlu1 %2285 }
0x2ffc   :  { %v2754_v27 = vpop.f32.mrf.mxu1 }
0x2ffd   :  { %v2759_v53 = vmul.f32 1.442695, %v2758_v18  ;;  %v2288_v18 = vadd.f32 %v2286_v46, %v4505_v13 }
0x2ffe   :  { %v3410_v20 = vpop.f32.mrf.mxu1 }
0x2fff   :  { %3573 = vpow2.f32 %v2759_v53  ;;  %v2289_v20 = vadd.f32 1.837877, %v2288_v18 }
0x3000   :  { %3575 = vrcp.f32 %v2780_v31 }
0x3001   :  { %3577 = vlog2.f32 %v624_v2 }
0x3002   :  { %3579 = vlog2.f32 %v1179_v50 }
0x300c   :  { %v3574_v17 = vpop.eup %3573 }
0x300d   :  { %v2761_v28 = vadd.f32 1.0, %v3574_v17  ;;  %v3576_v15 = vpop.eup %3575  ;;  %v2764_v30 = vmul.f32 -0.5, %v3574_v17  ;;  %v2767_v62 = vand.u32 2147483647, %v3574_v17 }
0x300e   :  { %v2783_v36 = vmul.f32 %v3576_v15, %v4352_v42  ;;  %v3578_v31 = vpop.eup %3577 }
0x300f   :  { %3581 = vlog2.f32 %v2761_v28  ;;  %v2765_v54 = vadd.f32 1.0, %v2764_v30  ;;  %v3580_v16 = vpop.eup %3579  ;;  %vm2768_vm9 = vcmp.lt.f32.partialorder %v2767_v62, 0.0004427343  ;;  %v626_v38 = vmul.f32 0.6931472, %v3578_v31 }
0x3010   :  { %3583 = vlog2.f32 %v1714_v33  ;;  %v1181_v49 = vmul.f32 0.6931472, %v3580_v16 }
0x3011   :  { %3585 = vlog2.f32 %v2249_v9  ;;  %v2766_v12 = vmul.f32 %v3574_v17, %v2765_v54  ;;  %v627_v1 = vmul.f32 2.0, %v626_v38 }
0x3012   :  { %3587 = vlog2.f32 %v2783_v36  ;;  %v1182_v8 = vmul.f32 2.0, %v1181_v49 }
0x3013   :  { %v643_v58 = vadd.f32 %v4479_v48, %v627_v1 }
0x3014   :  { %v1198_v7 = vadd.f32 %v4481_v14, %v1182_v8 }
0x3015   :  { %v2899_v40 = vadd.f32 -1.0, %v643_v58 }
0x3016   :  { %v2914_v0 = vadd.f32 -1.0, %v1198_v7 }
0x3018   :  { %v1200_v55 = vadd.f32 %v2914_v0, %v2899_v40 }
0x301c   :  { %v3582_v39 = vpop.eup %3581 }
0x301d   :  { %v2763_v26 = vmul.f32 0.6931472, %v3582_v39  ;;  %v3584_v25 = vpop.eup %3583 }
0x301e   :  { %v3586_v35 = vpop.eup %3585  ;;  %v1716_v5 = vmul.f32 0.6931472, %v3584_v25  ;;  %v2853_v25 = vand.u32 127, %v71_v22 }
0x301f   :  { %v2769_v34 = vsel %vm2768_vm9, %v2766_v12, %v2763_v26  ;;  %v3588_v37 = vpop.eup %3587  ;;  %v2251_v52 = vmul.f32 0.6931472, %v3586_v35 }
0x3020   :  { %v2770_v42 = vsel %vm2757_vm13, %v4508_v3, %v2769_v34  ;;  %v1717_v44 = vmul.f32 2.0, %v1716_v5  ;;  %v2785_v6 = vmul.f32 0.6931472, %v3588_v37 }
0x3021   :  { %v2805_v32 = vmul.f32 %v2770_v42, %v2770_v42  ;;  %3589 = vlog2.f32 %v2770_v42  ;;  %v2252_v61 = vmul.f32 2.0, %v2251_v52 }
0x3022   :  { %v1733_v63 = vadd.f32 %v4486_v10, %v1717_v44  ;;  %v2786_v60 = vmul.f32 2.0, %v2785_v6 }
0x3023   :  { %3591 = vrcp.f32 %v2805_v32  ;;  %v2268_v4 = vadd.f32 %v4488_v21, %v2252_v61  ;;  %v3611_v21 = vld [vmem:[%s4537_s0 + $0x20] sm:$0xff] }
0x3024   :  { %v2925_v24 = vadd.f32 -1.0, %v1733_v63  ;;  %v2802_v29 = vadd.f32 %v4494_v41, %v2786_v60  ;;  %v2807_v41 = vsub.f32 %v3611_v21, %v4508_v3 }
0x3025   :  { %v2936_v51 = vadd.f32 -1.0, %v2268_v4 }
0x3026   :  { %v1735_v45 = vadd.f32 %v2925_v24, %v1200_v55  ;;  %v2947_v14 = vadd.f32 -1.0, %v2802_v29  ;;  %v2808_v27 = vmul.f32 %v2807_v41, %v2807_v41 }
0x3028   :  { %v2270_v56 = vadd.f32 %v2936_v51, %v1735_v45 }
0x302a   :  { %v2804_v10 = vadd.f32 %v2947_v14, %v2270_v56 }
0x302e   :  { %v3590_v43 = vpop.eup %3589 }
0x302f   :  { %v2816_v47 = vmul.f32 0.6931472, %v3590_v43 }
0x3030   :  { %v3592_v23 = vpop.eup %3591 }
0x3031   :  { %2810 = vrot.lane.b32.xlu0 %v3592_v23, %s3663_s10  ;;  %v2817_v48 = vmul.f32 2.0, %v2816_v47 }
0x3033   :  { %2819 = vrot.lane.b32.xlu1 %v2817_v48, %s3663_s10 }
0x3035   :  { %2825 = vrot.lane.b32.xlu0 %v2804_v10, %s3670_s19 }
0x30a3   :  { %v2811_v53 = vpop.permute.xlu0 %2810 }
0x30a4   :  { %v2813_v57 = vmul.f32 %v2811_v53, %v2808_v27 }
0x30a5   :  { %v2820_v2 = vpop.permute.xlu1 %2819 }
0x30a6   :  { %v2814_v11 = vadd.f32 %v2813_v57, %v2289_v20 }
0x30a7   :  { %v2826_v59 = vpop.permute.xlu0 %2825 }
0x30a8   :  { %v2822_v50 = vadd.f32 %v2820_v2, %v2814_v11  ;;  %v2828_v19 = vsel %vm410_vm7, %v2826_v59, 0.0 }
0x30a9   :  { %2829 = vadd.xlane.f32.xlu1 %v2828_v19 }
0x30aa   :  { %v2823_v17 = vadd.f32 1.837877, %v2822_v50 }
0x30ac   :  { %v2840_v33 = vsel %vm410_vm7, %v2823_v17, 0.0  ;;  %vm2854_vm7 = vcmp.eq.s32.totalorder %v2853_v25, 0 }
0x30ad   :  { %2841 = vadd.xlane.f32.xlu0 %v2840_v33 }
0x3132   :  { %v2830_v28 = vpop.xlane.xlu1 %2829 }
0x3133   :  { %v2831_v3 = vrot.slane %v2830_v28, 4 }
0x3135   :  { %v2832_v15 = vadd.f32 %v2831_v3, %v2830_v28 }
0x3136   :  { %v2842_v9 = vpop.xlane.xlu0 %2841 }
0x3137   :  { %v2833_v13 = vrot.slane %v2832_v15, 2  ;;  %v2843_v36 = vrot.slane %v2842_v9, 4 }
0x3139   :  { %v2844_v30 = vadd.f32 %v2843_v36, %v2842_v9  ;;  %v2834_v54 = vadd.f32 %v2833_v13, %v2832_v15 }
0x313b   :  { %v2845_v31 = vrot.slane %v2844_v30, 2  ;;  %v2835_v62 = vrot.slane %v2834_v54, 1 }
0x313d   :  { %v2846_v16 = vadd.f32 %v2845_v31, %v2844_v30  ;;  %v2836_v39 = vadd.f32 %v2835_v62, %v2834_v54 }
0x313f   :  { %3411 = vpush %v2836_v39  ;;  %v2847_v26 = vrot.slane %v2846_v16, 1 }
0x3141   :  { %v2848_v12 = vadd.f32 %v2847_v26, %v2846_v16 }
0x3143   :  { %3413 = vpush %v2848_v12 }
0x3170   :  { %s3412_s0 = spop %3411 }
0x3171   :  { %v2838_v38 = vstv %s3412_s0 }
0x3172   :  { %v2839_v34 = vmul.f32 0.5, %v2838_v38 }
0x3174   :  { %s3414_s10 = spop %3413 }
0x3175   :  { %v2850_v49 = vstv %s3414_s10 }
0x3176   :  { %v2851_v35 = vmul.f32 0.5, %v2850_v49 }
0x3178   :  { %v2855_v42 = vsel %vm2854_vm7, %v2839_v34, %v2851_v35 }
0x3179   :  { %2857 = vst.msk [vmem:[#allocation5] sm:$0x1] %vm2856_vm14, %v2855_v42 }
0x317a   :  { %3643 = shalt.err (!%p3640_p9)
}
0x317b   :  { %2867 = dma.vmem_to_hbm [thread:$0]  %s2865_s14, 16, %s4541_s4, [#allocation4]  }
0x317c   :  { %3654 = dma.done.wait [#allocation4], 16  }
0x317d   :  { %3655 = vsyncadd [#allocation4], 4294967280 }
0x317e   :  { %2871 = vsyncpa [#allocation3], 1 }
0x317f   :  { %2872 = vsyncpa [#allocation4], 1 }

</bundles_post_ra>
